<compile_context>
chip_gen: v5e
topology: v5e:2x2
jax: 0.10.0
libtpu: 0.0.40
codegen_flags: <defaults>
</compile_context>

<pallas_src>
import math

import numpy as np
import jax
import jax.numpy as jnp
from jax import lax
from jax.experimental import pallas as pl
from jax.experimental.pallas import tpu as pltpu

LN_EPS = 1e-5  # nn.TransformerEncoderLayer default layer_norm_eps


def _layernorm(x, g, b):
    mu = jnp.mean(x, axis=-1, keepdims=True)
    var = jnp.mean((x - mu) ** 2, axis=-1, keepdims=True)
    return (x - mu) * jax.lax.rsqrt(var + LN_EPS) * g + b


def _make_kernel(B, S, F, H, FF, NH, DH, L):
    BS = B * S
    H3 = 3 * H
    scale = 1.0 / math.sqrt(DH)

    def kernel(x_ref, pe_ref, const_ref, wmisc_ref, wl_ref, bias_ref, out_ref):
        f32, bf16 = jnp.float32, jnp.bfloat16

        # hoisted constants: additive block-diagonal batch mask and pooling matrix
        mask = const_ref[0:BS, :]                      # (BS, BS) f32, 0 / -1e9

        # ---- embedding + (positional encoding + embedding bias); rows r = b*S+s ----
        w_emb = wmisc_ref[0:F, :]                      # (F, H) bf16
        h = jnp.dot(x_ref[...].astype(bf16), w_emb,
                    preferred_element_type=f32) + pe_ref[...]          # (BS, H) f32

        # ---- encoder layers (Python-unrolled; all weights VMEM-resident) ----
        for l in range(L):
            bl = bias_ref[l]                           # (16, H) f32; rows 0..9 used

            # fused QKV projection: one lane-dense (BS,H) x (H,3H) matmul
            qkv = jnp.dot(h.astype(bf16), wl_ref[l, :, 0:H3],
                          preferred_element_type=f32)                  # (BS, 3H)
            q_all = qkv[:, 0:H] + bl[0]
            k_all = qkv[:, H:2 * H] + bl[1]
            v_all = qkv[:, 2 * H:3 * H] + bl[2]

            # per-head masked full-(BS,BS) attention
            ctx_heads = []
            for hh in range(NH):
                sl = slice(hh * DH, (hh + 1) * DH)
                qh = q_all[:, sl].astype(bf16)
                kh = k_all[:, sl].astype(bf16)
                vh = v_all[:, sl].astype(bf16)
                # q @ k^T via dot_general (contract last dims) — no k relayout
                s = lax.dot_general(qh, kh, (((1,), (1,)), ((), ())),
                                    preferred_element_type=f32)        # (BS, BS)
                s = s * scale + mask                   # mask before max (avoid NaN)
                m = jnp.max(s, axis=-1, keepdims=True)
                e = jnp.exp(s - m)                     # masked entries -> exactly 0
                denom = jnp.sum(e, axis=-1, keepdims=True)
                ctx = jnp.dot(e.astype(bf16), vh, preferred_element_type=f32)
                ctx_heads.append(ctx * pl.reciprocal(denom, approx=True))
            ctx_all = jnp.concatenate(ctx_heads, axis=-1)              # (BS, H) f32

            # fused output projection (single K=H matmul) + residual + LayerNorm
            attn = jnp.dot(ctx_all.astype(bf16), wl_ref[l, :, H3:H3 + H],
                           preferred_element_type=f32) + bl[3]
            h = _layernorm(h + attn, bl[4], bl[5])

            # feed-forward (relu) + residual + LayerNorm
            f1 = jnp.maximum(
                jnp.dot(h.astype(bf16), wl_ref[l, :, H3 + H:H3 + H + FF],
                        preferred_element_type=f32) + bl[6], 0.0)
            ff = jnp.dot(f1.astype(bf16), wl_ref[l, :, H3 + H + FF:H3 + H + FF + H],
                         preferred_element_type=f32) + bl[7]
            h = _layernorm(h + ff, bl[8], bl[9])

        # ---- x.mean(dim=1): batch-axis pooling as a matmul, fused with fc ----
        pool = const_ref[BS:BS + S, :].astype(bf16)    # (S, BS), entries 1/B
        pooled = jnp.dot(pool, h.astype(bf16), preferred_element_type=f32)   # (S, H)
        w_fc = wmisc_ref[F:F + H, :]                   # (H, OUTP) bf16, lane-dense
        out_ref[...] = (jnp.dot(pooled.astype(bf16), w_fc,
                                preferred_element_type=f32)
                        + bias_ref[L, 0])              # (S, OUTP) full (8,128) store

    return kernel


def stock_transformer_pallas(x_sbf, pe_sh, params, *, num_heads):
    """x_sbf: (S, B, F) float32; returns (S, OUT) float32."""
    S, B, F = x_sbf.shape
    H = params["w_emb"].shape[1]
    L = params["wq"].shape[0]
    NH = num_heads
    DH = H // NH
    FF = params["w1"].shape[2]
    OUT = params["w_fc"].shape[1]
    OUTP = 128 * pl.cdiv(OUT, 128)                 # lane-dense classifier width
    BS = B * S
    f32, bf16 = jnp.float32, jnp.bfloat16

    # The module always sets dim_feedforward = hidden_dim; these equalities also let
    # w2 / wfc / bfc share the packed slabs below.
    assert FF == H and OUTP == H, "packing layout assumes FF == H == padded OUT width"

    # ---- activation-side operands; rows ordered r = b*S + s ----
    x_rows = jnp.transpose(x_sbf, (1, 0, 2)).reshape(BS, F)
    pe_bemb = jnp.tile(pe_sh[:S], (B, 1)) + params["b_emb"]        # fold b_emb into PE

    # ---- constants slab: attention batch mask + pooling matrix ----
    bidx = jnp.arange(BS) // S
    mask = jnp.where(bidx[:, None] == bidx[None, :], 0.0, -1e9).astype(f32)   # (BS,BS)
    pool = ((jnp.arange(BS)[None, :] % S) == jnp.arange(S)[:, None]).astype(f32) / B
    consts = jnp.concatenate([mask, pool], axis=0)                  # (BS+S, BS) f32

    # ---- packed bf16 weight slabs (f32 accumulation happens in-kernel) ----
    def heads_to_cols(w):                          # (L, NH, H, DH) -> (L, H, NH*DH)
        return jnp.transpose(w, (0, 2, 1, 3)).reshape(L, H, NH * DH)

    wqkv = jnp.concatenate([heads_to_cols(params["wq"]),
                            heads_to_cols(params["wk"]),
                            heads_to_cols(params["wv"])], axis=-1)  # (L, H, 3H)
    wo = params["wo"].reshape(L, NH * DH, H)                        # (L, H, H)
    w_layers = jnp.concatenate(
        [wqkv, wo, params["w1"], params["w2"]], axis=-1).astype(bf16)   # (L, H, 6H)

    wfc_pad = jnp.zeros((H, OUTP), f32).at[:, :OUT].set(params["w_fc"])
    w_misc = jnp.concatenate([params["w_emb"], wfc_pad], axis=0).astype(bf16)  # (F+H, H)

    # ---- packed f32 bias / LayerNorm slab (VPU-side adds stay f32) ----
    def brow(a):                                   # -> (L, H)
        return a.reshape(L, -1)

    bias = jnp.zeros((L + 1, 16, H), f32)
    rows = [brow(params["bq"]), brow(params["bk"]), brow(params["bv"]),
            brow(params["bo"]),
            brow(params["ln1_g"]), brow(params["ln1_b"]),
            brow(params["b1"]), brow(params["b2"]),
            brow(params["ln2_g"]), brow(params["ln2_b"])]
    for r, a in enumerate(rows):
        bias = bias.at[:L, r, :].set(a)
    bias = bias.at[L, 0, :OUT].set(params["b_fc"][0])               # padded fc bias

    kernel = _make_kernel(B, S, F, H, FF, NH, DH, L)
    operands = (x_rows, pe_bemb, consts, w_misc, w_layers, bias)
    vmem_spec = pl.BlockSpec(memory_space=pltpu.MemorySpace.VMEM)
    out_padded = pl.pallas_call(
        kernel,
        out_shape=jax.ShapeDtypeStruct((S, OUTP), jnp.float32),
        in_specs=[vmem_spec] * len(operands),
        out_specs=vmem_spec,
    )(*operands)
    return out_padded[:, :OUT]


# --------------------------- plain-JAX reference ---------------------------
# Mirrors the PyTorch forward (eval mode) with the standard per-head / per-batch
# attention structure.  Matmul operands are cast to bf16 (f32 accumulation) to match
# the TPU-MXU precision policy of the kernel; everything else is f32.

def positional_encoding(max_len, d_model):
    position = np.arange(max_len, dtype=np.float32)[:, None]
    div_term = np.exp(np.arange(0, d_model, 2, dtype=np.float32)
                      * (-np.log(10000.0) / d_model))
    pe = np.zeros((max_len, d_model), np.float32)
    pe[:, 0::2] = np.sin(position * div_term)
    pe[:, 1::2] = np.cos(position * div_term)
    return jnp.asarray(pe)


def reference_forward(x_sbf, pe_sh, p, *, num_heads):
    S, B, F = x_sbf.shape
    H = p["w_emb"].shape[1]
    L = p["wq"].shape[0]
    NH = num_heads
    DH = H // NH
    scale = 1.0 / math.sqrt(DH)
    f32 = jnp.float32
    bf = lambda a: a.astype(jnp.bfloat16)

    def ln(x, g, b):
        mu = x.mean(-1, keepdims=True)
        var = ((x - mu) ** 2).mean(-1, keepdims=True)
        return (x - mu) * jax.lax.rsqrt(var + LN_EPS) * g + b

    h = jnp.einsum('sbf,fh->sbh', bf(x_sbf), bf(p["w_emb"]),
                   preferred_element_type=f32) + p["b_emb"][0]
    h = h + pe_sh[:S][:, None, :]
    for l in range(L):
        ao = jnp.zeros_like(h)
        for hh in range(NH):
            q = jnp.einsum('sbh,hd->sbd', bf(h), bf(p["wq"][l, hh]),
                           preferred_element_type=f32) + p["bq"][l, hh, 0]
            k = jnp.einsum('sbh,hd->sbd', bf(h), bf(p["wk"][l, hh]),
                           preferred_element_type=f32) + p["bk"][l, hh, 0]
            v = jnp.einsum('sbh,hd->sbd', bf(h), bf(p["wv"][l, hh]),
                           preferred_element_type=f32) + p["bv"][l, hh, 0]
            s = jnp.einsum('qbd,kbd->bqk', bf(q), bf(k),
                           preferred_element_type=f32) * scale
            m = s.max(-1, keepdims=True)
            e = jnp.exp(s - m)
            denom = jnp.transpose(e.sum(-1, keepdims=True), (1, 0, 2))   # (S,B,1)
            ctx = jnp.einsum('bqk,kbd->qbd', bf(e), bf(v),
                             preferred_element_type=f32) / denom
            ao = ao + jnp.einsum('qbd,dh->qbh', bf(ctx), bf(p["wo"][l, hh]),
                                 preferred_element_type=f32)
        h = ln(h + ao + p["bo"][l, 0], p["ln1_g"][l, 0], p["ln1_b"][l, 0])
        f1 = jnp.maximum(jnp.einsum('sbh,hf->sbf', bf(h), bf(p["w1"][l]),
                                    preferred_element_type=f32) + p["b1"][l, 0], 0.0)
        ff = jnp.einsum('sbf,fh->sbh', bf(f1), bf(p["w2"][l]),
                        preferred_element_type=f32) + p["b2"][l, 0]
        h = ln(h + ff, p["ln2_g"][l, 0], p["ln2_b"][l, 0])
    pooled = h.mean(axis=1)                            # x.mean(dim=1): over batch
    return jnp.einsum('sh,ho->so', bf(pooled), bf(p["w_fc"]),
                      preferred_element_type=f32) + p["b_fc"][0]


def init_params(key, F, H, FF, NH, L, OUT):
    DH = H // NH
    std = 0.05
    ks = iter(jax.random.split(key, 32))

    def nrm(shape, s=std):
        return jax.random.normal(next(ks), shape, jnp.float32) * s

    return {
        "w_emb": nrm((F, H)), "b_emb": nrm((1, H)),
        "wq": nrm((L, NH, H, DH)), "bq": nrm((L, NH, 1, DH)),
        "wk": nrm((L, NH, H, DH)), "bk": nrm((L, NH, 1, DH)),
        "wv": nrm((L, NH, H, DH)), "bv": nrm((L, NH, 1, DH)),
        "wo": nrm((L, NH, DH, H)), "bo": nrm((L, 1, H)),
        "ln1_g": 1.0 + nrm((L, 1, H)), "ln1_b": nrm((L, 1, H)),
        "w1": nrm((L, H, FF)), "b1": nrm((L, 1, FF)),
        "w2": nrm((L, FF, H)), "b2": nrm((L, 1, H)),
        "ln2_g": 1.0 + nrm((L, 1, H)), "ln2_b": nrm((L, 1, H)),
        "w_fc": nrm((H, OUT)), "b_fc": nrm((1, OUT)),
    }


if __name__ == "__main__":
    # StockTransformer(input_dim=16, output_dim=1, num_layers=2, num_heads=4,
    #                  hidden_dim=128)  -> dim_feedforward = hidden_dim = 128
    S, B = 8, 4
    F_IN, OUT = 16, 1
    L, NH, H = 2, 4, 128
    FF = H

    key = jax.random.PRNGKey(0)
    k_x, k_p = jax.random.split(key)
    x = jax.random.normal(k_x, (S, B, F_IN), jnp.float32)   # (seq, batch, features)
    pe = positional_encoding(S, H)
    params = init_params(k_p, F_IN, H, FF, NH, L, OUT)

    out = stock_transformer_pallas(x, pe, params, num_heads=NH)
    out = jax.block_until_ready(out)

    ref = reference_forward(x, pe, params, num_heads=NH)
    # Tolerance accounts for approx-reciprocal softmax, bf16 pooling matmul and
    # fused-vs-per-head accumulation-order differences (all << 1e-2 here).
    np.testing.assert_allclose(np.asarray(out), np.asarray(ref), atol=1e-2, rtol=1e-2)

    print("KERNEL_OK")
</pallas_src>

<mosaic_0001>
module attributes {stable_mosaic.version = 11 : i64} {
  func.func @kernel(%arg0: memref<32x16xf32, #tpu.memory_space<vmem>>, %arg1: memref<32x128xf32, #tpu.memory_space<vmem>>, %arg2: memref<40x32xf32, #tpu.memory_space<vmem>>, %arg3: memref<144x128xbf16, #tpu.memory_space<vmem>>, %arg4: memref<2x128x768xbf16, #tpu.memory_space<vmem>>, %arg5: memref<3x16x128xf32, #tpu.memory_space<vmem>>, %arg6: memref<8x128xf32, #tpu.memory_space<vmem>>) attributes {dimension_semantics = [], scalar_prefetch = 0 : i64, scratch_operands = 0 : i64, tpu.core_type = #tpu.core_type<tc>} {
    %c0 = arith.constant 0 : index
    %c0_0 = arith.constant 0 : index
    %0 = vector.load %arg2[%c0, %c0_0] : memref<40x32xf32, #tpu.memory_space<vmem>>, vector<32x32xf32>
    %c0_1 = arith.constant 0 : index
    %c0_2 = arith.constant 0 : index
    %1 = vector.load %arg3[%c0_1, %c0_2] : memref<144x128xbf16, #tpu.memory_space<vmem>>, vector<16x128xbf16>
    %c0_3 = arith.constant 0 : index
    %c0_4 = arith.constant 0 : index
    %2 = vector.load %arg0[%c0_3, %c0_4] : memref<32x16xf32, #tpu.memory_space<vmem>>, vector<32x16xf32>
    %3 = arith.truncf %2 : vector<32x16xf32> to vector<32x16xbf16>
    %cst = arith.constant dense<0.000000e+00> : vector<32x128xf32>
    %4 = tpu.matmul %3, %1, %cst {dimension_numbers = #tpu.dot_dimension_numbers<[1], [0], [0], [1], [0, 0, 1, 1], [], []>} : vector<32x16xbf16>, vector<16x128xbf16>, vector<32x128xf32> -> vector<32x128xf32>
    %c0_5 = arith.constant 0 : index
    %c0_6 = arith.constant 0 : index
    %5 = vector.load %arg1[%c0_5, %c0_6] : memref<32x128xf32, #tpu.memory_space<vmem>>, vector<32x128xf32>
    %6 = arith.addf %4, %5 : vector<32x128xf32>
    %c0_7 = arith.constant 0 : index
    %c0_8 = arith.constant 0 : index
    %c0_9 = arith.constant 0 : index
    %7 = vector.load %arg5[%c0_7, %c0_8, %c0_9] : memref<3x16x128xf32, #tpu.memory_space<vmem>>, vector<1x16x128xf32>
    %8 = vector.shape_cast %7 : vector<1x16x128xf32> to vector<16x128xf32>
    %9 = arith.truncf %6 : vector<32x128xf32> to vector<32x128xbf16>
    %c0_10 = arith.constant 0 : index
    %c0_11 = arith.constant 0 : index
    %c0_12 = arith.constant 0 : index
    %10 = vector.load %arg4[%c0_10, %c0_11, %c0_12] : memref<2x128x768xbf16, #tpu.memory_space<vmem>>, vector<1x128x384xbf16>
    %11 = vector.shape_cast %10 : vector<1x128x384xbf16> to vector<128x384xbf16>
    %cst_13 = arith.constant dense<0.000000e+00> : vector<32x384xf32>
    %12 = tpu.matmul %9, %11, %cst_13 {dimension_numbers = #tpu.dot_dimension_numbers<[1], [0], [0], [1], [0, 0, 1, 1], [], []>} : vector<32x128xbf16>, vector<128x384xbf16>, vector<32x384xf32> -> vector<32x384xf32>
    %13 = vector.extract_strided_slice %12 {offsets = [0, 0], sizes = [32, 128], strides = [1, 1]} : vector<32x384xf32> to vector<32x128xf32>
    %14 = vector.extract_strided_slice %8 {offsets = [0, 0], sizes = [1, 128], strides = [1, 1]} : vector<16x128xf32> to vector<1x128xf32>
    %15 = vector.shape_cast %14 : vector<1x128xf32> to vector<128xf32>
    %16 = vector.shape_cast %15 : vector<128xf32> to vector<1x128xf32>
    %17 = vector.broadcast %16 : vector<1x128xf32> to vector<32x128xf32>
    %18 = arith.addf %13, %17 : vector<32x128xf32>
    %19 = vector.extract_strided_slice %12 {offsets = [0, 128], sizes = [32, 128], strides = [1, 1]} : vector<32x384xf32> to vector<32x128xf32>
    %20 = vector.extract_strided_slice %8 {offsets = [1, 0], sizes = [1, 128], strides = [1, 1]} : vector<16x128xf32> to vector<1x128xf32>
    %21 = vector.shape_cast %20 : vector<1x128xf32> to vector<128xf32>
    %22 = vector.shape_cast %21 : vector<128xf32> to vector<1x128xf32>
    %23 = vector.broadcast %22 : vector<1x128xf32> to vector<32x128xf32>
    %24 = arith.addf %19, %23 : vector<32x128xf32>
    %25 = vector.extract_strided_slice %12 {offsets = [0, 256], sizes = [32, 128], strides = [1, 1]} : vector<32x384xf32> to vector<32x128xf32>
    %26 = vector.extract_strided_slice %8 {offsets = [2, 0], sizes = [1, 128], strides = [1, 1]} : vector<16x128xf32> to vector<1x128xf32>
    %27 = vector.shape_cast %26 : vector<1x128xf32> to vector<128xf32>
    %28 = vector.shape_cast %27 : vector<128xf32> to vector<1x128xf32>
    %29 = vector.broadcast %28 : vector<1x128xf32> to vector<32x128xf32>
    %30 = arith.addf %25, %29 : vector<32x128xf32>
    %31 = vector.extract_strided_slice %18 {offsets = [0, 0], sizes = [32, 32], strides = [1, 1]} : vector<32x128xf32> to vector<32x32xf32>
    %32 = arith.truncf %31 : vector<32x32xf32> to vector<32x32xbf16>
    %33 = vector.extract_strided_slice %24 {offsets = [0, 0], sizes = [32, 32], strides = [1, 1]} : vector<32x128xf32> to vector<32x32xf32>
    %34 = arith.truncf %33 : vector<32x32xf32> to vector<32x32xbf16>
    %35 = vector.extract_strided_slice %30 {offsets = [0, 0], sizes = [32, 32], strides = [1, 1]} : vector<32x128xf32> to vector<32x32xf32>
    %36 = arith.truncf %35 : vector<32x32xf32> to vector<32x32xbf16>
    %cst_14 = arith.constant dense<0.000000e+00> : vector<32x32xf32>
    %37 = tpu.matmul %32, %34, %cst_14 {dimension_numbers = #tpu.dot_dimension_numbers<[1], [1], [0], [0], [0, 0, 1, 0], [], []>} : vector<32x32xbf16>, vector<32x32xbf16>, vector<32x32xf32> -> vector<32x32xf32>
    %cst_15 = arith.constant 0.176776692 : f32
    %38 = vector.broadcast %cst_15 : f32 to vector<32x32xf32>
    %39 = arith.mulf %37, %38 : vector<32x32xf32>
    %40 = arith.addf %39, %0 : vector<32x32xf32>
    %cst_16 = arith.constant dense<0xFF800000> : vector<32xf32>
    %41 = vector.multi_reduction <maximumf>, %40, %cst_16 [1] : vector<32x32xf32> to vector<32xf32>
    %42 = vector.shape_cast %41 : vector<32xf32> to vector<32x1xf32>
    %43 = vector.broadcast %42 : vector<32x1xf32> to vector<32x32xf32>
    %44 = arith.subf %40, %43 : vector<32x32xf32>
    %45 = math.exp %44 : vector<32x32xf32>
    %cst_17 = arith.constant dense<0.000000e+00> : vector<32xf32>
    %46 = vector.multi_reduction <add>, %45, %cst_17 [1] : vector<32x32xf32> to vector<32xf32>
    %47 = vector.shape_cast %46 : vector<32xf32> to vector<32x1xf32>
    %48 = arith.truncf %45 : vector<32x32xf32> to vector<32x32xbf16>
    %cst_18 = arith.constant dense<0.000000e+00> : vector<32x32xf32>
    %49 = tpu.matmul %48, %36, %cst_18 {dimension_numbers = #tpu.dot_dimension_numbers<[1], [0], [0], [1], [0, 0, 1, 1], [], []>} : vector<32x32xbf16>, vector<32x32xbf16>, vector<32x32xf32> -> vector<32x32xf32>
    %50 = tpu.reciprocal %47 {approx = true} : vector<32x1xf32> -> vector<32x1xf32>
    %51 = vector.broadcast %50 : vector<32x1xf32> to vector<32x32xf32>
    %52 = arith.mulf %49, %51 : vector<32x32xf32>
    %53 = vector.extract_strided_slice %18 {offsets = [0, 32], sizes = [32, 32], strides = [1, 1]} : vector<32x128xf32> to vector<32x32xf32>
    %54 = arith.truncf %53 : vector<32x32xf32> to vector<32x32xbf16>
    %55 = vector.extract_strided_slice %24 {offsets = [0, 32], sizes = [32, 32], strides = [1, 1]} : vector<32x128xf32> to vector<32x32xf32>
    %56 = arith.truncf %55 : vector<32x32xf32> to vector<32x32xbf16>
    %57 = vector.extract_strided_slice %30 {offsets = [0, 32], sizes = [32, 32], strides = [1, 1]} : vector<32x128xf32> to vector<32x32xf32>
    %58 = arith.truncf %57 : vector<32x32xf32> to vector<32x32xbf16>
    %cst_19 = arith.constant dense<0.000000e+00> : vector<32x32xf32>
    %59 = tpu.matmul %54, %56, %cst_19 {dimension_numbers = #tpu.dot_dimension_numbers<[1], [1], [0], [0], [0, 0, 1, 0], [], []>} : vector<32x32xbf16>, vector<32x32xbf16>, vector<32x32xf32> -> vector<32x32xf32>
    %cst_20 = arith.constant 0.176776692 : f32
    %60 = vector.broadcast %cst_20 : f32 to vector<32x32xf32>
    %61 = arith.mulf %59, %60 : vector<32x32xf32>
    %62 = arith.addf %61, %0 : vector<32x32xf32>
    %cst_21 = arith.constant dense<0xFF800000> : vector<32xf32>
    %63 = vector.multi_reduction <maximumf>, %62, %cst_21 [1] : vector<32x32xf32> to vector<32xf32>
    %64 = vector.shape_cast %63 : vector<32xf32> to vector<32x1xf32>
    %65 = vector.broadcast %64 : vector<32x1xf32> to vector<32x32xf32>
    %66 = arith.subf %62, %65 : vector<32x32xf32>
    %67 = math.exp %66 : vector<32x32xf32>
    %cst_22 = arith.constant dense<0.000000e+00> : vector<32xf32>
    %68 = vector.multi_reduction <add>, %67, %cst_22 [1] : vector<32x32xf32> to vector<32xf32>
    %69 = vector.shape_cast %68 : vector<32xf32> to vector<32x1xf32>
    %70 = arith.truncf %67 : vector<32x32xf32> to vector<32x32xbf16>
    %cst_23 = arith.constant dense<0.000000e+00> : vector<32x32xf32>
    %71 = tpu.matmul %70, %58, %cst_23 {dimension_numbers = #tpu.dot_dimension_numbers<[1], [0], [0], [1], [0, 0, 1, 1], [], []>} : vector<32x32xbf16>, vector<32x32xbf16>, vector<32x32xf32> -> vector<32x32xf32>
    %72 = tpu.reciprocal %69 {approx = true} : vector<32x1xf32> -> vector<32x1xf32>
    %73 = vector.broadcast %72 : vector<32x1xf32> to vector<32x32xf32>
    %74 = arith.mulf %71, %73 : vector<32x32xf32>
    %75 = vector.extract_strided_slice %18 {offsets = [0, 64], sizes = [32, 32], strides = [1, 1]} : vector<32x128xf32> to vector<32x32xf32>
    %76 = arith.truncf %75 : vector<32x32xf32> to vector<32x32xbf16>
    %77 = vector.extract_strided_slice %24 {offsets = [0, 64], sizes = [32, 32], strides = [1, 1]} : vector<32x128xf32> to vector<32x32xf32>
    %78 = arith.truncf %77 : vector<32x32xf32> to vector<32x32xbf16>
    %79 = vector.extract_strided_slice %30 {offsets = [0, 64], sizes = [32, 32], strides = [1, 1]} : vector<32x128xf32> to vector<32x32xf32>
    %80 = arith.truncf %79 : vector<32x32xf32> to vector<32x32xbf16>
    %cst_24 = arith.constant dense<0.000000e+00> : vector<32x32xf32>
    %81 = tpu.matmul %76, %78, %cst_24 {dimension_numbers = #tpu.dot_dimension_numbers<[1], [1], [0], [0], [0, 0, 1, 0], [], []>} : vector<32x32xbf16>, vector<32x32xbf16>, vector<32x32xf32> -> vector<32x32xf32>
    %cst_25 = arith.constant 0.176776692 : f32
    %82 = vector.broadcast %cst_25 : f32 to vector<32x32xf32>
    %83 = arith.mulf %81, %82 : vector<32x32xf32>
    %84 = arith.addf %83, %0 : vector<32x32xf32>
    %cst_26 = arith.constant dense<0xFF800000> : vector<32xf32>
    %85 = vector.multi_reduction <maximumf>, %84, %cst_26 [1] : vector<32x32xf32> to vector<32xf32>
    %86 = vector.shape_cast %85 : vector<32xf32> to vector<32x1xf32>
    %87 = vector.broadcast %86 : vector<32x1xf32> to vector<32x32xf32>
    %88 = arith.subf %84, %87 : vector<32x32xf32>
    %89 = math.exp %88 : vector<32x32xf32>
    %cst_27 = arith.constant dense<0.000000e+00> : vector<32xf32>
    %90 = vector.multi_reduction <add>, %89, %cst_27 [1] : vector<32x32xf32> to vector<32xf32>
    %91 = vector.shape_cast %90 : vector<32xf32> to vector<32x1xf32>
    %92 = arith.truncf %89 : vector<32x32xf32> to vector<32x32xbf16>
    %cst_28 = arith.constant dense<0.000000e+00> : vector<32x32xf32>
    %93 = tpu.matmul %92, %80, %cst_28 {dimension_numbers = #tpu.dot_dimension_numbers<[1], [0], [0], [1], [0, 0, 1, 1], [], []>} : vector<32x32xbf16>, vector<32x32xbf16>, vector<32x32xf32> -> vector<32x32xf32>
    %94 = tpu.reciprocal %91 {approx = true} : vector<32x1xf32> -> vector<32x1xf32>
    %95 = vector.broadcast %94 : vector<32x1xf32> to vector<32x32xf32>
    %96 = arith.mulf %93, %95 : vector<32x32xf32>
    %97 = vector.extract_strided_slice %18 {offsets = [0, 96], sizes = [32, 32], strides = [1, 1]} : vector<32x128xf32> to vector<32x32xf32>
    %98 = arith.truncf %97 : vector<32x32xf32> to vector<32x32xbf16>
    %99 = vector.extract_strided_slice %24 {offsets = [0, 96], sizes = [32, 32], strides = [1, 1]} : vector<32x128xf32> to vector<32x32xf32>
    %100 = arith.truncf %99 : vector<32x32xf32> to vector<32x32xbf16>
    %101 = vector.extract_strided_slice %30 {offsets = [0, 96], sizes = [32, 32], strides = [1, 1]} : vector<32x128xf32> to vector<32x32xf32>
    %102 = arith.truncf %101 : vector<32x32xf32> to vector<32x32xbf16>
    %cst_29 = arith.constant dense<0.000000e+00> : vector<32x32xf32>
    %103 = tpu.matmul %98, %100, %cst_29 {dimension_numbers = #tpu.dot_dimension_numbers<[1], [1], [0], [0], [0, 0, 1, 0], [], []>} : vector<32x32xbf16>, vector<32x32xbf16>, vector<32x32xf32> -> vector<32x32xf32>
    %cst_30 = arith.constant 0.176776692 : f32
    %104 = vector.broadcast %cst_30 : f32 to vector<32x32xf32>
    %105 = arith.mulf %103, %104 : vector<32x32xf32>
    %106 = arith.addf %105, %0 : vector<32x32xf32>
    %cst_31 = arith.constant dense<0xFF800000> : vector<32xf32>
    %107 = vector.multi_reduction <maximumf>, %106, %cst_31 [1] : vector<32x32xf32> to vector<32xf32>
    %108 = vector.shape_cast %107 : vector<32xf32> to vector<32x1xf32>
    %109 = vector.broadcast %108 : vector<32x1xf32> to vector<32x32xf32>
    %110 = arith.subf %106, %109 : vector<32x32xf32>
    %111 = math.exp %110 : vector<32x32xf32>
    %cst_32 = arith.constant dense<0.000000e+00> : vector<32xf32>
    %112 = vector.multi_reduction <add>, %111, %cst_32 [1] : vector<32x32xf32> to vector<32xf32>
    %113 = vector.shape_cast %112 : vector<32xf32> to vector<32x1xf32>
    %114 = arith.truncf %111 : vector<32x32xf32> to vector<32x32xbf16>
    %cst_33 = arith.constant dense<0.000000e+00> : vector<32x32xf32>
    %115 = tpu.matmul %114, %102, %cst_33 {dimension_numbers = #tpu.dot_dimension_numbers<[1], [0], [0], [1], [0, 0, 1, 1], [], []>} : vector<32x32xbf16>, vector<32x32xbf16>, vector<32x32xf32> -> vector<32x32xf32>
    %116 = tpu.reciprocal %113 {approx = true} : vector<32x1xf32> -> vector<32x1xf32>
    %117 = vector.broadcast %116 : vector<32x1xf32> to vector<32x32xf32>
    %118 = arith.mulf %115, %117 : vector<32x32xf32>
    %119 = tpu.concatenate %52, %74, %96, %118 in 1 : vector<32x32xf32>, vector<32x32xf32>, vector<32x32xf32>, vector<32x32xf32> -> vector<32x128xf32>
    %120 = arith.truncf %119 : vector<32x128xf32> to vector<32x128xbf16>
    %c0_34 = arith.constant 0 : index
    %c0_35 = arith.constant 0 : index
    %c384 = arith.constant 384 : index
    %121 = vector.load %arg4[%c0_34, %c0_35, %c384] : memref<2x128x768xbf16, #tpu.memory_space<vmem>>, vector<1x128x128xbf16>
    %122 = vector.shape_cast %121 : vector<1x128x128xbf16> to vector<128x128xbf16>
    %cst_36 = arith.constant dense<0.000000e+00> : vector<32x128xf32>
    %123 = tpu.matmul %120, %122, %cst_36 {dimension_numbers = #tpu.dot_dimension_numbers<[1], [0], [0], [1], [0, 0, 1, 1], [], []>} : vector<32x128xbf16>, vector<128x128xbf16>, vector<32x128xf32> -> vector<32x128xf32>
    %124 = vector.extract_strided_slice %8 {offsets = [3, 0], sizes = [1, 128], strides = [1, 1]} : vector<16x128xf32> to vector<1x128xf32>
    %125 = vector.shape_cast %124 : vector<1x128xf32> to vector<128xf32>
    %126 = vector.shape_cast %125 : vector<128xf32> to vector<1x128xf32>
    %127 = vector.broadcast %126 : vector<1x128xf32> to vector<32x128xf32>
    %128 = arith.addf %123, %127 : vector<32x128xf32>
    %129 = arith.addf %6, %128 : vector<32x128xf32>
    %130 = vector.extract_strided_slice %8 {offsets = [4, 0], sizes = [1, 128], strides = [1, 1]} : vector<16x128xf32> to vector<1x128xf32>
    %131 = vector.shape_cast %130 : vector<1x128xf32> to vector<128xf32>
    %132 = vector.extract_strided_slice %8 {offsets = [5, 0], sizes = [1, 128], strides = [1, 1]} : vector<16x128xf32> to vector<1x128xf32>
    %133 = vector.shape_cast %132 : vector<1x128xf32> to vector<128xf32>
    %cst_37 = arith.constant dense<0.000000e+00> : vector<32xf32>
    %134 = vector.multi_reduction <add>, %129, %cst_37 [1] : vector<32x128xf32> to vector<32xf32>
    %135 = vector.shape_cast %134 : vector<32xf32> to vector<32x1xf32>
    %cst_38 = arith.constant 1.280000e+02 : f32
    %136 = vector.broadcast %cst_38 : f32 to vector<32x1xf32>
    %137 = arith.divf %135, %136 : vector<32x1xf32>
    %138 = vector.broadcast %137 : vector<32x1xf32> to vector<32x128xf32>
    %139 = arith.subf %129, %138 : vector<32x128xf32>
    %140 = arith.mulf %139, %139 : vector<32x128xf32>
    %cst_39 = arith.constant dense<0.000000e+00> : vector<32xf32>
    %141 = vector.multi_reduction <add>, %140, %cst_39 [1] : vector<32x128xf32> to vector<32xf32>
    %142 = vector.shape_cast %141 : vector<32xf32> to vector<32x1xf32>
    %cst_40 = arith.constant 1.280000e+02 : f32
    %143 = vector.broadcast %cst_40 : f32 to vector<32x1xf32>
    %144 = arith.divf %142, %143 : vector<32x1xf32>
    %145 = vector.broadcast %137 : vector<32x1xf32> to vector<32x128xf32>
    %146 = arith.subf %129, %145 : vector<32x128xf32>
    %cst_41 = arith.constant 9.99999974E-6 : f32
    %147 = vector.broadcast %cst_41 : f32 to vector<32x1xf32>
    %148 = arith.addf %144, %147 : vector<32x1xf32>
    %149 = math.rsqrt %148 : vector<32x1xf32>
    %150 = vector.broadcast %149 : vector<32x1xf32> to vector<32x128xf32>
    %151 = arith.mulf %146, %150 : vector<32x128xf32>
    %152 = vector.shape_cast %131 : vector<128xf32> to vector<1x128xf32>
    %153 = vector.broadcast %152 : vector<1x128xf32> to vector<32x128xf32>
    %154 = arith.mulf %151, %153 : vector<32x128xf32>
    %155 = vector.shape_cast %133 : vector<128xf32> to vector<1x128xf32>
    %156 = vector.broadcast %155 : vector<1x128xf32> to vector<32x128xf32>
    %157 = arith.addf %154, %156 : vector<32x128xf32>
    %158 = arith.truncf %157 : vector<32x128xf32> to vector<32x128xbf16>
    %c0_42 = arith.constant 0 : index
    %c0_43 = arith.constant 0 : index
    %c512 = arith.constant 512 : index
    %159 = vector.load %arg4[%c0_42, %c0_43, %c512] : memref<2x128x768xbf16, #tpu.memory_space<vmem>>, vector<1x128x128xbf16>
    %160 = vector.shape_cast %159 : vector<1x128x128xbf16> to vector<128x128xbf16>
    %cst_44 = arith.constant dense<0.000000e+00> : vector<32x128xf32>
    %161 = tpu.matmul %158, %160, %cst_44 {dimension_numbers = #tpu.dot_dimension_numbers<[1], [0], [0], [1], [0, 0, 1, 1], [], []>} : vector<32x128xbf16>, vector<128x128xbf16>, vector<32x128xf32> -> vector<32x128xf32>
    %162 = vector.extract_strided_slice %8 {offsets = [6, 0], sizes = [1, 128], strides = [1, 1]} : vector<16x128xf32> to vector<1x128xf32>
    %163 = vector.shape_cast %162 : vector<1x128xf32> to vector<128xf32>
    %164 = vector.shape_cast %163 : vector<128xf32> to vector<1x128xf32>
    %165 = vector.broadcast %164 : vector<1x128xf32> to vector<32x128xf32>
    %166 = arith.addf %161, %165 : vector<32x128xf32>
    %cst_45 = arith.constant 0.000000e+00 : f32
    %167 = vector.broadcast %cst_45 : f32 to vector<32x128xf32>
    %168 = arith.maximumf %166, %167 : vector<32x128xf32>
    %169 = arith.truncf %168 : vector<32x128xf32> to vector<32x128xbf16>
    %c0_46 = arith.constant 0 : index
    %c0_47 = arith.constant 0 : index
    %c640 = arith.constant 640 : index
    %170 = vector.load %arg4[%c0_46, %c0_47, %c640] : memref<2x128x768xbf16, #tpu.memory_space<vmem>>, vector<1x128x128xbf16>
    %171 = vector.shape_cast %170 : vector<1x128x128xbf16> to vector<128x128xbf16>
    %cst_48 = arith.constant dense<0.000000e+00> : vector<32x128xf32>
    %172 = tpu.matmul %169, %171, %cst_48 {dimension_numbers = #tpu.dot_dimension_numbers<[1], [0], [0], [1], [0, 0, 1, 1], [], []>} : vector<32x128xbf16>, vector<128x128xbf16>, vector<32x128xf32> -> vector<32x128xf32>
    %173 = vector.extract_strided_slice %8 {offsets = [7, 0], sizes = [1, 128], strides = [1, 1]} : vector<16x128xf32> to vector<1x128xf32>
    %174 = vector.shape_cast %173 : vector<1x128xf32> to vector<128xf32>
    %175 = vector.shape_cast %174 : vector<128xf32> to vector<1x128xf32>
    %176 = vector.broadcast %175 : vector<1x128xf32> to vector<32x128xf32>
    %177 = arith.addf %172, %176 : vector<32x128xf32>
    %178 = arith.addf %157, %177 : vector<32x128xf32>
    %179 = vector.extract_strided_slice %8 {offsets = [8, 0], sizes = [1, 128], strides = [1, 1]} : vector<16x128xf32> to vector<1x128xf32>
    %180 = vector.shape_cast %179 : vector<1x128xf32> to vector<128xf32>
    %181 = vector.extract_strided_slice %8 {offsets = [9, 0], sizes = [1, 128], strides = [1, 1]} : vector<16x128xf32> to vector<1x128xf32>
    %182 = vector.shape_cast %181 : vector<1x128xf32> to vector<128xf32>
    %cst_49 = arith.constant dense<0.000000e+00> : vector<32xf32>
    %183 = vector.multi_reduction <add>, %178, %cst_49 [1] : vector<32x128xf32> to vector<32xf32>
    %184 = vector.shape_cast %183 : vector<32xf32> to vector<32x1xf32>
    %cst_50 = arith.constant 1.280000e+02 : f32
    %185 = vector.broadcast %cst_50 : f32 to vector<32x1xf32>
    %186 = arith.divf %184, %185 : vector<32x1xf32>
    %187 = vector.broadcast %186 : vector<32x1xf32> to vector<32x128xf32>
    %188 = arith.subf %178, %187 : vector<32x128xf32>
    %189 = arith.mulf %188, %188 : vector<32x128xf32>
    %cst_51 = arith.constant dense<0.000000e+00> : vector<32xf32>
    %190 = vector.multi_reduction <add>, %189, %cst_51 [1] : vector<32x128xf32> to vector<32xf32>
    %191 = vector.shape_cast %190 : vector<32xf32> to vector<32x1xf32>
    %cst_52 = arith.constant 1.280000e+02 : f32
    %192 = vector.broadcast %cst_52 : f32 to vector<32x1xf32>
    %193 = arith.divf %191, %192 : vector<32x1xf32>
    %194 = vector.broadcast %186 : vector<32x1xf32> to vector<32x128xf32>
    %195 = arith.subf %178, %194 : vector<32x128xf32>
    %cst_53 = arith.constant 9.99999974E-6 : f32
    %196 = vector.broadcast %cst_53 : f32 to vector<32x1xf32>
    %197 = arith.addf %193, %196 : vector<32x1xf32>
    %198 = math.rsqrt %197 : vector<32x1xf32>
    %199 = vector.broadcast %198 : vector<32x1xf32> to vector<32x128xf32>
    %200 = arith.mulf %195, %199 : vector<32x128xf32>
    %201 = vector.shape_cast %180 : vector<128xf32> to vector<1x128xf32>
    %202 = vector.broadcast %201 : vector<1x128xf32> to vector<32x128xf32>
    %203 = arith.mulf %200, %202 : vector<32x128xf32>
    %204 = vector.shape_cast %182 : vector<128xf32> to vector<1x128xf32>
    %205 = vector.broadcast %204 : vector<1x128xf32> to vector<32x128xf32>
    %206 = arith.addf %203, %205 : vector<32x128xf32>
    %c1 = arith.constant 1 : index
    %c0_54 = arith.constant 0 : index
    %c0_55 = arith.constant 0 : index
    %207 = vector.load %arg5[%c1, %c0_54, %c0_55] : memref<3x16x128xf32, #tpu.memory_space<vmem>>, vector<1x16x128xf32>
    %208 = vector.shape_cast %207 : vector<1x16x128xf32> to vector<16x128xf32>
    %209 = arith.truncf %206 : vector<32x128xf32> to vector<32x128xbf16>
    %c1_56 = arith.constant 1 : index
    %c0_57 = arith.constant 0 : index
    %c0_58 = arith.constant 0 : index
    %210 = vector.load %arg4[%c1_56, %c0_57, %c0_58] : memref<2x128x768xbf16, #tpu.memory_space<vmem>>, vector<1x128x384xbf16>
    %211 = vector.shape_cast %210 : vector<1x128x384xbf16> to vector<128x384xbf16>
    %cst_59 = arith.constant dense<0.000000e+00> : vector<32x384xf32>
    %212 = tpu.matmul %209, %211, %cst_59 {dimension_numbers = #tpu.dot_dimension_numbers<[1], [0], [0], [1], [0, 0, 1, 1], [], []>} : vector<32x128xbf16>, vector<128x384xbf16>, vector<32x384xf32> -> vector<32x384xf32>
    %213 = vector.extract_strided_slice %212 {offsets = [0, 0], sizes = [32, 128], strides = [1, 1]} : vector<32x384xf32> to vector<32x128xf32>
    %214 = vector.extract_strided_slice %208 {offsets = [0, 0], sizes = [1, 128], strides = [1, 1]} : vector<16x128xf32> to vector<1x128xf32>
    %215 = vector.shape_cast %214 : vector<1x128xf32> to vector<128xf32>
    %216 = vector.shape_cast %215 : vector<128xf32> to vector<1x128xf32>
    %217 = vector.broadcast %216 : vector<1x128xf32> to vector<32x128xf32>
    %218 = arith.addf %213, %217 : vector<32x128xf32>
    %219 = vector.extract_strided_slice %212 {offsets = [0, 128], sizes = [32, 128], strides = [1, 1]} : vector<32x384xf32> to vector<32x128xf32>
    %220 = vector.extract_strided_slice %208 {offsets = [1, 0], sizes = [1, 128], strides = [1, 1]} : vector<16x128xf32> to vector<1x128xf32>
    %221 = vector.shape_cast %220 : vector<1x128xf32> to vector<128xf32>
    %222 = vector.shape_cast %221 : vector<128xf32> to vector<1x128xf32>
    %223 = vector.broadcast %222 : vector<1x128xf32> to vector<32x128xf32>
    %224 = arith.addf %219, %223 : vector<32x128xf32>
    %225 = vector.extract_strided_slice %212 {offsets = [0, 256], sizes = [32, 128], strides = [1, 1]} : vector<32x384xf32> to vector<32x128xf32>
    %226 = vector.extract_strided_slice %208 {offsets = [2, 0], sizes = [1, 128], strides = [1, 1]} : vector<16x128xf32> to vector<1x128xf32>
    %227 = vector.shape_cast %226 : vector<1x128xf32> to vector<128xf32>
    %228 = vector.shape_cast %227 : vector<128xf32> to vector<1x128xf32>
    %229 = vector.broadcast %228 : vector<1x128xf32> to vector<32x128xf32>
    %230 = arith.addf %225, %229 : vector<32x128xf32>
    %231 = vector.extract_strided_slice %218 {offsets = [0, 0], sizes = [32, 32], strides = [1, 1]} : vector<32x128xf32> to vector<32x32xf32>
    %232 = arith.truncf %231 : vector<32x32xf32> to vector<32x32xbf16>
    %233 = vector.extract_strided_slice %224 {offsets = [0, 0], sizes = [32, 32], strides = [1, 1]} : vector<32x128xf32> to vector<32x32xf32>
    %234 = arith.truncf %233 : vector<32x32xf32> to vector<32x32xbf16>
    %235 = vector.extract_strided_slice %230 {offsets = [0, 0], sizes = [32, 32], strides = [1, 1]} : vector<32x128xf32> to vector<32x32xf32>
    %236 = arith.truncf %235 : vector<32x32xf32> to vector<32x32xbf16>
    %cst_60 = arith.constant dense<0.000000e+00> : vector<32x32xf32>
    %237 = tpu.matmul %232, %234, %cst_60 {dimension_numbers = #tpu.dot_dimension_numbers<[1], [1], [0], [0], [0, 0, 1, 0], [], []>} : vector<32x32xbf16>, vector<32x32xbf16>, vector<32x32xf32> -> vector<32x32xf32>
    %cst_61 = arith.constant 0.176776692 : f32
    %238 = vector.broadcast %cst_61 : f32 to vector<32x32xf32>
    %239 = arith.mulf %237, %238 : vector<32x32xf32>
    %240 = arith.addf %239, %0 : vector<32x32xf32>
    %cst_62 = arith.constant dense<0xFF800000> : vector<32xf32>
    %241 = vector.multi_reduction <maximumf>, %240, %cst_62 [1] : vector<32x32xf32> to vector<32xf32>
    %242 = vector.shape_cast %241 : vector<32xf32> to vector<32x1xf32>
    %243 = vector.broadcast %242 : vector<32x1xf32> to vector<32x32xf32>
    %244 = arith.subf %240, %243 : vector<32x32xf32>
    %245 = math.exp %244 : vector<32x32xf32>
    %cst_63 = arith.constant dense<0.000000e+00> : vector<32xf32>
    %246 = vector.multi_reduction <add>, %245, %cst_63 [1] : vector<32x32xf32> to vector<32xf32>
    %247 = vector.shape_cast %246 : vector<32xf32> to vector<32x1xf32>
    %248 = arith.truncf %245 : vector<32x32xf32> to vector<32x32xbf16>
    %cst_64 = arith.constant dense<0.000000e+00> : vector<32x32xf32>
    %249 = tpu.matmul %248, %236, %cst_64 {dimension_numbers = #tpu.dot_dimension_numbers<[1], [0], [0], [1], [0, 0, 1, 1], [], []>} : vector<32x32xbf16>, vector<32x32xbf16>, vector<32x32xf32> -> vector<32x32xf32>
    %250 = tpu.reciprocal %247 {approx = true} : vector<32x1xf32> -> vector<32x1xf32>
    %251 = vector.broadcast %250 : vector<32x1xf32> to vector<32x32xf32>
    %252 = arith.mulf %249, %251 : vector<32x32xf32>
    %253 = vector.extract_strided_slice %218 {offsets = [0, 32], sizes = [32, 32], strides = [1, 1]} : vector<32x128xf32> to vector<32x32xf32>
    %254 = arith.truncf %253 : vector<32x32xf32> to vector<32x32xbf16>
    %255 = vector.extract_strided_slice %224 {offsets = [0, 32], sizes = [32, 32], strides = [1, 1]} : vector<32x128xf32> to vector<32x32xf32>
    %256 = arith.truncf %255 : vector<32x32xf32> to vector<32x32xbf16>
    %257 = vector.extract_strided_slice %230 {offsets = [0, 32], sizes = [32, 32], strides = [1, 1]} : vector<32x128xf32> to vector<32x32xf32>
    %258 = arith.truncf %257 : vector<32x32xf32> to vector<32x32xbf16>
    %cst_65 = arith.constant dense<0.000000e+00> : vector<32x32xf32>
    %259 = tpu.matmul %254, %256, %cst_65 {dimension_numbers = #tpu.dot_dimension_numbers<[1], [1], [0], [0], [0, 0, 1, 0], [], []>} : vector<32x32xbf16>, vector<32x32xbf16>, vector<32x32xf32> -> vector<32x32xf32>
    %cst_66 = arith.constant 0.176776692 : f32
    %260 = vector.broadcast %cst_66 : f32 to vector<32x32xf32>
    %261 = arith.mulf %259, %260 : vector<32x32xf32>
    %262 = arith.addf %261, %0 : vector<32x32xf32>
    %cst_67 = arith.constant dense<0xFF800000> : vector<32xf32>
    %263 = vector.multi_reduction <maximumf>, %262, %cst_67 [1] : vector<32x32xf32> to vector<32xf32>
    %264 = vector.shape_cast %263 : vector<32xf32> to vector<32x1xf32>
    %265 = vector.broadcast %264 : vector<32x1xf32> to vector<32x32xf32>
    %266 = arith.subf %262, %265 : vector<32x32xf32>
    %267 = math.exp %266 : vector<32x32xf32>
    %cst_68 = arith.constant dense<0.000000e+00> : vector<32xf32>
    %268 = vector.multi_reduction <add>, %267, %cst_68 [1] : vector<32x32xf32> to vector<32xf32>
    %269 = vector.shape_cast %268 : vector<32xf32> to vector<32x1xf32>
    %270 = arith.truncf %267 : vector<32x32xf32> to vector<32x32xbf16>
    %cst_69 = arith.constant dense<0.000000e+00> : vector<32x32xf32>
    %271 = tpu.matmul %270, %258, %cst_69 {dimension_numbers = #tpu.dot_dimension_numbers<[1], [0], [0], [1], [0, 0, 1, 1], [], []>} : vector<32x32xbf16>, vector<32x32xbf16>, vector<32x32xf32> -> vector<32x32xf32>
    %272 = tpu.reciprocal %269 {approx = true} : vector<32x1xf32> -> vector<32x1xf32>
    %273 = vector.broadcast %272 : vector<32x1xf32> to vector<32x32xf32>
    %274 = arith.mulf %271, %273 : vector<32x32xf32>
    %275 = vector.extract_strided_slice %218 {offsets = [0, 64], sizes = [32, 32], strides = [1, 1]} : vector<32x128xf32> to vector<32x32xf32>
    %276 = arith.truncf %275 : vector<32x32xf32> to vector<32x32xbf16>
    %277 = vector.extract_strided_slice %224 {offsets = [0, 64], sizes = [32, 32], strides = [1, 1]} : vector<32x128xf32> to vector<32x32xf32>
    %278 = arith.truncf %277 : vector<32x32xf32> to vector<32x32xbf16>
    %279 = vector.extract_strided_slice %230 {offsets = [0, 64], sizes = [32, 32], strides = [1, 1]} : vector<32x128xf32> to vector<32x32xf32>
    %280 = arith.truncf %279 : vector<32x32xf32> to vector<32x32xbf16>
    %cst_70 = arith.constant dense<0.000000e+00> : vector<32x32xf32>
    %281 = tpu.matmul %276, %278, %cst_70 {dimension_numbers = #tpu.dot_dimension_numbers<[1], [1], [0], [0], [0, 0, 1, 0], [], []>} : vector<32x32xbf16>, vector<32x32xbf16>, vector<32x32xf32> -> vector<32x32xf32>
    %cst_71 = arith.constant 0.176776692 : f32
    %282 = vector.broadcast %cst_71 : f32 to vector<32x32xf32>
    %283 = arith.mulf %281, %282 : vector<32x32xf32>
    %284 = arith.addf %283, %0 : vector<32x32xf32>
    %cst_72 = arith.constant dense<0xFF800000> : vector<32xf32>
    %285 = vector.multi_reduction <maximumf>, %284, %cst_72 [1] : vector<32x32xf32> to vector<32xf32>
    %286 = vector.shape_cast %285 : vector<32xf32> to vector<32x1xf32>
    %287 = vector.broadcast %286 : vector<32x1xf32> to vector<32x32xf32>
    %288 = arith.subf %284, %287 : vector<32x32xf32>
    %289 = math.exp %288 : vector<32x32xf32>
    %cst_73 = arith.constant dense<0.000000e+00> : vector<32xf32>
    %290 = vector.multi_reduction <add>, %289, %cst_73 [1] : vector<32x32xf32> to vector<32xf32>
    %291 = vector.shape_cast %290 : vector<32xf32> to vector<32x1xf32>
    %292 = arith.truncf %289 : vector<32x32xf32> to vector<32x32xbf16>
    %cst_74 = arith.constant dense<0.000000e+00> : vector<32x32xf32>
    %293 = tpu.matmul %292, %280, %cst_74 {dimension_numbers = #tpu.dot_dimension_numbers<[1], [0], [0], [1], [0, 0, 1, 1], [], []>} : vector<32x32xbf16>, vector<32x32xbf16>, vector<32x32xf32> -> vector<32x32xf32>
    %294 = tpu.reciprocal %291 {approx = true} : vector<32x1xf32> -> vector<32x1xf32>
    %295 = vector.broadcast %294 : vector<32x1xf32> to vector<32x32xf32>
    %296 = arith.mulf %293, %295 : vector<32x32xf32>
    %297 = vector.extract_strided_slice %218 {offsets = [0, 96], sizes = [32, 32], strides = [1, 1]} : vector<32x128xf32> to vector<32x32xf32>
    %298 = arith.truncf %297 : vector<32x32xf32> to vector<32x32xbf16>
    %299 = vector.extract_strided_slice %224 {offsets = [0, 96], sizes = [32, 32], strides = [1, 1]} : vector<32x128xf32> to vector<32x32xf32>
    %300 = arith.truncf %299 : vector<32x32xf32> to vector<32x32xbf16>
    %301 = vector.extract_strided_slice %230 {offsets = [0, 96], sizes = [32, 32], strides = [1, 1]} : vector<32x128xf32> to vector<32x32xf32>
    %302 = arith.truncf %301 : vector<32x32xf32> to vector<32x32xbf16>
    %cst_75 = arith.constant dense<0.000000e+00> : vector<32x32xf32>
    %303 = tpu.matmul %298, %300, %cst_75 {dimension_numbers = #tpu.dot_dimension_numbers<[1], [1], [0], [0], [0, 0, 1, 0], [], []>} : vector<32x32xbf16>, vector<32x32xbf16>, vector<32x32xf32> -> vector<32x32xf32>
    %cst_76 = arith.constant 0.176776692 : f32
    %304 = vector.broadcast %cst_76 : f32 to vector<32x32xf32>
    %305 = arith.mulf %303, %304 : vector<32x32xf32>
    %306 = arith.addf %305, %0 : vector<32x32xf32>
    %cst_77 = arith.constant dense<0xFF800000> : vector<32xf32>
    %307 = vector.multi_reduction <maximumf>, %306, %cst_77 [1] : vector<32x32xf32> to vector<32xf32>
    %308 = vector.shape_cast %307 : vector<32xf32> to vector<32x1xf32>
    %309 = vector.broadcast %308 : vector<32x1xf32> to vector<32x32xf32>
    %310 = arith.subf %306, %309 : vector<32x32xf32>
    %311 = math.exp %310 : vector<32x32xf32>
    %cst_78 = arith.constant dense<0.000000e+00> : vector<32xf32>
    %312 = vector.multi_reduction <add>, %311, %cst_78 [1] : vector<32x32xf32> to vector<32xf32>
    %313 = vector.shape_cast %312 : vector<32xf32> to vector<32x1xf32>
    %314 = arith.truncf %311 : vector<32x32xf32> to vector<32x32xbf16>
    %cst_79 = arith.constant dense<0.000000e+00> : vector<32x32xf32>
    %315 = tpu.matmul %314, %302, %cst_79 {dimension_numbers = #tpu.dot_dimension_numbers<[1], [0], [0], [1], [0, 0, 1, 1], [], []>} : vector<32x32xbf16>, vector<32x32xbf16>, vector<32x32xf32> -> vector<32x32xf32>
    %316 = tpu.reciprocal %313 {approx = true} : vector<32x1xf32> -> vector<32x1xf32>
    %317 = vector.broadcast %316 : vector<32x1xf32> to vector<32x32xf32>
    %318 = arith.mulf %315, %317 : vector<32x32xf32>
    %319 = tpu.concatenate %252, %274, %296, %318 in 1 : vector<32x32xf32>, vector<32x32xf32>, vector<32x32xf32>, vector<32x32xf32> -> vector<32x128xf32>
    %320 = arith.truncf %319 : vector<32x128xf32> to vector<32x128xbf16>
    %c1_80 = arith.constant 1 : index
    %c0_81 = arith.constant 0 : index
    %c384_82 = arith.constant 384 : index
    %321 = vector.load %arg4[%c1_80, %c0_81, %c384_82] : memref<2x128x768xbf16, #tpu.memory_space<vmem>>, vector<1x128x128xbf16>
    %322 = vector.shape_cast %321 : vector<1x128x128xbf16> to vector<128x128xbf16>
    %cst_83 = arith.constant dense<0.000000e+00> : vector<32x128xf32>
    %323 = tpu.matmul %320, %322, %cst_83 {dimension_numbers = #tpu.dot_dimension_numbers<[1], [0], [0], [1], [0, 0, 1, 1], [], []>} : vector<32x128xbf16>, vector<128x128xbf16>, vector<32x128xf32> -> vector<32x128xf32>
    %324 = vector.extract_strided_slice %208 {offsets = [3, 0], sizes = [1, 128], strides = [1, 1]} : vector<16x128xf32> to vector<1x128xf32>
    %325 = vector.shape_cast %324 : vector<1x128xf32> to vector<128xf32>
    %326 = vector.shape_cast %325 : vector<128xf32> to vector<1x128xf32>
    %327 = vector.broadcast %326 : vector<1x128xf32> to vector<32x128xf32>
    %328 = arith.addf %323, %327 : vector<32x128xf32>
    %329 = arith.addf %206, %328 : vector<32x128xf32>
    %330 = vector.extract_strided_slice %208 {offsets = [4, 0], sizes = [1, 128], strides = [1, 1]} : vector<16x128xf32> to vector<1x128xf32>
    %331 = vector.shape_cast %330 : vector<1x128xf32> to vector<128xf32>
    %332 = vector.extract_strided_slice %208 {offsets = [5, 0], sizes = [1, 128], strides = [1, 1]} : vector<16x128xf32> to vector<1x128xf32>
    %333 = vector.shape_cast %332 : vector<1x128xf32> to vector<128xf32>
    %cst_84 = arith.constant dense<0.000000e+00> : vector<32xf32>
    %334 = vector.multi_reduction <add>, %329, %cst_84 [1] : vector<32x128xf32> to vector<32xf32>
    %335 = vector.shape_cast %334 : vector<32xf32> to vector<32x1xf32>
    %cst_85 = arith.constant 1.280000e+02 : f32
    %336 = vector.broadcast %cst_85 : f32 to vector<32x1xf32>
    %337 = arith.divf %335, %336 : vector<32x1xf32>
    %338 = vector.broadcast %337 : vector<32x1xf32> to vector<32x128xf32>
    %339 = arith.subf %329, %338 : vector<32x128xf32>
    %340 = arith.mulf %339, %339 : vector<32x128xf32>
    %cst_86 = arith.constant dense<0.000000e+00> : vector<32xf32>
    %341 = vector.multi_reduction <add>, %340, %cst_86 [1] : vector<32x128xf32> to vector<32xf32>
    %342 = vector.shape_cast %341 : vector<32xf32> to vector<32x1xf32>
    %cst_87 = arith.constant 1.280000e+02 : f32
    %343 = vector.broadcast %cst_87 : f32 to vector<32x1xf32>
    %344 = arith.divf %342, %343 : vector<32x1xf32>
    %345 = vector.broadcast %337 : vector<32x1xf32> to vector<32x128xf32>
    %346 = arith.subf %329, %345 : vector<32x128xf32>
    %cst_88 = arith.constant 9.99999974E-6 : f32
    %347 = vector.broadcast %cst_88 : f32 to vector<32x1xf32>
    %348 = arith.addf %344, %347 : vector<32x1xf32>
    %349 = math.rsqrt %348 : vector<32x1xf32>
    %350 = vector.broadcast %349 : vector<32x1xf32> to vector<32x128xf32>
    %351 = arith.mulf %346, %350 : vector<32x128xf32>
    %352 = vector.shape_cast %331 : vector<128xf32> to vector<1x128xf32>
    %353 = vector.broadcast %352 : vector<1x128xf32> to vector<32x128xf32>
    %354 = arith.mulf %351, %353 : vector<32x128xf32>
    %355 = vector.shape_cast %333 : vector<128xf32> to vector<1x128xf32>
    %356 = vector.broadcast %355 : vector<1x128xf32> to vector<32x128xf32>
    %357 = arith.addf %354, %356 : vector<32x128xf32>
    %358 = arith.truncf %357 : vector<32x128xf32> to vector<32x128xbf16>
    %c1_89 = arith.constant 1 : index
    %c0_90 = arith.constant 0 : index
    %c512_91 = arith.constant 512 : index
    %359 = vector.load %arg4[%c1_89, %c0_90, %c512_91] : memref<2x128x768xbf16, #tpu.memory_space<vmem>>, vector<1x128x128xbf16>
    %360 = vector.shape_cast %359 : vector<1x128x128xbf16> to vector<128x128xbf16>
    %cst_92 = arith.constant dense<0.000000e+00> : vector<32x128xf32>
    %361 = tpu.matmul %358, %360, %cst_92 {dimension_numbers = #tpu.dot_dimension_numbers<[1], [0], [0], [1], [0, 0, 1, 1], [], []>} : vector<32x128xbf16>, vector<128x128xbf16>, vector<32x128xf32> -> vector<32x128xf32>
    %362 = vector.extract_strided_slice %208 {offsets = [6, 0], sizes = [1, 128], strides = [1, 1]} : vector<16x128xf32> to vector<1x128xf32>
    %363 = vector.shape_cast %362 : vector<1x128xf32> to vector<128xf32>
    %364 = vector.shape_cast %363 : vector<128xf32> to vector<1x128xf32>
    %365 = vector.broadcast %364 : vector<1x128xf32> to vector<32x128xf32>
    %366 = arith.addf %361, %365 : vector<32x128xf32>
    %cst_93 = arith.constant 0.000000e+00 : f32
    %367 = vector.broadcast %cst_93 : f32 to vector<32x128xf32>
    %368 = arith.maximumf %366, %367 : vector<32x128xf32>
    %369 = arith.truncf %368 : vector<32x128xf32> to vector<32x128xbf16>
    %c1_94 = arith.constant 1 : index
    %c0_95 = arith.constant 0 : index
    %c640_96 = arith.constant 640 : index
    %370 = vector.load %arg4[%c1_94, %c0_95, %c640_96] : memref<2x128x768xbf16, #tpu.memory_space<vmem>>, vector<1x128x128xbf16>
    %371 = vector.shape_cast %370 : vector<1x128x128xbf16> to vector<128x128xbf16>
    %cst_97 = arith.constant dense<0.000000e+00> : vector<32x128xf32>
    %372 = tpu.matmul %369, %371, %cst_97 {dimension_numbers = #tpu.dot_dimension_numbers<[1], [0], [0], [1], [0, 0, 1, 1], [], []>} : vector<32x128xbf16>, vector<128x128xbf16>, vector<32x128xf32> -> vector<32x128xf32>
    %373 = vector.extract_strided_slice %208 {offsets = [7, 0], sizes = [1, 128], strides = [1, 1]} : vector<16x128xf32> to vector<1x128xf32>
    %374 = vector.shape_cast %373 : vector<1x128xf32> to vector<128xf32>
    %375 = vector.shape_cast %374 : vector<128xf32> to vector<1x128xf32>
    %376 = vector.broadcast %375 : vector<1x128xf32> to vector<32x128xf32>
    %377 = arith.addf %372, %376 : vector<32x128xf32>
    %378 = arith.addf %357, %377 : vector<32x128xf32>
    %379 = vector.extract_strided_slice %208 {offsets = [8, 0], sizes = [1, 128], strides = [1, 1]} : vector<16x128xf32> to vector<1x128xf32>
    %380 = vector.shape_cast %379 : vector<1x128xf32> to vector<128xf32>
    %381 = vector.extract_strided_slice %208 {offsets = [9, 0], sizes = [1, 128], strides = [1, 1]} : vector<16x128xf32> to vector<1x128xf32>
    %382 = vector.shape_cast %381 : vector<1x128xf32> to vector<128xf32>
    %cst_98 = arith.constant dense<0.000000e+00> : vector<32xf32>
    %383 = vector.multi_reduction <add>, %378, %cst_98 [1] : vector<32x128xf32> to vector<32xf32>
    %384 = vector.shape_cast %383 : vector<32xf32> to vector<32x1xf32>
    %cst_99 = arith.constant 1.280000e+02 : f32
    %385 = vector.broadcast %cst_99 : f32 to vector<32x1xf32>
    %386 = arith.divf %384, %385 : vector<32x1xf32>
    %387 = vector.broadcast %386 : vector<32x1xf32> to vector<32x128xf32>
    %388 = arith.subf %378, %387 : vector<32x128xf32>
    %389 = arith.mulf %388, %388 : vector<32x128xf32>
    %cst_100 = arith.constant dense<0.000000e+00> : vector<32xf32>
    %390 = vector.multi_reduction <add>, %389, %cst_100 [1] : vector<32x128xf32> to vector<32xf32>
    %391 = vector.shape_cast %390 : vector<32xf32> to vector<32x1xf32>
    %cst_101 = arith.constant 1.280000e+02 : f32
    %392 = vector.broadcast %cst_101 : f32 to vector<32x1xf32>
    %393 = arith.divf %391, %392 : vector<32x1xf32>
    %394 = vector.broadcast %386 : vector<32x1xf32> to vector<32x128xf32>
    %395 = arith.subf %378, %394 : vector<32x128xf32>
    %cst_102 = arith.constant 9.99999974E-6 : f32
    %396 = vector.broadcast %cst_102 : f32 to vector<32x1xf32>
    %397 = arith.addf %393, %396 : vector<32x1xf32>
    %398 = math.rsqrt %397 : vector<32x1xf32>
    %399 = vector.broadcast %398 : vector<32x1xf32> to vector<32x128xf32>
    %400 = arith.mulf %395, %399 : vector<32x128xf32>
    %401 = vector.shape_cast %380 : vector<128xf32> to vector<1x128xf32>
    %402 = vector.broadcast %401 : vector<1x128xf32> to vector<32x128xf32>
    %403 = arith.mulf %400, %402 : vector<32x128xf32>
    %404 = vector.shape_cast %382 : vector<128xf32> to vector<1x128xf32>
    %405 = vector.broadcast %404 : vector<1x128xf32> to vector<32x128xf32>
    %406 = arith.addf %403, %405 : vector<32x128xf32>
    %c32 = arith.constant 32 : index
    %c0_103 = arith.constant 0 : index
    %407 = vector.load %arg2[%c32, %c0_103] : memref<40x32xf32, #tpu.memory_space<vmem>>, vector<8x32xf32>
    %408 = arith.truncf %407 : vector<8x32xf32> to vector<8x32xbf16>
    %409 = arith.truncf %406 : vector<32x128xf32> to vector<32x128xbf16>
    %cst_104 = arith.constant dense<0.000000e+00> : vector<8x128xf32>
    %410 = tpu.matmul %408, %409, %cst_104 {dimension_numbers = #tpu.dot_dimension_numbers<[1], [0], [0], [1], [0, 0, 1, 1], [], []>} : vector<8x32xbf16>, vector<32x128xbf16>, vector<8x128xf32> -> vector<8x128xf32>
    %c16 = arith.constant 16 : index
    %c0_105 = arith.constant 0 : index
    %411 = vector.load %arg3[%c16, %c0_105] : memref<144x128xbf16, #tpu.memory_space<vmem>>, vector<128x128xbf16>
    %412 = arith.truncf %410 : vector<8x128xf32> to vector<8x128xbf16>
    %cst_106 = arith.constant dense<0.000000e+00> : vector<8x128xf32>
    %413 = tpu.matmul %412, %411, %cst_106 {dimension_numbers = #tpu.dot_dimension_numbers<[1], [0], [0], [1], [0, 0, 1, 1], [], []>} : vector<8x128xbf16>, vector<128x128xbf16>, vector<8x128xf32> -> vector<8x128xf32>
    %c2 = arith.constant 2 : index
    %c0_107 = arith.constant 0 : index
    %c0_108 = arith.constant 0 : index
    %414 = vector.load %arg5[%c2, %c0_107, %c0_108] : memref<3x16x128xf32, #tpu.memory_space<vmem>>, vector<1x1x128xf32>
    %415 = vector.shape_cast %414 : vector<1x1x128xf32> to vector<128xf32>
    %416 = vector.shape_cast %415 : vector<128xf32> to vector<1x128xf32>
    %417 = vector.broadcast %416 : vector<1x128xf32> to vector<8x128xf32>
    %418 = arith.addf %413, %417 : vector<8x128xf32>
    %c0_109 = arith.constant 0 : index
    %c0_110 = arith.constant 0 : index
    %419 = vector.load %arg6[%c0_109, %c0_110] : memref<8x128xf32, #tpu.memory_space<vmem>>, vector<8x128xf32>
    tpu.vector_store %arg6[%c0_109, %c0_110], %418 {strides = array<i32>} : memref<8x128xf32, #tpu.memory_space<vmem>>, vector<8x128xf32>,
    return
  }
}

</mosaic_0001>

<bundles_post_ra>
// kernel: tpu_custom_call.1
= control target key start
LH: loop header
LB: loop body
LE: loop exit
PB: predicated region body
PF: predicated region fallthrough
CT: control target
= control target key end

     0   :  { %11 = vsyncpa [#allocation3], 0  ;;  %s4360_s0 = inlined_call_operand.vmem [shape: f32[32,16], index: 0, kind: input, shape index: {}]   ;;  %s4361_s1 = inlined_call_operand.hbm [shape: f32[32,128], index: 1, kind: input, shape index: {}]   ;;  %s4362_s2 = inlined_call_operand.vmem [shape: f32[40,32], index: 2, kind: input, shape index: {}]   ;;  %s4363_s3 = inlined_call_operand.vmem [shape: bf16[144,128], index: 3, kind: input, shape index: {}]   ;;  %s4364_s4 = inlined_call_operand.hbm [shape: bf16[2,128,768], index: 4, kind: input, shape index: {}]   ;;  %s4365_s5 = inlined_call_operand.hbm [shape: f32[3,16,128], index: 5, kind: input, shape index: {}]   ;;  %s4366_s6 = inlined_call_operand.hbm [shape: f32[8,128], index: 6, kind: output, shape index: {}]  }
   0x1   :  { %12 = vsyncpa [#allocation6], 0  ;;  %s37_s23 = sshll.u32 %s4364_s4, 4  ;;  %s38_s23 = int_to_ptr.hbm [resolvable:$true] %s37_s23 }
   0x2   :  { %13 = vsyncpa [#allocation4], 0  ;;  %s3635_s24 = smov [#allocation5]   ;;  %s20_s28 = sshll.u32 %s4361_s1, 4  ;;  %s21_s28 = int_to_ptr.hbm [resolvable:$true] %s20_s28 }
   0x3   :  { %s39_s25 = sshll.u32 %s3635_s24, 4  ;;  %s3636_s29 = smov 384   ;;  %s40_s25 = int_to_ptr.vmem [resolvable:$true] %s39_s25 }
   0x4   :  { %s3637_s30 = smov 24   ;;  %s3638_s7 = smov [#allocation2]  }
   0x5   :  { %45 = dma.hbm_to_vmem [thread:$0]  %s38_s23, 12288, %s40_s25, [#allocation6], %s3636_s29, %s3636_s29, %s3637_s30  }
   0x6   :  { %s22_s8 = sshll.u32 %s3638_s7, 4  ;;  %s3639_s9 = smov 128   ;;  %s23_s8 = int_to_ptr.vmem [resolvable:$true] %s22_s8 }
   0x7   :  { %s3640_s10 = smov 8   ;;  %s50_s12 = sshll.u32 %s4365_s5, 4  ;;  %s51_s12 = int_to_ptr.hbm [resolvable:$true] %s50_s12 }
   0x8   :  { %28 = dma.hbm_to_vmem [thread:$0]  %s21_s28, 512, %s23_s8, [#allocation3], %s3639_s9, %s3639_s9, %s3640_s10  }
   0x9   :  { %s3641_s13 = smov [#allocation7]  }
   0xa   :  { %s52_s14 = sshll.u32 %s3641_s13, 4  ;;  %s53_s14 = int_to_ptr.vmem [resolvable:$true] %s52_s14 }
   0xb   :  { %58 = dma.hbm_to_vmem [thread:$0]  %s51_s12, 768, %s53_s14, [#allocation6], %s3639_s9, %s3639_s9, %s3640_s10  }
   0xc   :  { %3629 = dma.done.wait [#allocation3], 512  }
   0xd   :  { %3630 = vsyncadd [#allocation3], 4294966784 }
   0xe   :  { %3631 = dma.done.wait [#allocation6], 13056  }
   0xf   :  { %3632 = vsyncadd [#allocation6], 4294954240  ;;  %v3187_v0 = vld [vmem:[%s4363_s3] sm:$0xff]  ;;  %v79_v2 = vld [vmem:[%s4360_s0 + $0x8] sm:$0xff]  ;;  %vm94_vm0 = vcmask 130048   ;;  %vm362_vm1 = vcmask 261120  }
  0x10   :  { %v78_v1 = vld [vmem:[%s4360_s0] sm:$0xff]  ;;  %v2824_v4 = vld [vmem:[#allocation5 + $0x150] sm:$0xf]  ;;  %108 = vmatpush.bf16.msra.mxu0 %v3187_v0  ;;  %v3210_v5 = vld [vmem:[#allocation5 + $0x164] sm:$0xf0]  ;;  %s3643_s23 = smov 32  }
  0x11   :  { %v82_v3 = vpack.c.bf16 %v79_v2, %v78_v1  ;;  %v3209_v6 = vld [vmem:[#allocation5 + $0x154] sm:$0xf]  ;;  %v2826_v7 = vld [vmem:[#allocation5 + $0x168] sm:$0xf0]  ;;  %v2825_v8 = vor.u32 %v3210_v5, %v2824_v4  ;;  %v2832_v10 = vld [vmem:[#allocation5 + $0x158] sm:$0xf] }
  0x12   :  { %v2829_v9 = vor.u32 %v3209_v6, %v2826_v7  ;;  %v3211_v11 = vld [vmem:[#allocation5 + $0x16c] sm:$0xf0]  ;;  %v2812_v12 = vld [vmem:[#allocation5 + $0x120] sm:$0xf]  ;;  %v3207_v14 = vld [vmem:[#allocation5 + $0x134] sm:$0xf0] }
  0x13   :  { %v2833_v13 = vor.u32 %v3211_v11, %v2832_v10  ;;  %v3206_v15 = vld [vmem:[#allocation5 + $0x124] sm:$0xf]  ;;  %v2814_v16 = vld [vmem:[#allocation5 + $0x138] sm:$0xf0]  ;;  %2736 = vmatmul.msk.bf16.vlgmr.msra.gmra.mxu0 %vm94_vm0, %v82_v3  ;;  %284 = vmatpush.bf16.msra.mxu1 %v2825_v8  ;;  %v2813_v17 = vor.u32 %v3207_v14, %v2812_v12  ;;  %v2820_v18 = vld [vmem:[#allocation5 + $0x128] sm:$0xf] }
  0x14   :  { %v3208_v19 = vld [vmem:[#allocation5 + $0x13c] sm:$0xf0]  ;;  %303 = vmatpush.bf16.msra.mxu2 %v2829_v9  ;;  %v2817_v20 = vor.u32 %v3206_v15, %v2814_v16  ;;  %v2800_v22 = vld [vmem:[#allocation5 + $0xf0] sm:$0xf]  ;;  %v3204_v23 = vld [vmem:[#allocation5 + $0x104] sm:$0xf0] }
  0x15   :  { %322 = vmatpush.bf16.msra.mxu3 %v2833_v13  ;;  %v2821_v21 = vor.u32 %v3208_v19, %v2820_v18  ;;  %v3203_v24 = vld [vmem:[#allocation5 + $0xf4] sm:$0xf]  ;;  %v2802_v25 = vld [vmem:[#allocation5 + $0x108] sm:$0xf0]  ;;  %v2808_v26 = vld [vmem:[#allocation5 + $0xf8] sm:$0xf]  ;;  %v2801_v28 = vor.u32 %v3204_v23, %v2800_v22 }
  0x16   :  { %v3205_v27 = vld [vmem:[#allocation5 + $0x10c] sm:$0xf0]  ;;  %v2805_v29 = vor.u32 %v3203_v24, %v2802_v25  ;;  %v2788_v31 = vld [vmem:[#allocation5 + $0xc0] sm:$0xf]  ;;  %v3201_v32 = vld [vmem:[#allocation5 + $0xd4] sm:$0xf0] }
  0x17   :  { %285 = vmatpush.bf16.msra.mxu1 %v2813_v17  ;;  %v2809_v30 = vor.u32 %v3205_v27, %v2808_v26  ;;  %v3200_v33 = vld [vmem:[#allocation5 + $0xc4] sm:$0xf]  ;;  %v2790_v34 = vld [vmem:[#allocation5 + $0xd8] sm:$0xf0]  ;;  %v2796_v35 = vld [vmem:[#allocation5 + $0xc8] sm:$0xf]  ;;  %v2789_v39 = vor.u32 %v3201_v32, %v2788_v31 }
  0x18   :  { %304 = vmatpush.bf16.msra.mxu2 %v2817_v20  ;;  %v3202_v36 = vld [vmem:[#allocation5 + $0xdc] sm:$0xf0]  ;;  %v80_v37 = vld [vmem:[%s4360_s0 + $0x10] sm:$0xff]  ;;  %v81_v38 = vld [vmem:[%s4360_s0 + $0x18] sm:$0xff]  ;;  %v2793_v40 = vor.u32 %v3200_v33, %v2790_v34  ;;  %s3642_s0 = smov 96   ;;  %s3644_s24 = smov 64  }
  0x19   :  { %323 = vmatpush.bf16.msra.mxu3 %v2821_v21  ;;  %v2797_v41 = vor.u32 %v3202_v36, %v2796_v35  ;;  %v2776_v42 = vld [vmem:[#allocation5 + $0x90] sm:$0xf]  ;;  %v3198_v43 = vld [vmem:[#allocation5 + $0xa4] sm:$0xf0]  ;;  %v3197_v44 = vld [vmem:[#allocation5 + $0x94] sm:$0xf]  ;;  %v83_v48 = vpack.c.bf16 %v81_v38, %v80_v37 }
  0x1a   :  { %v2778_v45 = vld [vmem:[#allocation5 + $0xa8] sm:$0xf0]  ;;  %v2784_v46 = vld [vmem:[#allocation5 + $0x98] sm:$0xf]  ;;  %v3199_v47 = vld [vmem:[#allocation5 + $0xac] sm:$0xf0]  ;;  %v2777_v49 = vor.u32 %v3198_v43, %v2776_v42 }
  0x1b   :  { %286 = vmatpush.bf16.msra.mxu1 %v2801_v28  ;;  %v2781_v50 = vor.u32 %v3197_v44, %v2778_v45  ;;  %v2785_v51 = vor.u32 %v3199_v47, %v2784_v46  ;;  %v2764_v52 = vld [vmem:[#allocation5 + $0x60] sm:$0xf]  ;;  %v3195_v53 = vld [vmem:[#allocation5 + $0x74] sm:$0xf0]  ;;  %v3194_v54 = vld [vmem:[#allocation5 + $0x64] sm:$0xf] }
  0x1c   :  { %305 = vmatpush.bf16.msra.mxu2 %v2805_v29  ;;  %v2765_v55 = vor.u32 %v3195_v53, %v2764_v52  ;;  %v2766_v56 = vld [vmem:[#allocation5 + $0x78] sm:$0xf0]  ;;  %v2772_v57 = vld [vmem:[#allocation5 + $0x68] sm:$0xf]  ;;  %v3196_v58 = vld [vmem:[#allocation5 + $0x7c] sm:$0xf0] }
  0x1d   :  { %324 = vmatpush.bf16.msra.mxu3 %v2809_v30  ;;  %v2769_v59 = vor.u32 %v3194_v54, %v2766_v56  ;;  %v2773_v60 = vor.u32 %v3196_v58, %v2772_v57  ;;  %v2752_v61 = vld [vmem:[#allocation5 + $0x30] sm:$0xf]  ;;  %v3192_v62 = vld [vmem:[#allocation5 + $0x44] sm:$0xf0]  ;;  %v3191_v63 = vld [vmem:[#allocation5 + $0x34] sm:$0xf] }
  0x1e   :  { %v2753_v0 = vor.u32 %v3192_v62, %v2752_v61  ;;  %v2754_v1 = vld [vmem:[#allocation5 + $0x48] sm:$0xf0]  ;;  %v2760_v2 = vld [vmem:[#allocation5 + $0x38] sm:$0xf]  ;;  %v3193_v3 = vld [vmem:[#allocation5 + $0x4c] sm:$0xf0] }
  0x1f   :  { %287 = vmatpush.bf16.msra.mxu1 %v2789_v39  ;;  %v2757_v4 = vor.u32 %v3191_v63, %v2754_v1  ;;  %v2761_v5 = vor.u32 %v3193_v3, %v2760_v2  ;;  %v2740_v6 = vld [vmem:[#allocation5] sm:$0xf]  ;;  %v3189_v7 = vld [vmem:[#allocation5 + $0x14] sm:$0xf0]  ;;  %v3188_v8 = vld [vmem:[#allocation5 + $0x4] sm:$0xf] }
  0x20   :  { %306 = vmatpush.bf16.msra.mxu2 %v2793_v40  ;;  %v2741_v9 = vor.u32 %v3189_v7, %v2740_v6  ;;  %v2742_v10 = vld [vmem:[#allocation5 + $0x18] sm:$0xf0]  ;;  %v2748_v11 = vld [vmem:[#allocation5 + $0x8] sm:$0xf]  ;;  %v3190_v12 = vld [vmem:[#allocation5 + $0x1c] sm:$0xf0] }
  0x21   :  { %325 = vmatpush.bf16.msra.mxu3 %v2797_v41  ;;  %v2745_v13 = vor.u32 %v3188_v8, %v2742_v10  ;;  %v2749_v14 = vor.u32 %v3190_v12, %v2748_v11  ;;  %v84_v16 = vld [vmem:[#allocation2] sm:$0xff]  ;;  %v85_v17 = vld [vmem:[#allocation2 + $0x8] sm:$0xff]  ;;  %v86_v23 = vld [vmem:[#allocation2 + $0x10] sm:$0xff]  ;;  %vm903_vm2 = vcmask 523264   ;;  %vm908_vm3 = vcmask 785408   ;;  %s3646_s7 = smov [#allocation8]  }
  0x22   :  { %v87_v24 = vld [vmem:[#allocation2 + $0x18] sm:$0xff]  ;;  %v3720_v30 = vld [vmem:[#allocation7] sm:$0xff]  ;;  %s2719_s8 = sshll.u32 %s3646_s7, 4  ;;  %s2721_s10 = sshll.u32 %s4366_s6, 4  ;;  %s2720_s8 = int_to_ptr.vmem [resolvable:$true] %s2719_s8  ;;  %s2722_s10 = int_to_ptr.hbm [resolvable:$true] %s2721_s10 }
  0x23   :  { %2737 = vmatmul.msk.bf16.gmra.mxu0 %vm94_vm0, %v83_v48  ;;  %288 = vmatpush.bf16.msra.mxu1 %v2777_v49  ;;  %v341_v31 = vperm.slane %v3720_v30, 0  ;;  %v346_v47 = vperm.slane %v3720_v30, 1  ;;  %v351_v48 = vperm.slane %v3720_v30, 2 }
  0x24   :  { %307 = vmatpush.bf16.msra.mxu2 %v2781_v50 }
  0x25   :  { %326 = vmatpush.bf16.msra.mxu3 %v2785_v51 }
  0x27   :  { %289 = vmatpush.bf16.msra.mxu1 %v2765_v55 }
  0x28   :  { %308 = vmatpush.bf16.msra.mxu2 %v2769_v59 }
  0x29   :  { %327 = vmatpush.bf16.msra.mxu3 %v2773_v60 }
  0x2b   :  { %290 = vmatpush.bf16.msra.mxu1 %v2753_v0 }
  0x2c   :  { %309 = vmatpush.bf16.msra.mxu2 %v2757_v4 }
  0x2d   :  { %328 = vmatpush.bf16.msra.mxu3 %v2761_v5 }
  0x2f   :  { %291 = vmatpush.bf16.msra.mxu1 %v2741_v9 }
  0x30   :  { %310 = vmatpush.bf16.msra.mxu2 %v2745_v13 }
  0x31   :  { %329 = vmatpush.bf16.msra.mxu3 %v2749_v14 }
  0x90   :  { %v110_v15 = vpop.f32.mrf.mxu0 }
  0x91   :  { %v3708_v19 = vadd.f32 %v110_v15, %v84_v16 }
  0x98   :  { %v112_v18 = vpop.f32.mrf.mxu0 }
  0x99   :  { %v3710_v20 = vadd.f32 %v112_v18, %v85_v17 }
  0x9b   :  { %v122_v21 = vpack.c.bf16 %v3710_v20, %v3708_v19 }
  0x9d   :  { %292 = vmatmul.bf16.vlgmr.msra.gmra.mxu1 %v122_v21  ;;  %311 = vmatmul.bf16.vlgmr.msra.gmra.mxu2 %v122_v21 }
  0x9e   :  { %330 = vmatmul.bf16.vlgmr.msra.gmra.mxu3 %v122_v21 }
  0xa0   :  { %v115_v22 = vpop.f32.mrf.mxu0 }
  0xa1   :  { %v3714_v26 = vadd.f32 %v115_v22, %v86_v23  ;;  %v3763_v22 = vld [vmem:[%s4362_s2] sm:$0xff] }
  0xa8   :  { %v117_v25 = vpop.f32.mrf.mxu0 }
  0xa9   :  { %v3716_v27 = vadd.f32 %v117_v25, %v87_v24 }
  0xab   :  { %v123_v28 = vpack.c.bf16 %v3716_v27, %v3714_v26 }
  0xad   :  { %297 = vmatmul.bf16.gmra.mxu1 %v123_v28  ;;  %316 = vmatmul.bf16.gmra.mxu2 %v123_v28 }
  0xae   :  { %335 = vmatmul.bf16.gmra.mxu3 %v123_v28 }
 0x11a   :  { %v293_v29 = vpop.f32.mrf.mxu1 }
 0x11b   :  { %v342_v35 = vadd.f32 %v341_v31, %v293_v29 }
 0x120   :  { %v312_v32 = vpop.f32.mrf.mxu2 }
 0x121   :  { %v331_v33 = vpop.f32.mrf.mxu3  ;;  %v347_v61 = vadd.f32 %v346_v47, %v312_v32  ;;  %v3772_v32 = vld [vmem:[%s4362_s2 + $0x8] sm:$0xff] }
 0x122   :  { %v295_v34 = vpop.f32.mrf.mxu1  ;;  %v352_v60 = vadd.f32 %v351_v48, %v331_v33 }
 0x123   :  { %v343_v36 = vadd.f32 %v341_v31, %v295_v34 }
 0x125   :  { %v356_v37 = vpack.c.bf16 %v343_v36, %v342_v35 }
 0x127   :  { %475 = vrot.lane.b32.xlu1 %v356_v37, %s3642_s0 }
 0x128   :  { %v314_v38 = vpop.f32.mrf.mxu2 }
 0x129   :  { %v333_v39 = vpop.f32.mrf.mxu3  ;;  %v348_v58 = vadd.f32 %v346_v47, %v314_v38  ;;  %v3779_v38 = vld [vmem:[%s4362_s2 + $0x10] sm:$0xff] }
 0x12a   :  { %v298_v40 = vpop.f32.mrf.mxu1  ;;  %v353_v56 = vadd.f32 %v351_v48, %v333_v39 }
 0x12b   :  { %v344_v44 = vadd.f32 %v341_v31, %v298_v40  ;;  %v358_v63 = vpack.c.bf16 %v348_v58, %v347_v61 }
 0x12c   :  { %v3734_v62 = vpack.c.bf16 %v353_v56, %v352_v60 }
 0x12d   :  { %v370_v0 = vsel %vm362_vm1, %v358_v63, 0 }
 0x130   :  { %v317_v41 = vpop.f32.mrf.mxu2 }
 0x131   :  { %v336_v42 = vpop.f32.mrf.mxu3  ;;  %v349_v50 = vadd.f32 %v346_v47, %v317_v41 }
 0x132   :  { %v300_v43 = vpop.f32.mrf.mxu1  ;;  %v354_v53 = vadd.f32 %v351_v48, %v336_v42 }
 0x133   :  { %v345_v45 = vadd.f32 %v341_v31, %v300_v43  ;;  %v3788_v43 = vld [vmem:[%s4362_s2 + $0x18] sm:$0xff] }
 0x135   :  { %v357_v46 = vpack.c.bf16 %v345_v45, %v344_v44 }
 0x137   :  { %477 = vrot.lane.b32.xlu1 %v357_v46, %s3642_s0 }
 0x138   :  { %v319_v49 = vpop.f32.mrf.mxu2 }
 0x139   :  { %v350_v51 = vadd.f32 %v346_v47, %v319_v49  ;;  %v338_v52 = vpop.f32.mrf.mxu3 }
 0x13a   :  { %v355_v54 = vadd.f32 %v351_v48, %v338_v52 }
 0x13b   :  { %v359_v55 = vpack.c.bf16 %v350_v51, %v349_v50 }
 0x13c   :  { %v3727_v57 = vpack.c.bf16 %v355_v54, %v354_v53 }
 0x13d   :  { %733 = vrot.lane.b32.xlu2 %v359_v55, %s3643_s23  ;;  %483 = vrot.lane.b32.xlu0 %v359_v55, %s3642_s0  ;;  %v373_v59 = vsel %vm362_vm1, %v359_v55, 0 }
 0x13e   :  { %452 = vmatpush.bf16.msrb.mxu1 %v3727_v57  ;;  %381 = vmatpush.bf16.xpose.msrb.mxu0 %v373_v59 }
 0x13f   :  { %727 = vrot.lane.b32.xlu1 %v356_v37, %s3643_s23 }
 0x142   :  { %453 = vmatpush.bf16.msrb.mxu1 %v3734_v62 }
 0x145   :  { %731 = vrot.lane.b32.xlu2 %v358_v63, %s3643_s23  ;;  %481 = vrot.lane.b32.xlu0 %v358_v63, %s3642_s0 }
 0x146   :  { %382 = vmatpush.bf16.xpose.msrb.mxu0 %v370_v0 }
 0x147   :  { %729 = vrot.lane.b32.xlu1 %v357_v46, %s3643_s23 }
 0x14d   :  { %607 = vrot.lane.b32.xlu2 %v358_v63, %s3644_s24  ;;  %609 = vrot.lane.b32.xlu0 %v359_v55, %s3644_s24 }
 0x14e   :  { %2834 = vmatmul.msk.bf16.vlgmr.msrb.gmra.mxu0 %vm362_vm1, %v356_v37 }
 0x14f   :  { %564 = vrot.lane.b32.xlu1 %v3734_v62, %s3642_s0 }
 0x155   :  { %603 = vrot.lane.b32.xlu0 %v356_v37, %s3644_s24  ;;  %605 = vrot.lane.b32.xlu2 %v357_v46, %s3644_s24 }
 0x15d   :  { %566 = vrot.lane.b32.xlu0 %v3727_v57, %s3642_s0  ;;  %814 = vrot.lane.b32.xlu2 %v3727_v57, %s3643_s23 }
 0x15e   :  { %2835 = vmatmul.msk.bf16.gmra.mxu0 %vm362_vm1, %v357_v46 }
 0x197   :  { %v734_v1 = vpop.permute.xlu2 %733 }
 0x198   :  { %v745_v9 = vsel %vm362_vm1, %v734_v1, 0 }
 0x199   :  { %v476_v2 = vpop.permute.xlu1 %475 }
 0x19f   :  { %v732_v6 = vpop.permute.xlu2 %731 }
 0x1a0   :  { %v742_v14 = vsel %vm362_vm1, %v732_v6, 0 }
 0x1a7   :  { %v608_v12 = vpop.permute.xlu2 %607 }
 0x1a8   :  { %v618_v16 = vsel %vm362_vm1, %v608_v12, 0 }
 0x1a9   :  { %v478_v5 = vpop.permute.xlu1 %477 }
 0x1af   :  { %v484_v3 = vpop.permute.xlu0 %483  ;;  %v606_v18 = vpop.permute.xlu2 %605 }
 0x1b0   :  { %v495_v4 = vsel %vm362_vm1, %v484_v3, 0 }
 0x1b1   :  { %503 = vmatpush.bf16.xpose.msrb.mxu2 %v495_v4  ;;  %v728_v10 = vpop.permute.xlu1 %727 }
 0x1b7   :  { %v482_v7 = vpop.permute.xlu0 %481  ;;  %v815_v33 = vpop.permute.xlu2 %814 }
 0x1b8   :  { %v492_v8 = vsel %vm362_vm1, %v482_v7, 0 }
 0x1b9   :  { %504 = vmatpush.bf16.xpose.msrb.mxu2 %v492_v8  ;;  %v730_v17 = vpop.permute.xlu1 %729 }
 0x1bf   :  { %v610_v11 = vpop.permute.xlu0 %609 }
 0x1c0   :  { %v621_v13 = vsel %vm362_vm1, %v610_v11, 0  ;;  %2838 = vmatmul.msk.bf16.vlgmr.msrb.gmra.mxu2 %vm362_vm1, %v476_v2 }
 0x1c1   :  { %753 = vmatpush.bf16.xpose.msra.mxu2 %v745_v9  ;;  %629 = vmatpush.bf16.xpose.msra.mxu0 %v621_v13  ;;  %v565_v29 = vpop.permute.xlu1 %564 }
 0x1c7   :  { %v604_v15 = vpop.permute.xlu0 %603 }
 0x1c9   :  { %754 = vmatpush.bf16.xpose.msra.mxu2 %v742_v14  ;;  %630 = vmatpush.bf16.xpose.msra.mxu0 %v618_v16 }
 0x1cb   :  { %v384_v21 = vpop.f32.mrf.mxu0 }
 0x1cc   :  { %v394_v23 = vmul.f32 0.17677669, %v384_v21 }
 0x1ce   :  { %v398_v24 = vadd.f32 %v394_v23, %v3763_v22 }
 0x1cf   :  { %v567_v25 = vpop.permute.xlu0 %566 }
 0x1d0   :  { %2839 = vmatmul.msk.bf16.gmra.mxu2 %vm362_vm1, %v478_v5  ;;  %582 = vmatpush.bf16.msrb.mxu3 %v567_v25  ;;  %v402_v28 = vsel %vm362_vm1, %v398_v24, -inf }
 0x1d1   :  { %2842 = vmatmul.msk.bf16.vlgmr.msra.gmra.mxu0 %vm362_vm1, %v604_v15  ;;  %403 = vmax.xlane.f32.xlu2 %v402_v28 }
 0x1d3   :  { %v386_v31 = vpop.f32.mrf.mxu0 }
 0x1d4   :  { %v395_v34 = vmul.f32 0.17677669, %v386_v31  ;;  %583 = vmatpush.bf16.msrb.mxu3 %v565_v29 }
 0x1d6   :  { %v399_v35 = vadd.f32 %v395_v34, %v3772_v32 }
 0x1d8   :  { %830 = vmatpush.bf16.msra.mxu3 %v815_v33  ;;  %v405_v36 = vsel %vm362_vm1, %v399_v35, -inf }
 0x1d9   :  { %406 = vmax.xlane.f32.xlu2 %v405_v36 }
 0x1db   :  { %v389_v37 = vpop.f32.mrf.mxu0 }
 0x1dc   :  { %v396_v39 = vmul.f32 0.17677669, %v389_v37 }
 0x1de   :  { %v400_v40 = vadd.f32 %v396_v39, %v3779_v38 }
 0x1e0   :  { %2846 = vmatmul.msk.bf16.vlgmr.msra.gmra.mxu2 %vm362_vm1, %v728_v10  ;;  %v408_v41 = vsel %vm362_vm1, %v400_v40, -inf }
 0x1e1   :  { %2843 = vmatmul.msk.bf16.gmra.mxu0 %vm362_vm1, %v606_v18  ;;  %409 = vmax.xlane.f32.xlu0 %v408_v41 }
 0x1e3   :  { %v391_v42 = vpop.f32.mrf.mxu0 }
 0x1e4   :  { %v397_v44 = vmul.f32 0.17677669, %v391_v42 }
 0x1e6   :  { %v401_v45 = vadd.f32 %v397_v44, %v3788_v43 }
 0x1e8   :  { %v411_v46 = vsel %vm362_vm1, %v401_v45, -inf }
 0x1e9   :  { %412 = vmax.xlane.f32.xlu2 %v411_v46 }
 0x1f0   :  { %2847 = vmatmul.msk.bf16.gmra.mxu2 %vm362_vm1, %v730_v17 }
 0x243   :  { %v506_v47 = vpop.f32.mrf.mxu2 }
 0x244   :  { %v516_v48 = vmul.f32 0.17677669, %v506_v47  ;;  %v404_v49 = vpop.xlane.xlu2 %403 }
 0x245   :  { %v414_v51 = vsub.f32 %v398_v24, %v404_v49 }
 0x246   :  { %v3794_v50 = vadd.f32 %v516_v48, %v3763_v22 }
 0x247   :  { %v418_v54 = vmul.f32 1.442695, %v414_v51 }
 0x248   :  { %v524_v52 = vsel %vm362_vm1, %v3794_v50, -inf }
 0x249   :  { %525 = vmax.xlane.f32.xlu0 %v524_v52  ;;  %3365 = vpow2.f32 %v418_v54 }
 0x24b   :  { %v508_v53 = vpop.f32.mrf.mxu2 }
 0x24c   :  { %v517_v55 = vmul.f32 0.17677669, %v508_v53  ;;  %v407_v56 = vpop.xlane.xlu2 %406 }
 0x24d   :  { %v415_v58 = vsub.f32 %v399_v35, %v407_v56 }
 0x24e   :  { %v632_v59 = vpop.f32.mrf.mxu0  ;;  %v3799_v60 = vadd.f32 %v517_v55, %v3772_v32 }
 0x24f   :  { %v420_v61 = vmul.f32 1.442695, %v415_v58  ;;  %v642_v63 = vmul.f32 0.17677669, %v632_v59  ;;  %v3808_v5 = vpop.eup %3365 }
 0x250   :  { %v527_v0 = vsel %vm362_vm1, %v3799_v60, -inf }
 0x251   :  { %3367 = vpow2.f32 %v420_v61  ;;  %528 = vmax.xlane.f32.xlu1 %v527_v0  ;;  %v3804_v1 = vadd.f32 %v642_v63, %v3763_v22  ;;  %v426_v61 = vsel %vm362_vm1, %v3808_v5, 0.0 }
 0x253   :  { %v511_v2 = vpop.f32.mrf.mxu2  ;;  %v650_v3 = vsel %vm362_vm1, %v3804_v1, -inf }
 0x254   :  { %651 = vmax.xlane.f32.xlu2 %v650_v3  ;;  %v410_v4 = vpop.xlane.xlu0 %409  ;;  %v518_v12 = vmul.f32 0.17677669, %v511_v2 }
 0x255   :  { %v416_v9 = vsub.f32 %v400_v40, %v410_v4 }
 0x256   :  { %v634_v6 = vpop.f32.mrf.mxu0  ;;  %v3820_v21 = vadd.f32 %v518_v12, %v3779_v38 }
 0x257   :  { %v3368_v7 = vpop.eup %3367  ;;  %v643_v8 = vmul.f32 0.17677669, %v634_v6  ;;  %v422_v15 = vmul.f32 1.442695, %v416_v9 }
 0x258   :  { %v438_v10 = vpack.c.bf16 %v3368_v7, %v3808_v5  ;;  %v530_v25 = vsel %vm362_vm1, %v3820_v21, -inf }
 0x259   :  { %v3812_v11 = vadd.f32 %v643_v8, %v3772_v32  ;;  %3369 = vpow2.f32 %v422_v15 }
 0x25a   :  { %2836 = vmatmul.msk.bf16.vlgmr.msrb.gmra.mxu1 %vm362_vm1, %v438_v10 }
 0x25b   :  { %v513_v13 = vpop.f32.mrf.mxu2  ;;  %v653_v14 = vsel %vm362_vm1, %v3812_v11, -inf }
 0x25c   :  { %654 = vmax.xlane.f32.xlu2 %v653_v14  ;;  %v413_v16 = vpop.xlane.xlu2 %412  ;;  %v519_v23 = vmul.f32 0.17677669, %v513_v13 }
 0x25d   :  { %v417_v17 = vsub.f32 %v401_v45, %v413_v16  ;;  %812 = vrot.lane.b32.xlu0 %v3734_v62, %s3643_s23 }
 0x25e   :  { %v3832_v34 = vadd.f32 %v519_v23, %v3788_v43  ;;  %v637_v42 = vpop.f32.mrf.mxu0 }
 0x25f   :  { %v424_v18 = vmul.f32 1.442695, %v417_v17  ;;  %v3824_v29 = vpop.eup %3369  ;;  %v644_v52 = vmul.f32 0.17677669, %v637_v42 }
 0x260   :  { %v533_v39 = vsel %vm362_vm1, %v3832_v34, -inf }
 0x261   :  { %3371 = vpow2.f32 %v424_v18  ;;  %v3862_v53 = vadd.f32 %v644_v52, %v3779_v38 }
 0x263   :  { %v756_v24 = vpop.f32.mrf.mxu2  ;;  %v656_v55 = vsel %vm362_vm1, %v3862_v53, -inf }
 0x264   :  { %v766_v28 = vmul.f32 0.17677669, %v756_v24  ;;  %531 = vmax.xlane.f32.xlu2 %v530_v25 }
 0x266   :  { %v3827_v31 = vadd.f32 %v766_v28, %v3763_v22  ;;  %v639_v47 = vpop.f32.mrf.mxu0 }
 0x267   :  { %v3829_v33 = vpop.eup %3371  ;;  %v645_v48 = vmul.f32 0.17677669, %v639_v47 }
 0x268   :  { %v774_v35 = vsel %vm362_vm1, %v3827_v31, -inf  ;;  %v439_v36 = vpack.c.bf16 %v3829_v33, %v3824_v29 }
 0x269   :  { %775 = vmax.xlane.f32.xlu1 %v774_v35 }
 0x26a   :  { %2837 = vmatmul.msk.bf16.gmra.mxu1 %vm362_vm1, %v439_v36 }
 0x26b   :  { %v758_v37 = vpop.f32.mrf.mxu2 }
 0x26c   :  { %v767_v22 = vmul.f32 0.17677669, %v758_v37  ;;  %534 = vmax.xlane.f32.xlu2 %v533_v39 }
 0x26e   :  { %v3842_v40 = vadd.f32 %v767_v22, %v3772_v32  ;;  %v3854_v32 = vadd.f32 %v645_v48, %v3788_v43 }
 0x270   :  { %v777_v41 = vsel %vm362_vm1, %v3842_v40, -inf  ;;  %v659_v51 = vsel %vm362_vm1, %v3854_v32, -inf }
 0x273   :  { %v761_v44 = vpop.f32.mrf.mxu2 }
 0x274   :  { %778 = vmax.xlane.f32.xlu2 %v777_v41  ;;  %v768_v45 = vmul.f32 0.17677669, %v761_v44 }
 0x276   :  { %v3849_v46 = vadd.f32 %v768_v45, %v3779_v38 }
 0x278   :  { %v780_v49 = vsel %vm362_vm1, %v3849_v46, -inf }
 0x27b   :  { %v763_v54 = vpop.f32.mrf.mxu2 }
 0x27c   :  { %v769_v56 = vmul.f32 0.17677669, %v763_v54 }
 0x27e   :  { %v3867_v58 = vadd.f32 %v769_v56, %v3788_v43 }
 0x282   :  { %690 = vrot.lane.b32.xlu1 %v3727_v57, %s3644_s24  ;;  %v429_v57 = vsel %vm362_vm1, %v3368_v7, 0.0 }
 0x287   :  { %781 = vmax.xlane.f32.xlu0 %v780_v49 }
 0x28c   :  { %688 = vrot.lane.b32.xlu2 %v3734_v62, %s3644_s24  ;;  %v783_v62 = vsel %vm362_vm1, %v3867_v58, -inf }
 0x28f   :  { %660 = vmax.xlane.f32.xlu0 %v659_v51 }
 0x297   :  { %430 = vadd.xlane.f32.xlu0 %v429_v57 }
 0x2ac   :  { %657 = vmax.xlane.f32.xlu1 %v656_v55 }
 0x2b5   :  { %784 = vmax.xlane.f32.xlu2 %v783_v62 }
 0x2bc   :  { %v526_v59 = vpop.xlane.xlu0 %525 }
 0x2bd   :  { %v536_v38 = vsub.f32 %v3794_v50, %v526_v59  ;;  %427 = vadd.xlane.f32.xlu2 %v426_v61 }
 0x2bf   :  { %v540_v63 = vmul.f32 1.442695, %v536_v38 }
 0x2c1   :  { %3373 = vpow2.f32 %v540_v63 }
 0x2c4   :  { %v529_v0 = vpop.xlane.xlu1 %528 }
 0x2c5   :  { %v537_v2 = vsub.f32 %v3799_v60, %v529_v0 }
 0x2c7   :  { %v3374_v3 = vpop.eup %3373  ;;  %v542_v4 = vmul.f32 1.442695, %v537_v2  ;;  %v652_v43 = vpop.xlane.xlu2 %651 }
 0x2c8   :  { %v662_v6 = vsub.f32 %v3804_v1, %v652_v43  ;;  %v548_v7 = vsel %vm362_vm1, %v3374_v3, 0.0 }
 0x2c9   :  { %3375 = vpow2.f32 %v542_v4  ;;  %549 = vadd.xlane.f32.xlu2 %v548_v7 }
 0x2ca   :  { %v666_v8 = vmul.f32 1.442695, %v662_v6 }
 0x2cc   :  { %3377 = vpow2.f32 %v666_v8 }
 0x2cf   :  { %v3376_v5 = vpop.eup %3375  ;;  %v655_v9 = vpop.xlane.xlu2 %654 }
 0x2d0   :  { %v813_v50 = vpop.permute.xlu0 %812  ;;  %v663_v10 = vsub.f32 %v3812_v11, %v655_v9  ;;  %v551_v12 = vsel %vm362_vm1, %v3376_v5, 0.0  ;;  %v560_v60 = vpack.c.bf16 %v3376_v5, %v3374_v3 }
 0x2d1   :  { %831 = vmatpush.bf16.msra.mxu3 %v813_v50  ;;  %552 = vadd.xlane.f32.xlu0 %v551_v12 }
 0x2d2   :  { %v3378_v13 = vpop.eup %3377  ;;  %v668_v14 = vmul.f32 1.442695, %v663_v10  ;;  %2840 = vmatmul.msk.bf16.vlgmr.msrb.gmra.mxu3 %vm362_vm1, %v560_v60 }
 0x2d3   :  { %v674_v1 = vsel %vm362_vm1, %v3378_v13, 0.0 }
 0x2d4   :  { %3379 = vpow2.f32 %v668_v14  ;;  %675 = vadd.xlane.f32.xlu1 %v674_v1 }
 0x2d7   :  { %v532_v15 = vpop.xlane.xlu2 %531  ;;  %v3907_v10 = vpop.f32.mrf.mxu1 }
 0x2d8   :  { %v538_v16 = vsub.f32 %v3820_v21, %v532_v15 }
 0x2da   :  { %v3380_v17 = vpop.eup %3379  ;;  %v544_v18 = vmul.f32 1.442695, %v538_v16 }
 0x2db   :  { %v677_v11 = vsel %vm362_vm1, %v3380_v17, 0.0  ;;  %v686_v51 = vpack.c.bf16 %v3380_v17, %v3378_v13 }
 0x2dc   :  { %3381 = vpow2.f32 %v544_v18  ;;  %678 = vadd.xlane.f32.xlu2 %v677_v11  ;;  %v776_v23 = vpop.xlane.xlu1 %775 }
 0x2dd   :  { %v786_v35 = vsub.f32 %v3827_v31, %v776_v23 }
 0x2df   :  { %v535_v24 = vpop.xlane.xlu2 %534  ;;  %v790_v39 = vmul.f32 1.442695, %v786_v35  ;;  %v3909_v15 = vpop.f32.mrf.mxu1 }
 0x2e0   :  { %v539_v25 = vsub.f32 %v3832_v34, %v535_v24 }
 0x2e2   :  { %v3382_v28 = vpop.eup %3381  ;;  %v546_v36 = vmul.f32 1.442695, %v539_v25 }
 0x2e3   :  { %v554_v37 = vsel %vm362_vm1, %v3382_v28, 0.0 }
 0x2e4   :  { %3383 = vpow2.f32 %v546_v36  ;;  %555 = vadd.xlane.f32.xlu2 %v554_v37 }
 0x2e5   :  { %3385 = vpow2.f32 %v790_v39 }
 0x2e7   :  { %v779_v21 = vpop.xlane.xlu2 %778  ;;  %v3912_v23 = vpop.f32.mrf.mxu1 }
 0x2e8   :  { %v787_v41 = vsub.f32 %v3842_v40, %v779_v21 }
 0x2ea   :  { %v3384_v22 = vpop.eup %3383  ;;  %v792_v34 = vmul.f32 1.442695, %v787_v41 }
 0x2eb   :  { %v557_v42 = vsel %vm362_vm1, %v3384_v22, 0.0  ;;  %v561_v44 = vpack.c.bf16 %v3384_v22, %v3382_v28  ;;  %v3386_v45 = vpop.eup %3385 }
 0x2ec   :  { %558 = vadd.xlane.f32.xlu0 %v557_v42  ;;  %3387 = vpow2.f32 %v792_v34  ;;  %v798_v31 = vsel %vm362_vm1, %v3386_v45, 0.0 }
 0x2ed   :  { %2841 = vmatmul.msk.bf16.gmra.mxu3 %vm362_vm1, %v561_v44 }
 0x2ef   :  { %v689_v49 = vpop.permute.xlu2 %688  ;;  %v3914_v24 = vpop.f32.mrf.mxu1 }
 0x2f2   :  { %v3388_v48 = vpop.eup %3387 }
 0x2f3   :  { %v810_v40 = vpack.c.bf16 %v3388_v48, %v3386_v45  ;;  %v801_v5 = vsel %vm362_vm1, %v3388_v48, 0.0 }
 0x2f4   :  { %799 = vadd.xlane.f32.xlu0 %v798_v31  ;;  %v691_v47 = vpop.permute.xlu1 %690 }
 0x2f5   :  { %706 = vmatpush.bf16.msra.mxu1 %v691_v47 }
 0x2f9   :  { %707 = vmatpush.bf16.msra.mxu1 %v689_v49 }
 0x2fa   :  { %v782_v57 = vpop.xlane.xlu0 %781 }
 0x2fb   :  { %v788_v52 = vsub.f32 %v3849_v46, %v782_v57 }
 0x2fc   :  { %2844 = vmatmul.msk.bf16.vlgmr.msra.gmra.mxu1 %vm362_vm1, %v686_v51  ;;  %v432_v51 = vsel %vm362_vm1, %v3824_v29, 0.0 }
 0x2fd   :  { %v794_v54 = vmul.f32 1.442695, %v788_v52  ;;  %2848 = vmatmul.msk.bf16.vlgmr.msra.gmra.mxu3 %vm362_vm1, %v810_v40 }
 0x2ff   :  { %3389 = vpow2.f32 %v794_v54 }
 0x302   :  { %v661_v55 = vpop.xlane.xlu0 %660 }
 0x303   :  { %v665_v56 = vsub.f32 %v3854_v32, %v661_v55 }
 0x305   :  { %v3390_v62 = vpop.eup %3389  ;;  %v672_v59 = vmul.f32 1.442695, %v665_v56 }
 0x306   :  { %v804_v61 = vsel %vm362_vm1, %v3390_v62, 0.0 }
 0x307   :  { %3391 = vpow2.f32 %v672_v59  ;;  %805 = vadd.xlane.f32.xlu0 %v804_v61 }
 0x30a   :  { %v3905_v50 = vpop.xlane.xlu0 %430 }
 0x30d   :  { %v3392_v38 = vpop.eup %3391 }
 0x30e   :  { %v683_v63 = vsel %vm362_vm1, %v3392_v38, 0.0 }
 0x30f   :  { %684 = vadd.xlane.f32.xlu2 %v683_v63 }
 0x31f   :  { %v658_v46 = vpop.xlane.xlu1 %657 }
 0x320   :  { %v664_v0 = vsub.f32 %v3862_v53, %v658_v46 }
 0x322   :  { %v670_v2 = vmul.f32 1.442695, %v664_v0 }
 0x324   :  { %3393 = vpow2.f32 %v670_v2 }
 0x328   :  { %v785_v3 = vpop.xlane.xlu2 %784 }
 0x329   :  { %v789_v4 = vsub.f32 %v3867_v58, %v785_v3 }
 0x32a   :  { %v3394_v43 = vpop.eup %3393 }
 0x32b   :  { %v796_v32 = vmul.f32 1.442695, %v789_v4  ;;  %v680_v6 = vsel %vm362_vm1, %v3394_v43, 0.0  ;;  %v687_v7 = vpack.c.bf16 %v3392_v38, %v3394_v43 }
 0x32c   :  { %681 = vadd.xlane.f32.xlu1 %v680_v6 }
 0x32d   :  { %3395 = vpow2.f32 %v796_v32  ;;  %2845 = vmatmul.msk.bf16.gmra.mxu1 %vm362_vm1, %v687_v7 }
 0x330   :  { %v3903_v58 = vpop.xlane.xlu2 %427 }
 0x333   :  { %v3396_v8 = vpop.eup %3395 }
 0x334   :  { %802 = vadd.xlane.f32.xlu1 %v801_v5  ;;  %v811_v9 = vpack.c.bf16 %v3396_v8, %v3390_v62  ;;  %v807_v53 = vsel %vm362_vm1, %v3396_v8, 0.0 }
 0x336   :  { %2849 = vmatmul.msk.bf16.gmra.mxu3 %vm362_vm1, %v811_v9 }
 0x33c   :  { %808 = vadd.xlane.f32.xlu1 %v807_v53  ;;  %v550_v12 = vpop.xlane.xlu2 %549 }
 0x33d   :  { %3397 = vrcp.f32 %v550_v12 }
 0x343   :  { %v3398_v14 = vpop.eup %3397 }
 0x344   :  { %v553_v60 = vpop.xlane.xlu0 %552 }
 0x345   :  { %3399 = vrcp.f32 %v553_v60 }
 0x347   :  { %v676_v28 = vpop.xlane.xlu1 %675 }
 0x348   :  { %3401 = vrcp.f32 %v676_v28  ;;  %v2872_v28 = vld [vmem:[#allocation5 + $0xfc] sm:$0xf] }
 0x34b   :  { %v3400_v1 = vpop.eup %3399 }
 0x34e   :  { %v3402_v39 = vpop.eup %3401 }
 0x34f   :  { %v679_v25 = vpop.xlane.xlu2 %678 }
 0x350   :  { %3403 = vrcp.f32 %v679_v25 }
 0x355   :  { %v585_v13 = vpop.f32.mrf.mxu3 }
 0x356   :  { %v599_v17 = vmul.f32 %v3398_v14, %v585_v13  ;;  %v3404_v22 = vpop.eup %3403  ;;  %v435_v14 = vsel %vm362_vm1, %v3829_v33, 0.0 }
 0x357   :  { %v556_v21 = vpop.xlane.xlu2 %555 }
 0x35d   :  { %v587_v16 = vpop.f32.mrf.mxu3 }
 0x35e   :  { %v600_v18 = vmul.f32 %v3400_v1, %v587_v16  ;;  %v2880_v1 = vld [vmem:[#allocation5 + $0x15c] sm:$0xf]  ;;  %v3219_v16 = vld [vmem:[#allocation5 + $0x170] sm:$0xf0] }
 0x35f   :  { %v559_v37 = vpop.xlane.xlu0 %558 }
 0x360   :  { %v3309_v11 = vpack.i.bf16 %v600_v18, %v599_v17  ;;  %3405 = vrcp.f32 %v559_v37  ;;  %v2876_v17 = vld [vmem:[#allocation5 + $0x12c] sm:$0xf]  ;;  %v2881_v18 = vor.u32 %v3219_v16, %v2880_v1 }
 0x361   :  { %3407 = vrcp.f32 %v556_v21 }
 0x362   :  { %3310 = vrot.lane.b32.xlu1 %v3309_v11, %s3643_s23  ;;  %v3218_v11 = vld [vmem:[#allocation5 + $0x140] sm:$0xf0]  ;;  %980 = vmatpush.bf16.msrb.mxu0 %v2881_v18 }
 0x363   :  { %v2877_v25 = vor.u32 %v3218_v11, %v2876_v17 }
 0x366   :  { %v3406_v31 = vpop.eup %3405  ;;  %981 = vmatpush.bf16.msrb.mxu0 %v2877_v25 }
 0x367   :  { %v3408_v48 = vpop.eup %3407  ;;  %v800_v52 = vpop.xlane.xlu0 %799 }
 0x368   :  { %3409 = vrcp.f32 %v800_v52 }
 0x36e   :  { %v3410_v59 = vpop.eup %3409 }
 0x370   :  { %v590_v36 = vpop.f32.mrf.mxu3 }
 0x371   :  { %v601_v49 = vmul.f32 %v3408_v48, %v590_v36  ;;  %v2868_v36 = vld [vmem:[#allocation5 + $0xcc] sm:$0xf] }
 0x372   :  { %v2852_v48 = vld [vmem:[#allocation5 + $0xc] sm:$0xf] }
 0x378   :  { %v592_v45 = vpop.f32.mrf.mxu3 }
 0x379   :  { %v709_v35 = vpop.f32.mrf.mxu1  ;;  %v602_v47 = vmul.f32 %v3406_v31, %v592_v45  ;;  %v2856_v45 = vld [vmem:[#allocation5 + $0x3c] sm:$0xf]  ;;  %v3213_v31 = vld [vmem:[#allocation5 + $0x50] sm:$0xf0] }
 0x37a   :  { %v723_v42 = vmul.f32 %v3402_v39, %v709_v35  ;;  %v806_v6 = vpop.xlane.xlu0 %805  ;;  %v3217_v35 = vld [vmem:[#allocation5 + $0x110] sm:$0xf0]  ;;  %v3216_v39 = vld [vmem:[#allocation5 + $0xe0] sm:$0xf0] }
 0x37b   :  { %v3319_v57 = vpack.i.bf16 %v602_v47, %v601_v49  ;;  %v2873_v37 = vor.u32 %v3217_v35, %v2872_v28  ;;  %v2869_v21 = vor.u32 %v3216_v39, %v2868_v36  ;;  %v2857_v47 = vor.u32 %v3213_v31, %v2856_v45  ;;  %v3212_v49 = vld [vmem:[#allocation5 + $0x20] sm:$0xf0] }
 0x37c   :  { %v931_v36 = vperm.slane %v3720_v30, 3  ;;  %v3645_v30 = vmov 128.0  }
 0x37d   :  { %982 = vmatpush.bf16.msrb.mxu0 %v2873_v37 }
 0x380   :  { %v833_v54 = vpop.f32.mrf.mxu3 }
 0x381   :  { %v711_v41 = vpop.f32.mrf.mxu1  ;;  %v847_v63 = vmul.f32 %v3410_v59, %v833_v54  ;;  %983 = vmatpush.bf16.msrb.mxu0 %v2869_v21 }
 0x382   :  { %v724_v44 = vmul.f32 %v3404_v22, %v711_v41  ;;  %v685_v56 = vpop.xlane.xlu2 %684  ;;  %v2864_v22 = vld [vmem:[#allocation5 + $0x9c] sm:$0xf]  ;;  %v3215_v41 = vld [vmem:[#allocation5 + $0xb0] sm:$0xf0] }
 0x383   :  { %v2865_v33 = vor.u32 %v3215_v41, %v2864_v22 }
 0x384   :  { %v3304_v34 = vpack.i.bf16 %v724_v44, %v723_v42  ;;  %v2860_v42 = vld [vmem:[#allocation5 + $0x6c] sm:$0xf]  ;;  %v3214_v44 = vld [vmem:[#allocation5 + $0x80] sm:$0xf0] }
 0x385   :  { %984 = vmatpush.bf16.msrb.mxu0 %v2865_v33 }
 0x386   :  { %3305 = vrot.lane.b32.xlu2 %v3304_v34, %s3644_s24  ;;  %v2861_v34 = vor.u32 %v3214_v44, %v2860_v42 }
 0x388   :  { %v835_v38 = vpop.f32.mrf.mxu3 }
 0x389   :  { %985 = vmatpush.bf16.msrb.mxu0 %v2861_v34 }
 0x38c   :  { %433 = vadd.xlane.f32.xlu1 %v432_v51  ;;  %v2853_v51 = vor.u32 %v3212_v49, %v2852_v48 }
 0x38d   :  { %986 = vmatpush.bf16.msrb.mxu0 %v2857_v47 }
 0x38e   :  { %3320 = vrot.lane.b32.xlu2 %v3319_v57, %s3643_s23 }
 0x391   :  { %987 = vmatpush.bf16.msrb.mxu0 %v2853_v51 }
 0x39f   :  { %v682_v40 = vpop.xlane.xlu1 %681 }
 0x3a7   :  { %v803_v55 = vpop.xlane.xlu1 %802 }
 0x3a8   :  { %3411 = vrcp.f32 %v803_v55 }
 0x3a9   :  { %3413 = vrcp.f32 %v685_v56 }
 0x3aa   :  { %v714_v62 = vpop.f32.mrf.mxu1  ;;  %3415 = vrcp.f32 %v682_v40 }
 0x3ab   :  { %3417 = vrcp.f32 %v806_v6 }
 0x3ae   :  { %v3412_v61 = vpop.eup %3411 }
 0x3af   :  { %v848_v46 = vmul.f32 %v3412_v61, %v835_v38  ;;  %v3414_v29 = vpop.eup %3413  ;;  %v809_v7 = vpop.xlane.xlu1 %808 }
 0x3b0   :  { %v3416_v2 = vpop.eup %3415  ;;  %3419 = vrcp.f32 %v809_v7 }
 0x3b1   :  { %v3314_v0 = vpack.i.bf16 %v848_v46, %v847_v63  ;;  %v725_v4 = vmul.f32 %v3416_v2, %v714_v62  ;;  %v3418_v5 = vpop.eup %3417  ;;  %3421 = vrcp.f32 %v3905_v50 }
 0x3b2   :  { %v716_v3 = vpop.f32.mrf.mxu1  ;;  %3423 = vrcp.f32 %v3903_v58 }
 0x3b3   :  { %v726_v43 = vmul.f32 %v3414_v29, %v716_v3  ;;  %3315 = vrot.lane.b32.xlu0 %v3314_v0, %s3642_s0 }
 0x3b5   :  { %v3324_v32 = vpack.i.bf16 %v726_v43, %v725_v4 }
 0x3b6   :  { %v3420_v9 = vpop.eup %3419 }
 0x3b7   :  { %3325 = vrot.lane.b32.xlu2 %v3324_v32, %s3644_s24  ;;  %v3422_v40 = vpop.eup %3421 }
 0x3b8   :  { %v3424_v54 = vpop.eup %3423  ;;  %v470_v61 = vmul.f32 %v3422_v40, %v3909_v15 }
 0x3b9   :  { %v838_v8 = vpop.f32.mrf.mxu3  ;;  %v469_v38 = vmul.f32 %v3424_v54, %v3907_v10 }
 0x3ba   :  { %v849_v12 = vmul.f32 %v3418_v5, %v838_v8 }
 0x3c1   :  { %v840_v53 = vpop.f32.mrf.mxu3 }
 0x3c2   :  { %v850_v60 = vmul.f32 %v3420_v9, %v840_v53 }
 0x3c4   :  { %v3329_v13 = vpack.i.bf16 %v850_v60, %v849_v12 }
 0x3c6   :  { %3330 = vrot.lane.b32.xlu2 %v3329_v13, %s3642_s0 }
 0x3d4   :  { %v3311_v57 = vpop.permute.xlu1 %3310 }
 0x3d5   :  { %v3313_v55 = vunpack.i.h.bf16 %v3311_v57  ;;  %v3312_v56 = vunpack.i.l.bf16 %v3311_v57 }
 0x3d7   :  { %v900_v46 = vsel %vm362_vm1, %v470_v61, %v3313_v55  ;;  %v899_v50 = vsel %vm362_vm1, %v469_v38, %v3312_v56 }
 0x3dd   :  { %436 = vadd.xlane.f32.xlu0 %v435_v14 }
 0x3e0   :  { %v3306_v52 = vpop.permute.xlu2 %3305 }
 0x3e1   :  { %v3308_v62 = vunpack.i.h.bf16 %v3306_v52  ;;  %v3307_v59 = vunpack.i.l.bf16 %v3306_v52 }
 0x3e3   :  { %v905_v0 = vsel %vm903_vm2, %v900_v46, %v3308_v62  ;;  %v904_v2 = vsel %vm903_vm2, %v899_v50, %v3307_v59 }
 0x3e8   :  { %v3321_v10 = vpop.permute.xlu2 %3320 }
 0x3e9   :  { %v3323_v12 = vunpack.i.h.bf16 %v3321_v10  ;;  %v3322_v60 = vunpack.i.l.bf16 %v3321_v10  ;;  %v2904_v10 = vld [vmem:[#allocation5 + $0x100] sm:$0xf] }
 0x3ff   :  { %v434_v43 = vpop.xlane.xlu1 %433 }
 0x400   :  { %3425 = vrcp.f32 %v434_v43  ;;  %v3225_v43 = vld [vmem:[#allocation5 + $0x114] sm:$0xf0] }
 0x406   :  { %v3426_v7 = vpop.eup %3425 }
 0x407   :  { %v471_v5 = vmul.f32 %v3426_v7, %v3912_v23  ;;  %v3224_v7 = vld [vmem:[#allocation5 + $0xe4] sm:$0xf0] }
 0x409   :  { %v901_v17 = vsel %vm362_vm1, %v471_v5, %v3322_v60  ;;  %v2896_v5 = vld [vmem:[#allocation5 + $0xa0] sm:$0xf]  ;;  %v3222_v60 = vld [vmem:[#allocation5 + $0x84] sm:$0xf0] }
 0x411   :  { %v3326_v32 = vpop.permute.xlu2 %3325 }
 0x412   :  { %v3327_v53 = vunpack.i.l.bf16 %v3326_v32  ;;  %v3328_v1 = vunpack.i.h.bf16 %v3326_v32  ;;  %v2905_v32 = vor.u32 %v3225_v43, %v2904_v10  ;;  %v2936_v10 = vld [vmem:[#allocation5 + $0x104] sm:$0xf]  ;;  %v3233_v43 = vld [vmem:[#allocation5 + $0x118] sm:$0xf0] }
 0x414   :  { %v906_v11 = vsel %vm903_vm2, %v901_v17, %v3327_v53  ;;  %v2884_v17 = vld [vmem:[#allocation5 + $0x10] sm:$0xf] }
 0x420   :  { %v3331_v8 = vpop.permute.xlu2 %3330 }
 0x421   :  { %v3332_v13 = vunpack.i.l.bf16 %v3331_v8  ;;  %v3333_v16 = vunpack.i.h.bf16 %v3331_v8 }
 0x423   :  { %v911_v28 = vsel %vm908_vm3, %v906_v11, %v3332_v13 }
 0x425   :  { %v3316_v63 = vpop.permute.xlu0 %3315 }
 0x426   :  { %v3318_v29 = vunpack.i.h.bf16 %v3316_v63  ;;  %v3317_v58 = vunpack.i.l.bf16 %v3316_v63 }
 0x428   :  { %v909_v3 = vsel %vm908_vm3, %v904_v2, %v3317_v58  ;;  %v910_v4 = vsel %vm908_vm3, %v905_v0, %v3318_v29  ;;  %v2912_v58 = vld [vmem:[#allocation5 + $0x160] sm:$0xf]  ;;  %v3227_v0 = vld [vmem:[#allocation5 + $0x174] sm:$0xf0] }
 0x429   :  { %v913_v15 = vpack.c.bf16 %v910_v4, %v909_v3  ;;  %v2913_v2 = vor.u32 %v3227_v0, %v2912_v58  ;;  %v2908_v3 = vld [vmem:[#allocation5 + $0x130] sm:$0xf]  ;;  %v3226_v4 = vld [vmem:[#allocation5 + $0x144] sm:$0xf0]  ;;  %v3234_v0 = vld [vmem:[#allocation5 + $0x148] sm:$0xf0] }
 0x42b   :  { %988 = vmatmul.bf16.vlgmr.msrb.gmra.mxu0 %v913_v15  ;;  %1167 = vmatpush.bf16.msrb.mxu1 %v2913_v2  ;;  %v2909_v15 = vor.u32 %v3226_v4, %v2908_v3 }
 0x42f   :  { %1168 = vmatpush.bf16.msrb.mxu1 %v2909_v15 }
 0x433   :  { %1169 = vmatpush.bf16.msrb.mxu1 %v2905_v32 }
 0x450   :  { %v437_v6 = vpop.xlane.xlu0 %436 }
 0x451   :  { %3427 = vrcp.f32 %v437_v6  ;;  %v2900_v6 = vld [vmem:[#allocation5 + $0xd0] sm:$0xf] }
 0x452   :  { %3429 = vrcp.f32 %v3645_v30  ;;  %v2901_v8 = vor.u32 %v3224_v7, %v2900_v6  ;;  %v2937_v7 = vor.u32 %v3233_v43, %v2936_v10 }
 0x454   :  { %1170 = vmatpush.bf16.msrb.mxu1 %v2901_v8  ;;  %v2932_v8 = vld [vmem:[#allocation5 + $0xd4] sm:$0xf] }
 0x457   :  { %v3428_v9 = vpop.eup %3427 }
 0x458   :  { %v472_v14 = vmul.f32 %v3428_v9, %v3914_v24  ;;  %v3430_v47 = vpop.eup %3429  ;;  %v3223_v9 = vld [vmem:[#allocation5 + $0xb4] sm:$0xf0] }
 0x459   :  { %vm1016_vm4 = vweird.f32 %v3430_v47  ;;  %v2897_v53 = vor.u32 %v3223_v9, %v2896_v5  ;;  %v3232_v5 = vld [vmem:[#allocation5 + $0xe8] sm:$0xf0] }
 0x45a   :  { %v902_v18 = vsel %vm362_vm1, %v472_v14, %v3323_v12  ;;  %v2892_v12 = vld [vmem:[#allocation5 + $0x70] sm:$0xf]  ;;  %v2888_v14 = vld [vmem:[#allocation5 + $0x40] sm:$0xf] }
 0x45b   :  { %v907_v25 = vsel %vm903_vm2, %v902_v18, %v3328_v1  ;;  %1171 = vmatpush.bf16.msrb.mxu1 %v2897_v53  ;;  %v2893_v13 = vor.u32 %v3222_v60, %v2892_v12  ;;  %v3221_v1 = vld [vmem:[#allocation5 + $0x54] sm:$0xf0]  ;;  %v3220_v18 = vld [vmem:[#allocation5 + $0x24] sm:$0xf0]  ;;  %v2933_v12 = vor.u32 %v3232_v5, %v2932_v8 }
 0x45c   :  { %v912_v23 = vsel %vm908_vm3, %v907_v25, %v3333_v16  ;;  %v2889_v16 = vor.u32 %v3221_v1, %v2888_v14 }
 0x45d   :  { %v914_v35 = vpack.c.bf16 %v912_v23, %v911_v28  ;;  %v2885_v28 = vor.u32 %v3220_v18, %v2884_v17 }
 0x45f   :  { %993 = vmatmul.bf16.gmra.mxu0 %v914_v35  ;;  %1172 = vmatpush.bf16.msrb.mxu1 %v2893_v13 }
 0x463   :  { %1173 = vmatpush.bf16.msrb.mxu1 %v2889_v16 }
 0x467   :  { %1174 = vmatpush.bf16.msrb.mxu1 %v2885_v28 }
 0x4a8   :  { %v989_v37 = vpop.f32.mrf.mxu0 }
 0x4a9   :  { %v990_v24 = vadd.f32 %v989_v37, %v931_v36 }
 0x4ab   :  { %v999_v39 = vadd.f32 %v990_v24, %v3708_v19  ;;  %v1012_v19 = vmul.f32 128.0, %v3430_v47 }
 0x4ad   :  { %1003 = vadd.xlane.f32.xlu2 %v999_v39  ;;  %v1013_v48 = vsub.f32 1.0, %v1012_v19  ;;  %v3973_v19 = vld [vmem:[#allocation7] sm:$0xff] }
 0x4af   :  { %v1014_v49 = vmul.f32 %v3430_v47, %v1013_v48  ;;  %v1090_v48 = vperm.slane %v3973_v19, 4 }
 0x4b0   :  { %v991_v21 = vpop.f32.mrf.mxu0 }
 0x4b1   :  { %v992_v22 = vadd.f32 %v991_v21, %v931_v36  ;;  %v1015_v51 = vadd.f32 %v3430_v47, %v1014_v49 }
 0x4b3   :  { %v1000_v41 = vadd.f32 %v992_v22, %v3710_v20  ;;  %v3948_v20 = vsel %vm1016_vm4, %v3430_v47, %v1015_v51 }
 0x4b5   :  { %1005 = vadd.xlane.f32.xlu1 %v1000_v41 }
 0x4dc   :  { %v994_v33 = vpop.f32.mrf.mxu0 }
 0x4dd   :  { %v995_v42 = vadd.f32 %v994_v33, %v931_v36 }
 0x4df   :  { %v1001_v44 = vadd.f32 %v995_v42, %v3714_v26 }
 0x4e1   :  { %1007 = vadd.xlane.f32.xlu0 %v1001_v44 }
 0x4e4   :  { %v996_v34 = vpop.f32.mrf.mxu0 }
 0x4e5   :  { %v997_v45 = vadd.f32 %v996_v34, %v931_v36 }
 0x4e7   :  { %v1002_v31 = vadd.f32 %v997_v45, %v3716_v27 }
 0x4e9   :  { %1009 = vadd.xlane.f32.xlu1 %v1002_v31 }
 0x520   :  { %v1004_v57 = vpop.xlane.xlu2 %1003 }
 0x521   :  { %v1018_v40 = vmul.f32 %v3948_v20, %v1004_v57 }
 0x523   :  { %v3951_v26 = vsub.f32 %v999_v39, %v1018_v40 }
 0x525   :  { %v1026_v52 = vmul.f32 %v3951_v26, %v3951_v26 }
 0x527   :  { %1030 = vadd.xlane.f32.xlu0 %v1026_v52  ;;  %v1095_v52 = vperm.slane %v3973_v19, 5 }
 0x528   :  { %v1006_v27 = vpop.xlane.xlu1 %1005 }
 0x529   :  { %v1019_v54 = vmul.f32 %v3948_v20, %v1006_v27 }
 0x52b   :  { %v3956_v55 = vsub.f32 %v1000_v41, %v1019_v54 }
 0x52d   :  { %v1027_v56 = vmul.f32 %v3956_v55, %v3956_v55 }
 0x52f   :  { %1032 = vadd.xlane.f32.xlu1 %v1027_v56 }
 0x554   :  { %v1008_v62 = vpop.xlane.xlu0 %1007 }
 0x555   :  { %v1020_v59 = vmul.f32 %v3948_v20, %v1008_v62 }
 0x557   :  { %v3961_v61 = vsub.f32 %v1001_v44, %v1020_v59 }
 0x559   :  { %v1028_v38 = vmul.f32 %v3961_v61, %v3961_v61 }
 0x55b   :  { %1034 = vadd.xlane.f32.xlu0 %v1028_v38 }
 0x55c   :  { %v1010_v63 = vpop.xlane.xlu1 %1009 }
 0x55d   :  { %v1021_v46 = vmul.f32 %v3948_v20, %v1010_v63  ;;  %v2944_v63 = vld [vmem:[#allocation5 + $0x164] sm:$0xf] }
 0x55f   :  { %v3966_v50 = vsub.f32 %v1002_v31, %v1021_v46  ;;  %v3235_v46 = vld [vmem:[#allocation5 + $0x178] sm:$0xf0] }
 0x560   :  { %v2945_v58 = vor.u32 %v3235_v46, %v2944_v63 }
 0x561   :  { %v1029_v29 = vmul.f32 %v3966_v50, %v3966_v50 }
 0x562   :  { %1257 = vmatpush.bf16.msrb.mxu2 %v2945_v58 }
 0x563   :  { %1036 = vadd.xlane.f32.xlu1 %v1029_v29 }
 0x59a   :  { %v1031_v11 = vpop.xlane.xlu0 %1030 }
 0x59b   :  { %v1038_v25 = vmul.f32 %v1031_v11, %v3948_v20 }
 0x59d   :  { %v1042_v23 = vadd.f32 1e-05, %v1038_v25 }
 0x59f   :  { %3431 = vrsqrt.f32 %v1042_v23  ;;  %vm1052_vm6 = vweird.f32 %v1042_v23 }
 0x5a2   :  { %v1033_v35 = vpop.xlane.xlu1 %1032 }
 0x5a3   :  { %v1039_v36 = vmul.f32 %v1033_v35, %v3948_v20 }
 0x5a5   :  { %v3432_v37 = vpop.eup %3431  ;;  %v1043_v24 = vadd.f32 1e-05, %v1039_v36 }
 0x5a6   :  { %v1047_v39 = vmul.f32 %v3432_v37, %v1042_v23  ;;  %vm1053_vm5 = vweird.f32 %v3432_v37 }
 0x5a7   :  { %3433 = vrsqrt.f32 %v1043_v24  ;;  %vm1054_vm7 = vmor %vm1052_vm6, %vm1053_vm5  ;;  %vm1062_vm9 = vweird.f32 %v1043_v24 }
 0x5a8   :  { %v1048_v21 = vmul.f32 %v3432_v37, %v1047_v39 }
 0x5aa   :  { %v1049_v22 = vmul.f32 0.5, %v1048_v21  ;;  %v2928_v21 = vld [vmem:[#allocation5 + $0xa4] sm:$0xf] }
 0x5ac   :  { %v1050_v41 = vsub.f32 1.5, %v1049_v22  ;;  %v3231_v22 = vld [vmem:[#allocation5 + $0xb8] sm:$0xf0] }
 0x5ad   :  { %v3434_v33 = vpop.eup %3433 }
 0x5ae   :  { %v1051_v42 = vmul.f32 %v3432_v37, %v1050_v41  ;;  %v1057_v44 = vmul.f32 %v3434_v33, %v1043_v24  ;;  %vm1063_vm8 = vweird.f32 %v3434_v33  ;;  %v2929_v41 = vor.u32 %v3231_v22, %v2928_v21 }
 0x5af   :  { %vm1064_vm10 = vmor %vm1062_vm9, %vm1063_vm8 }
 0x5b0   :  { %v1058_v34 = vmul.f32 %v3434_v33, %v1057_v44  ;;  %v1055_v45 = vsel %vm1054_vm7, %v3432_v37, %v1051_v42  ;;  %v3230_v42 = vld [vmem:[#allocation5 + $0x88] sm:$0xf0] }
 0x5b1   :  { %v1086_v47 = vmul.f32 %v1055_v45, %v3951_v26 }
 0x5b2   :  { %v1059_v31 = vmul.f32 0.5, %v1058_v34  ;;  %v3229_v34 = vld [vmem:[#allocation5 + $0x58] sm:$0xf0] }
 0x5b3   :  { %v1091_v40 = vmul.f32 %v1090_v48, %v1086_v47 }
 0x5b4   :  { %v1060_v30 = vsub.f32 1.5, %v1059_v31  ;;  %v2916_v31 = vld [vmem:[#allocation5 + $0x14] sm:$0xf] }
 0x5b5   :  { %v3978_v54 = vadd.f32 %v1095_v52, %v1091_v40 }
 0x5b6   :  { %v1061_v49 = vmul.f32 %v3434_v33, %v1060_v30 }
 0x5b8   :  { %v1065_v51 = vsel %vm1064_vm10, %v3434_v33, %v1061_v49  ;;  %v2924_v33 = vld [vmem:[#allocation5 + $0x74] sm:$0xf] }
 0x5b9   :  { %v1087_v57 = vmul.f32 %v1065_v51, %v3956_v55  ;;  %v2940_v55 = vld [vmem:[#allocation5 + $0x134] sm:$0xf]  ;;  %v2925_v44 = vor.u32 %v3230_v42, %v2924_v33  ;;  %v3255_v33 = vld [vmem:[#allocation5 + $0x2b4] sm:$0xf0]  ;;  %v3254_v42 = vld [vmem:[#allocation5 + $0x2a4] sm:$0xf] }
 0x5ba   :  { %v2941_v3 = vor.u32 %v3234_v0, %v2940_v55 }
 0x5bb   :  { %v1092_v27 = vmul.f32 %v1090_v48, %v1087_v57 }
 0x5bc   :  { %1258 = vmatpush.bf16.msrb.mxu2 %v2941_v3 }
 0x5bd   :  { %v3980_v56 = vadd.f32 %v1095_v52, %v1092_v27 }
 0x5bf   :  { %v1100_v26 = vpack.c.bf16 %v3980_v56, %v3978_v54 }
 0x5c0   :  { %1259 = vmatpush.bf16.msrb.mxu2 %v2937_v7 }
 0x5c1   :  { %1175 = vmatmul.bf16.vlgmr.msrb.gmra.mxu1 %v1100_v26 }
 0x5c4   :  { %1260 = vmatpush.bf16.msrb.mxu2 %v2933_v12 }
 0x5c8   :  { %1261 = vmatpush.bf16.msrb.mxu2 %v2929_v41  ;;  %v3020_v41 = vld [vmem:[#allocation5 + $0x2a0] sm:$0xf] }
 0x5cc   :  { %1262 = vmatpush.bf16.msrb.mxu2 %v2925_v44  ;;  %v3021_v44 = vor.u32 %v3255_v33, %v3020_v41  ;;  %v2950_v33 = vld [vmem:[#allocation5 + $0x198] sm:$0xf0] }
 0x5ce   :  { %v1035_v62 = vpop.xlane.xlu0 %1034 }
 0x5cf   :  { %v1040_v59 = vmul.f32 %v1035_v62, %v3948_v20 }
 0x5d1   :  { %v1044_v38 = vadd.f32 1e-05, %v1040_v59 }
 0x5d3   :  { %3435 = vrsqrt.f32 %v1044_v38  ;;  %vm1072_vm12 = vweird.f32 %v1044_v38 }
 0x5d6   :  { %v1037_v29 = vpop.xlane.xlu1 %1036 }
 0x5d7   :  { %v1041_v2 = vmul.f32 %v1037_v29, %v3948_v20  ;;  %v1208_v29 = vperm.slane %v3973_v19, 7 }
 0x5d9   :  { %v3436_v4 = vpop.eup %3435  ;;  %v1045_v15 = vadd.f32 1e-05, %v1041_v2 }
 0x5da   :  { %v1067_v32 = vmul.f32 %v3436_v4, %v1044_v38  ;;  %vm1073_vm11 = vweird.f32 %v3436_v4 }
 0x5db   :  { %3437 = vrsqrt.f32 %v1045_v15  ;;  %vm1074_vm13 = vmor %vm1072_vm12, %vm1073_vm11  ;;  %vm1082_vm15 = vweird.f32 %v1045_v15 }
 0x5dc   :  { %v1068_v6 = vmul.f32 %v3436_v4, %v1067_v32 }
 0x5de   :  { %v1069_v9 = vmul.f32 0.5, %v1068_v6 }
 0x5e0   :  { %v1070_v53 = vsub.f32 1.5, %v1069_v9 }
 0x5e1   :  { %v3438_v60 = vpop.eup %3437 }
 0x5e2   :  { %v1071_v13 = vmul.f32 %v3436_v4, %v1070_v53  ;;  %v1077_v14 = vmul.f32 %v3438_v60, %v1045_v15  ;;  %vm1083_vm14 = vweird.f32 %v3438_v60 }
 0x5e3   :  { %vm1084_vm0 = vmor %vm1082_vm15, %vm1083_vm14 }
 0x5e4   :  { %v1078_v1 = vmul.f32 %v3438_v60, %v1077_v14  ;;  %v1075_v17 = vsel %vm1074_vm13, %v3436_v4, %v1071_v13 }
 0x5e5   :  { %v1088_v11 = vmul.f32 %v1075_v17, %v3961_v61  ;;  %v2920_v61 = vld [vmem:[#allocation5 + $0x44] sm:$0xf] }
 0x5e6   :  { %v1079_v16 = vmul.f32 0.5, %v1078_v1  ;;  %v2921_v45 = vor.u32 %v3229_v34, %v2920_v61  ;;  %v3022_v61 = vld [vmem:[#allocation5 + $0x2b8] sm:$0xf0]  ;;  %v3028_v34 = vld [vmem:[#allocation5 + $0x2a8] sm:$0xf] }
 0x5e7   :  { %v1093_v35 = vmul.f32 %v1090_v48, %v1088_v11 }
 0x5e8   :  { %v1080_v18 = vsub.f32 1.5, %v1079_v16  ;;  %1263 = vmatpush.bf16.msrb.mxu2 %v2921_v45  ;;  %v3256_v45 = vld [vmem:[#allocation5 + $0x2bc] sm:$0xf0] }
 0x5e9   :  { %v1098_v37 = vadd.f32 %v1095_v52, %v1093_v35  ;;  %v3257_v35 = vld [vmem:[#allocation5 + $0x2d4] sm:$0xf] }
 0x5ea   :  { %v1081_v25 = vmul.f32 %v3438_v60, %v1080_v18 }
 0x5ec   :  { %v1085_v28 = vsel %vm1084_vm0, %v3438_v60, %v1081_v25 }
 0x5ed   :  { %v1089_v23 = vmul.f32 %v1085_v28, %v3966_v50  ;;  %v3228_v50 = vld [vmem:[#allocation5 + $0x28] sm:$0xf0]  ;;  %v3032_v28 = vld [vmem:[#allocation5 + $0x2d0] sm:$0xf] }
 0x5ee   :  { %v2917_v30 = vor.u32 %v3228_v50, %v2916_v31  ;;  %v3025_v31 = vor.u32 %v3254_v42, %v3022_v61  ;;  %v3029_v50 = vor.u32 %v3256_v45, %v3028_v34  ;;  %v2956_v42 = vld [vmem:[#allocation5 + $0x188] sm:$0xf] }
 0x5ef   :  { %v1094_v36 = vmul.f32 %v1090_v48, %v1089_v23  ;;  %v1118_v48 = vperm.slane %v3973_v19, 6  ;;  %v3258_v23 = vld [vmem:[#allocation5 + $0x2e4] sm:$0xf0] }
 0x5f0   :  { %1264 = vmatpush.bf16.msrb.mxu2 %v2917_v30  ;;  %v3008_v30 = vld [vmem:[#allocation5 + $0x270] sm:$0xf] }
 0x5f1   :  { %v1099_v24 = vadd.f32 %v1095_v52, %v1094_v36  ;;  %v3033_v36 = vor.u32 %v3258_v23, %v3032_v28  ;;  %v2968_v28 = vld [vmem:[#allocation5 + $0x1b8] sm:$0xf]  ;;  %v3241_v23 = vld [vmem:[#allocation5 + $0x1cc] sm:$0xf0] }
 0x5f3   :  { %v1101_v39 = vpack.c.bf16 %v1099_v24, %v1098_v37  ;;  %1536 = vmatpush.bf16.msrb.mxu3 %v3033_v36 }
 0x5f5   :  { %1180 = vmatmul.bf16.gmra.mxu1 %v1101_v39  ;;  %v3259_v39 = vld [vmem:[#allocation5 + $0x2ec] sm:$0xf0] }
 0x5f7   :  { %1537 = vmatpush.bf16.msrb.mxu3 %v3021_v44  ;;  %v3238_v44 = vld [vmem:[#allocation5 + $0x19c] sm:$0xf0] }
 0x5f8   :  { %v2957_v34 = vor.u32 %v3238_v44, %v2956_v42 }
 0x63e   :  { %v1176_v47 = vpop.f32.mrf.mxu1 }
 0x63f   :  { %v1177_v49 = vadd.f32 %v1176_v47, %v1118_v48  ;;  %v3252_v47 = vld [vmem:[#allocation5 + $0x284] sm:$0xf0] }
 0x641   :  { %v1186_v40 = vmax.f32 %v1177_v49, 0.0  ;;  %v3009_v49 = vor.u32 %v3252_v47, %v3008_v30 }
 0x643   :  { %1538 = vmatpush.bf16.msrb.mxu3 %v3009_v49 }
 0x646   :  { %v1178_v51 = vpop.f32.mrf.mxu1 }
 0x647   :  { %v1179_v57 = vadd.f32 %v1178_v51, %v1118_v48  ;;  %v3010_v51 = vld [vmem:[#allocation5 + $0x288] sm:$0xf0] }
 0x649   :  { %v1187_v52 = vmax.f32 %v1179_v57, 0.0  ;;  %v3016_v57 = vld [vmem:[#allocation5 + $0x278] sm:$0xf] }
 0x64b   :  { %v1190_v27 = vpack.c.bf16 %v1187_v52, %v1186_v40  ;;  %v3253_v40 = vld [vmem:[#allocation5 + $0x28c] sm:$0xf0] }
 0x64d   :  { %1265 = vmatmul.bf16.vlgmr.msrb.gmra.mxu2 %v1190_v27  ;;  %v3017_v27 = vor.u32 %v3253_v40, %v3016_v57 }
 0x672   :  { %v1181_v26 = vpop.f32.mrf.mxu1 }
 0x673   :  { %v1182_v62 = vadd.f32 %v1181_v26, %v1118_v48  ;;  %v2996_v26 = vld [vmem:[#allocation5 + $0x240] sm:$0xf] }
 0x675   :  { %v1188_v63 = vmax.f32 %v1182_v62, 0.0  ;;  %v3249_v62 = vld [vmem:[#allocation5 + $0x254] sm:$0xf0] }
 0x67a   :  { %v1183_v59 = vpop.f32.mrf.mxu1 }
 0x67b   :  { %v1184_v38 = vadd.f32 %v1183_v59, %v1118_v48  ;;  %v3251_v48 = vld [vmem:[#allocation5 + $0x274] sm:$0xf]  ;;  %v3248_v59 = vld [vmem:[#allocation5 + $0x244] sm:$0xf] }
 0x67c   :  { %v3013_v52 = vor.u32 %v3251_v48, %v3010_v51 }
 0x67d   :  { %v1189_v46 = vmax.f32 %v1184_v38, 0.0  ;;  %v2997_v38 = vor.u32 %v3249_v62, %v2996_v26 }
 0x67f   :  { %v1191_v55 = vpack.c.bf16 %v1189_v46, %v1188_v63  ;;  %v2998_v63 = vld [vmem:[#allocation5 + $0x258] sm:$0xf0]  ;;  %v3004_v46 = vld [vmem:[#allocation5 + $0x248] sm:$0xf]  ;;  %1539 = vmatpush.bf16.msrb.mxu3 %v2997_v38 }
 0x680   :  { %v121_v38 = vld [vmem:[#allocation7 + $0x8] sm:$0xff] }
 0x681   :  { %1270 = vmatmul.bf16.gmra.mxu2 %v1191_v55  ;;  %v3250_v55 = vld [vmem:[#allocation5 + $0x25c] sm:$0xf0] }
 0x6d0   :  { %v1266_v58 = vpop.f32.mrf.mxu2 }
 0x6d1   :  { %v1267_v0 = vadd.f32 %v1266_v58, %v1208_v29  ;;  %v3005_v58 = vor.u32 %v3250_v55, %v3004_v46  ;;  %v1360_v55 = vperm.slane %v121_v38, 0 }
 0x6d3   :  { %v1276_v2 = vadd.f32 %v1267_v0, %v3978_v54  ;;  %v2984_v0 = vld [vmem:[#allocation5 + $0x210] sm:$0xf] }
 0x6d5   :  { %1280 = vadd.xlane.f32.xlu2 %v1276_v2 }
 0x6d8   :  { %v1268_v3 = vpop.f32.mrf.mxu2 }
 0x6d9   :  { %v1269_v4 = vadd.f32 %v1268_v3, %v1208_v29  ;;  %v3245_v3 = vld [vmem:[#allocation5 + $0x214] sm:$0xf] }
 0x6db   :  { %v1277_v15 = vadd.f32 %v1269_v4, %v3980_v56 }
 0x6dd   :  { %1282 = vadd.xlane.f32.xlu0 %v1277_v15 }
 0x704   :  { %v1271_v10 = vpop.f32.mrf.mxu2 }
 0x705   :  { %v1272_v43 = vadd.f32 %v1271_v10, %v1208_v29  ;;  %v2992_v10 = vld [vmem:[#allocation5 + $0x218] sm:$0xf] }
 0x707   :  { %v1278_v32 = vadd.f32 %v1272_v43, %v1098_v37  ;;  %v3034_v37 = vld [vmem:[#allocation5 + $0x2e8] sm:$0xf0]  ;;  %v3247_v43 = vld [vmem:[#allocation5 + $0x22c] sm:$0xf0] }
 0x708   :  { %v3037_v21 = vor.u32 %v3257_v35, %v3034_v37  ;;  %v2969_v37 = vor.u32 %v3241_v23, %v2968_v28 }
 0x709   :  { %1284 = vadd.xlane.f32.xlu1 %v1278_v32 }
 0x70a   :  { %1555 = vmatpush.bf16.msra.mxu0 %v3037_v21  ;;  %v3236_v21 = vld [vmem:[#allocation5 + $0x184] sm:$0xf] }
 0x70b   :  { %v2953_v61 = vor.u32 %v3236_v21, %v2950_v33 }
 0x70c   :  { %v1273_v6 = vpop.f32.mrf.mxu2 }
 0x70d   :  { %v1274_v7 = vadd.f32 %v1273_v6, %v1208_v29  ;;  %v3001_v29 = vor.u32 %v3248_v59, %v2998_v63  ;;  %v2993_v6 = vor.u32 %v3247_v43, %v2992_v10 }
 0x70e   :  { %1556 = vmatpush.bf16.msra.mxu0 %v3025_v31 }
 0x70f   :  { %v1279_v8 = vadd.f32 %v1274_v7, %v1099_v24  ;;  %v3040_v24 = vld [vmem:[#allocation5 + $0x2d8] sm:$0xf]  ;;  %v2972_v7 = vld [vmem:[#allocation5 + $0x1e0] sm:$0xf] }
 0x710   :  { %v3041_v22 = vor.u32 %v3259_v39, %v3040_v24  ;;  %v2948_v24 = vld [vmem:[#allocation5 + $0x180] sm:$0xf]  ;;  %v3237_v39 = vld [vmem:[#allocation5 + $0x194] sm:$0xf0] }
 0x711   :  { %1286 = vadd.xlane.f32.xlu2 %v1279_v8  ;;  %v2949_v41 = vor.u32 %v3237_v39, %v2948_v24 }
 0x712   :  { %1574 = vmatpush.bf16.msra.mxu1 %v3041_v22  ;;  %1557 = vmatpush.bf16.msra.mxu0 %v3013_v52 }
 0x716   :  { %1575 = vmatpush.bf16.msra.mxu1 %v3029_v50  ;;  %1558 = vmatpush.bf16.msra.mxu0 %v3001_v29 }
 0x71a   :  { %1576 = vmatpush.bf16.msra.mxu1 %v3017_v27 }
 0x71e   :  { %1577 = vmatpush.bf16.msra.mxu1 %v3005_v58 }
 0x722   :  { %1578 = vmatpush.bf16.msra.mxu1 %v2993_v6 }
 0x748   :  { %v1281_v5 = vpop.xlane.xlu2 %1280 }
 0x749   :  { %v1288_v19 = vmul.f32 %v1281_v5, %v3948_v20  ;;  %v3242_v5 = vld [vmem:[#allocation5 + $0x1e4] sm:$0xf] }
 0x74b   :  { %v3993_v9 = vsub.f32 %v1276_v2, %v1288_v19  ;;  %v3246_v2 = vld [vmem:[#allocation5 + $0x224] sm:$0xf0] }
 0x74c   :  { %v2985_v4 = vor.u32 %v3246_v2, %v2984_v0 }
 0x74d   :  { %v1296_v54 = vmul.f32 %v3993_v9, %v3993_v9 }
 0x74e   :  { %1540 = vmatpush.bf16.msrb.mxu3 %v2985_v4 }
 0x74f   :  { %1300 = vadd.xlane.f32.xlu0 %v1296_v54  ;;  %v2974_v54 = vld [vmem:[#allocation5 + $0x1f8] sm:$0xf0] }
 0x750   :  { %v1283_v53 = vpop.xlane.xlu0 %1282 }
 0x751   :  { %v1289_v56 = vmul.f32 %v1283_v53, %v3948_v20  ;;  %v2980_v53 = vld [vmem:[#allocation5 + $0x1e8] sm:$0xf] }
 0x753   :  { %v3998_v12 = vsub.f32 %v1277_v15, %v1289_v56  ;;  %v2986_v15 = vld [vmem:[#allocation5 + $0x228] sm:$0xf0]  ;;  %v3244_v56 = vld [vmem:[#allocation5 + $0x1fc] sm:$0xf0] }
 0x755   :  { %v1297_v60 = vmul.f32 %v3998_v12, %v3998_v12 }
 0x757   :  { %1302 = vadd.xlane.f32.xlu1 %v1297_v60  ;;  %v2977_v60 = vor.u32 %v3242_v5, %v2974_v54 }
 0x77c   :  { %v1285_v13 = vpop.xlane.xlu1 %1284 }
 0x77d   :  { %v1290_v14 = vmul.f32 %v1285_v13, %v3948_v20  ;;  %v2981_v13 = vor.u32 %v3244_v56, %v2980_v53 }
 0x77f   :  { %v4003_v1 = vsub.f32 %v1278_v32, %v1290_v14  ;;  %v2989_v32 = vor.u32 %v3245_v3, %v2986_v15  ;;  %1579 = vmatpush.bf16.msra.mxu1 %v2981_v13  ;;  %v2960_v14 = vld [vmem:[#allocation5 + $0x1b0] sm:$0xf]  ;;  %v1365_v3 = vperm.slane %v121_v38, 1 }
 0x781   :  { %v1298_v16 = vmul.f32 %v4003_v1, %v4003_v1  ;;  %1559 = vmatpush.bf16.msra.mxu0 %v2989_v32 }
 0x783   :  { %1304 = vadd.xlane.f32.xlu2 %v1298_v16  ;;  %v3240_v16 = vld [vmem:[#allocation5 + $0x1c4] sm:$0xf0]  ;;  %1580 = vmatpush.bf16.msra.mxu1 %v2969_v37 }
 0x784   :  { %v1287_v17 = vpop.xlane.xlu2 %1286 }
 0x785   :  { %v1291_v18 = vmul.f32 %v1287_v17, %v3948_v20  ;;  %1560 = vmatpush.bf16.msra.mxu0 %v2977_v60  ;;  %v3239_v17 = vld [vmem:[#allocation5 + $0x1b4] sm:$0xf] }
 0x787   :  { %v4008_v11 = vsub.f32 %v1279_v8, %v1291_v18  ;;  %v3243_v8 = vld [vmem:[#allocation5 + $0x1f4] sm:$0xf0]  ;;  %v2961_v18 = vor.u32 %v3240_v16, %v2960_v14  ;;  %1581 = vmatpush.bf16.msra.mxu1 %v2957_v34 }
 0x788   :  { %v2973_v19 = vor.u32 %v3243_v8, %v2972_v7 }
 0x789   :  { %v1299_v25 = vmul.f32 %v4008_v11, %v4008_v11 }
 0x78a   :  { %1541 = vmatpush.bf16.msrb.mxu3 %v2973_v19 }
 0x78b   :  { %1306 = vadd.xlane.f32.xlu0 %v1299_v25  ;;  %v2962_v25 = vld [vmem:[#allocation5 + $0x1c8] sm:$0xf0] }
 0x78c   :  { %v2965_v36 = vor.u32 %v3239_v17, %v2962_v25 }
 0x78e   :  { %1542 = vmatpush.bf16.msrb.mxu3 %v2961_v18  ;;  %1561 = vmatpush.bf16.msra.mxu0 %v2965_v36 }
 0x792   :  { %1543 = vmatpush.bf16.msrb.mxu3 %v2949_v41  ;;  %1562 = vmatpush.bf16.msra.mxu0 %v2953_v61 }
 0x7c2   :  { %v1301_v35 = vpop.xlane.xlu0 %1300 }
 0x7c3   :  { %v1308_v22 = vmul.f32 %v1301_v35, %v3948_v20 }
 0x7c5   :  { %v1312_v45 = vadd.f32 1e-05, %v1308_v22 }
 0x7c7   :  { %3439 = vrsqrt.f32 %v1312_v45  ;;  %vm1322_vm5 = vweird.f32 %v1312_v45 }
 0x7ca   :  { %v1303_v31 = vpop.xlane.xlu1 %1302 }
 0x7cb   :  { %v1309_v50 = vmul.f32 %v1303_v31, %v3948_v20 }
 0x7cd   :  { %v3440_v30 = vpop.eup %3439  ;;  %v1313_v47 = vadd.f32 1e-05, %v1309_v50 }
 0x7ce   :  { %v1317_v48 = vmul.f32 %v3440_v30, %v1312_v45  ;;  %vm1323_vm4 = vweird.f32 %v3440_v30 }
 0x7cf   :  { %3441 = vrsqrt.f32 %v1313_v47  ;;  %vm1324_vm6 = vmor %vm1322_vm5, %vm1323_vm4  ;;  %vm1332_vm8 = vweird.f32 %v1313_v47 }
 0x7d0   :  { %v1318_v49 = vmul.f32 %v3440_v30, %v1317_v48 }
 0x7d2   :  { %v1319_v51 = vmul.f32 0.5, %v1318_v49 }
 0x7d4   :  { %v1320_v57 = vsub.f32 1.5, %v1319_v51 }
 0x7d5   :  { %v3442_v40 = vpop.eup %3441 }
 0x7d6   :  { %v1321_v52 = vmul.f32 %v3440_v30, %v1320_v57  ;;  %v1327_v27 = vmul.f32 %v3442_v40, %v1313_v47  ;;  %vm1333_vm7 = vweird.f32 %v3442_v40 }
 0x7d7   :  { %vm1334_vm9 = vmor %vm1332_vm8, %vm1333_vm7 }
 0x7d8   :  { %v1328_v26 = vmul.f32 %v3442_v40, %v1327_v27  ;;  %v1325_v62 = vsel %vm1324_vm6, %v3440_v30, %v1321_v52 }
 0x7d9   :  { %v1356_v46 = vmul.f32 %v1325_v62, %v3993_v9 }
 0x7da   :  { %v1329_v59 = vmul.f32 0.5, %v1328_v26 }
 0x7db   :  { %v1361_v2 = vmul.f32 %v1360_v55, %v1356_v46 }
 0x7dc   :  { %v1330_v63 = vsub.f32 1.5, %v1329_v59 }
 0x7dd   :  { %v4016_v15 = vadd.f32 %v1365_v3, %v1361_v2 }
 0x7de   :  { %v1331_v29 = vmul.f32 %v3442_v40, %v1330_v63 }
 0x7e0   :  { %v1335_v58 = vsel %vm1334_vm9, %v3442_v40, %v1331_v29 }
 0x7e1   :  { %v1357_v0 = vmul.f32 %v1335_v58, %v3998_v12 }
 0x7e3   :  { %v1362_v4 = vmul.f32 %v1360_v55, %v1357_v0 }
 0x7e5   :  { %v4018_v10 = vadd.f32 %v1365_v3, %v1362_v4 }
 0x7e7   :  { %v1373_v43 = vpack.c.bf16 %v4018_v10, %v4016_v15 }
 0x7e9   :  { %1544 = vmatmul.bf16.vlgmr.msrb.gmra.mxu3 %v1373_v43  ;;  %1563 = vmatmul.bf16.vlgmr.msra.gmra.mxu0 %v1373_v43 }
 0x7ea   :  { %1582 = vmatmul.bf16.vlgmr.msra.gmra.mxu1 %v1373_v43 }
 0x7f6   :  { %v1305_v9 = vpop.xlane.xlu2 %1304 }
 0x7f7   :  { %v1310_v32 = vmul.f32 %v1305_v9, %v3948_v20 }
 0x7f9   :  { %v1314_v6 = vadd.f32 1e-05, %v1310_v32 }
 0x7fb   :  { %3443 = vrsqrt.f32 %v1314_v6  ;;  %vm1342_vm11 = vweird.f32 %v1314_v6 }
 0x7fe   :  { %v1307_v7 = vpop.xlane.xlu0 %1306 }
 0x7ff   :  { %v1311_v12 = vmul.f32 %v1307_v7, %v3948_v20 }
 0x801   :  { %v3444_v8 = vpop.eup %3443  ;;  %v1315_v5 = vadd.f32 1e-05, %v1311_v12 }
 0x802   :  { %v1337_v19 = vmul.f32 %v3444_v8, %v1314_v6  ;;  %vm1343_vm10 = vweird.f32 %v3444_v8 }
 0x803   :  { %3445 = vrsqrt.f32 %v1315_v5  ;;  %vm1344_vm12 = vmor %vm1342_vm11, %vm1343_vm10  ;;  %vm1352_vm14 = vweird.f32 %v1315_v5 }
 0x804   :  { %v1338_v54 = vmul.f32 %v3444_v8, %v1337_v19 }
 0x806   :  { %v1339_v53 = vmul.f32 0.5, %v1338_v54 }
 0x808   :  { %v1340_v56 = vsub.f32 1.5, %v1339_v53 }
 0x809   :  { %v3446_v60 = vpop.eup %3445 }
 0x80a   :  { %v1341_v13 = vmul.f32 %v3444_v8, %v1340_v56  ;;  %v1347_v14 = vmul.f32 %v3446_v60, %v1315_v5  ;;  %vm1353_vm13 = vweird.f32 %v3446_v60 }
 0x80b   :  { %vm1354_vm15 = vmor %vm1352_vm14, %vm1353_vm13 }
 0x80c   :  { %v1348_v16 = vmul.f32 %v3446_v60, %v1347_v14  ;;  %v1345_v17 = vsel %vm1344_vm12, %v3444_v8, %v1341_v13 }
 0x80d   :  { %v1358_v28 = vmul.f32 %v1345_v17, %v4003_v1  ;;  %v4032_v1 = vld [vmem:[#allocation7 + $0x10] sm:$0xff] }
 0x80e   :  { %v1349_v18 = vmul.f32 0.5, %v1348_v16  ;;  %v1598_v33 = vperm.slane %v4032_v1, 1  ;;  %v1593_v34 = vperm.slane %v4032_v1, 0  ;;  %v1603_v52 = vperm.slane %v4032_v1, 2 }
 0x80f   :  { %v1363_v37 = vmul.f32 %v1360_v55, %v1358_v28 }
 0x810   :  { %v1350_v25 = vsub.f32 1.5, %v1349_v18 }
 0x811   :  { %v4026_v39 = vadd.f32 %v1365_v3, %v1363_v37 }
 0x812   :  { %v1351_v23 = vmul.f32 %v3446_v60, %v1350_v25 }
 0x814   :  { %v1355_v35 = vsel %vm1354_vm15, %v3446_v60, %v1351_v23 }
 0x815   :  { %v1359_v36 = vmul.f32 %v1355_v35, %v4008_v11 }
 0x817   :  { %v1364_v24 = vmul.f32 %v1360_v55, %v1359_v36 }
 0x819   :  { %v4028_v21 = vadd.f32 %v1365_v3, %v1364_v24  ;;  %v4076_v24 = vld [vmem:[%s4362_s2] sm:$0xff] }
 0x81b   :  { %v1374_v22 = vpack.c.bf16 %v4028_v21, %v4026_v39 }
 0x81d   :  { %1549 = vmatmul.bf16.gmra.mxu3 %v1374_v22  ;;  %1568 = vmatmul.bf16.gmra.mxu0 %v1374_v22 }
 0x81e   :  { %1587 = vmatmul.bf16.gmra.mxu1 %v1374_v22 }
 0x866   :  { %v1564_v41 = vpop.f32.mrf.mxu0 }
 0x867   :  { %v1599_v11 = vadd.f32 %v1598_v33, %v1564_v41  ;;  %v1583_v48 = vpop.f32.mrf.mxu1 }
 0x868   :  { %v1604_v0 = vadd.f32 %v1603_v52, %v1583_v48 }
 0x86c   :  { %v1545_v42 = vpop.f32.mrf.mxu3 }
 0x86d   :  { %v1594_v50 = vadd.f32 %v1593_v34, %v1545_v42 }
 0x86e   :  { %v1566_v44 = vpop.f32.mrf.mxu0 }
 0x86f   :  { %v1600_v61 = vadd.f32 %v1598_v33, %v1566_v44  ;;  %v1585_v49 = vpop.f32.mrf.mxu1  ;;  %v4083_v44 = vld [vmem:[%s4362_s2 + $0x8] sm:$0xff] }
 0x870   :  { %v1605_v55 = vadd.f32 %v1603_v52, %v1585_v49 }
 0x871   :  { %v1610_v45 = vpack.c.bf16 %v1600_v61, %v1599_v11 }
 0x872   :  { %v4047_v43 = vpack.c.bf16 %v1605_v55, %v1604_v0 }
 0x873   :  { %1732 = vrot.lane.b32.xlu2 %v1610_v45, %s3642_s0  ;;  %v1621_v32 = vsel %vm362_vm1, %v1610_v45, 0 }
 0x874   :  { %v1547_v31 = vpop.f32.mrf.mxu3 }
 0x875   :  { %v1595_v30 = vadd.f32 %v1593_v34, %v1547_v31 }
 0x877   :  { %v1608_v47 = vpack.c.bf16 %v1595_v30, %v1594_v50  ;;  %v4091_v50 = vld [vmem:[%s4362_s2 + $0x10] sm:$0xff] }
 0x879   :  { %1726 = vrot.lane.b32.xlu0 %v1608_v47, %s3642_s0 }
 0x87b   :  { %1858 = vrot.lane.b32.xlu2 %v1610_v45, %s3644_s24 }
 0x883   :  { %1854 = vrot.lane.b32.xlu2 %v1608_v47, %s3644_s24 }
 0x89a   :  { %v1569_v51 = vpop.f32.mrf.mxu0 }
 0x89b   :  { %v1588_v57 = vpop.f32.mrf.mxu1  ;;  %v1601_v26 = vadd.f32 %v1598_v33, %v1569_v51  ;;  %v4098_v51 = vld [vmem:[%s4362_s2 + $0x18] sm:$0xff] }
 0x89c   :  { %v1606_v38 = vadd.f32 %v1603_v52, %v1588_v57 }
 0x8a0   :  { %v1550_v40 = vpop.f32.mrf.mxu3 }
 0x8a1   :  { %v1596_v3 = vadd.f32 %v1593_v34, %v1550_v40 }
 0x8a2   :  { %v1571_v27 = vpop.f32.mrf.mxu0 }
 0x8a3   :  { %v1602_v62 = vadd.f32 %v1598_v33, %v1571_v27  ;;  %v1590_v59 = vpop.f32.mrf.mxu1 }
 0x8a4   :  { %v1607_v63 = vadd.f32 %v1603_v52, %v1590_v59 }
 0x8a5   :  { %v1611_v46 = vpack.c.bf16 %v1602_v62, %v1601_v26 }
 0x8a6   :  { %v4041_v29 = vpack.c.bf16 %v1607_v63, %v1606_v38 }
 0x8a7   :  { %1860 = vrot.lane.b32.xlu0 %v1611_v46, %s3644_s24  ;;  %1734 = vrot.lane.b32.xlu1 %v1611_v46, %s3642_s0  ;;  %v1624_v58 = vsel %vm362_vm1, %v1611_v46, 0 }
 0x8a8   :  { %1703 = vmatpush.bf16.msra.mxu3 %v4041_v29  ;;  %v1552_v2 = vpop.f32.mrf.mxu3  ;;  %1632 = vmatpush.bf16.xpose.msra.mxu2 %v1624_v58 }
 0x8a9   :  { %v1597_v4 = vadd.f32 %v1593_v34, %v1552_v2 }
 0x8ab   :  { %v1609_v9 = vpack.c.bf16 %v1597_v4, %v1596_v3 }
 0x8ac   :  { %1704 = vmatpush.bf16.msra.mxu3 %v4047_v43 }
 0x8ad   :  { %1856 = vrot.lane.b32.xlu2 %v1609_v9, %s3644_s24 }
 0x8af   :  { %1984 = vrot.lane.b32.xlu0 %v1611_v46, %s3643_s23  ;;  %1728 = vrot.lane.b32.xlu1 %v1609_v9, %s3642_s0 }
 0x8b0   :  { %1633 = vmatpush.bf16.xpose.msra.mxu2 %v1621_v32 }
 0x8b5   :  { %1817 = vrot.lane.b32.xlu2 %v4041_v29, %s3642_s0 }
 0x8b7   :  { %1978 = vrot.lane.b32.xlu0 %v1608_v47, %s3643_s23  ;;  %3042 = vmatmul.msk.bf16.vlgmr.msra.gmra.mxu2 %vm362_vm1, %v1608_v47 }
 0x8b8   :  { %1982 = vrot.lane.b32.xlu1 %v1610_v45, %s3643_s23 }
 0x8c0   :  { %1980 = vrot.lane.b32.xlu1 %v1609_v9, %s3643_s23 }
 0x8c7   :  { %3043 = vmatmul.msk.bf16.gmra.mxu2 %vm362_vm1, %v1609_v9 }
 0x8c8   :  { %1815 = vrot.lane.b32.xlu1 %v4047_v43, %s3642_s0 }
 0x8cd   :  { %v1733_v6 = vpop.permute.xlu2 %1732 }
 0x8ce   :  { %v1743_v16 = vsel %vm362_vm1, %v1733_v6, 0 }
 0x8d5   :  { %v1859_v7 = vpop.permute.xlu2 %1858 }
 0x8d6   :  { %v1869_v17 = vsel %vm362_vm1, %v1859_v7, 0 }
 0x8dd   :  { %v1855_v12 = vpop.permute.xlu2 %1854 }
 0x8eb   :  { %v1727_v19 = vpop.permute.xlu0 %1726 }
 0x907   :  { %v1857_v8 = vpop.permute.xlu2 %1856 }
 0x90f   :  { %v1818_v5 = vpop.permute.xlu2 %1817 }
 0x910   :  { %1833 = vmatpush.bf16.msrb.mxu1 %v1818_v5 }
 0x919   :  { %v1735_v54 = vpop.permute.xlu1 %1734  ;;  %v1861_v53 = vpop.permute.xlu0 %1860 }
 0x91a   :  { %v1746_v56 = vsel %vm362_vm1, %v1735_v54, 0  ;;  %v1872_v60 = vsel %vm362_vm1, %v1861_v53, 0 }
 0x91b   :  { %1754 = vmatpush.bf16.xpose.msrb.mxu0 %v1746_v56  ;;  %1880 = vmatpush.bf16.xpose.msrb.mxu2 %v1872_v60 }
 0x921   :  { %v1729_v13 = vpop.permute.xlu1 %1728  ;;  %v1985_v14 = vpop.permute.xlu0 %1984 }
 0x922   :  { %v1996_v18 = vsel %vm362_vm1, %v1985_v14, 0 }
 0x923   :  { %1755 = vmatpush.bf16.xpose.msrb.mxu0 %v1743_v16  ;;  %1881 = vmatpush.bf16.xpose.msrb.mxu2 %v1869_v17 }
 0x929   :  { %v1979_v34 = vpop.permute.xlu0 %1978 }
 0x92a   :  { %v1983_v25 = vpop.permute.xlu1 %1982  ;;  %3046 = vmatmul.msk.bf16.vlgmr.msrb.gmra.mxu0 %vm362_vm1, %v1727_v19  ;;  %3050 = vmatmul.msk.bf16.vlgmr.msrb.gmra.mxu2 %vm362_vm1, %v1855_v12 }
 0x92b   :  { %2004 = vmatpush.bf16.xpose.msra.mxu0 %v1996_v18  ;;  %v1993_v28 = vsel %vm362_vm1, %v1983_v25, 0 }
 0x932   :  { %v1981_v23 = vpop.permute.xlu1 %1980 }
 0x933   :  { %2005 = vmatpush.bf16.xpose.msra.mxu0 %v1993_v28 }
 0x93a   :  { %v1816_v35 = vpop.permute.xlu1 %1815  ;;  %v1635_v36 = vpop.f32.mrf.mxu2  ;;  %3047 = vmatmul.msk.bf16.gmra.mxu0 %vm362_vm1, %v1729_v13  ;;  %3051 = vmatmul.msk.bf16.gmra.mxu2 %vm362_vm1, %v1857_v8 }
 0x93b   :  { %v1645_v37 = vmul.f32 0.17677669, %v1635_v36  ;;  %1834 = vmatpush.bf16.msrb.mxu1 %v1816_v35 }
 0x93d   :  { %v1649_v22 = vadd.f32 %v4076_v24, %v1645_v37 }
 0x93f   :  { %v1653_v41 = vsel %vm362_vm1, %v1649_v22, -inf }
 0x940   :  { %1654 = vmax.xlane.f32.xlu0 %v1653_v41 }
 0x942   :  { %v1637_v33 = vpop.f32.mrf.mxu2 }
 0x943   :  { %v1646_v42 = vmul.f32 0.17677669, %v1637_v33 }
 0x945   :  { %v1650_v11 = vadd.f32 %v4083_v44, %v1646_v42 }
 0x947   :  { %v1656_v61 = vsel %vm362_vm1, %v1650_v11, -inf }
 0x948   :  { %1657 = vmax.xlane.f32.xlu2 %v1656_v61 }
 0x94a   :  { %v1640_v45 = vpop.f32.mrf.mxu2  ;;  %3054 = vmatmul.msk.bf16.vlgmr.msra.gmra.mxu0 %vm362_vm1, %v1979_v34 }
 0x94b   :  { %v1647_v31 = vmul.f32 0.17677669, %v1640_v45 }
 0x94d   :  { %v1651_v30 = vadd.f32 %v4091_v50, %v1647_v31 }
 0x94f   :  { %v1659_v47 = vsel %vm362_vm1, %v1651_v30, -inf }
 0x950   :  { %1660 = vmax.xlane.f32.xlu1 %v1659_v47 }
 0x952   :  { %v1642_v48 = vpop.f32.mrf.mxu2 }
 0x953   :  { %v1648_v49 = vmul.f32 0.17677669, %v1642_v48 }
 0x955   :  { %v1652_v57 = vadd.f32 %v4098_v51, %v1648_v49 }
 0x957   :  { %v1662_v40 = vsel %vm362_vm1, %v1652_v57, -inf }
 0x958   :  { %1663 = vmax.xlane.f32.xlu0 %v1662_v40 }
 0x95a   :  { %3055 = vmatmul.msk.bf16.gmra.mxu0 %vm362_vm1, %v1981_v23 }
 0x9a7   :  { %v1757_v52 = vpop.f32.mrf.mxu0 }
 0x9a8   :  { %v1767_v27 = vmul.f32 0.17677669, %v1757_v52 }
 0x9aa   :  { %v4104_v26 = vadd.f32 %v4076_v24, %v1767_v27 }
 0x9ac   :  { %v1775_v62 = vsel %vm362_vm1, %v4104_v26, -inf }
 0x9ad   :  { %1776 = vmax.xlane.f32.xlu1 %v1775_v62  ;;  %v1883_v59 = vpop.f32.mrf.mxu2 }
 0x9ae   :  { %v1893_v38 = vmul.f32 0.17677669, %v1883_v59 }
 0x9af   :  { %v1759_v63 = vpop.f32.mrf.mxu0 }
 0x9b0   :  { %v1768_v46 = vmul.f32 0.17677669, %v1759_v63  ;;  %v4109_v55 = vadd.f32 %v4076_v24, %v1893_v38 }
 0x9b2   :  { %v1901_v58 = vsel %vm362_vm1, %v4109_v55, -inf  ;;  %v4114_v0 = vadd.f32 %v4083_v44, %v1768_v46 }
 0x9b3   :  { %1902 = vmax.xlane.f32.xlu2 %v1901_v58  ;;  %v1655_v2 = vpop.xlane.xlu0 %1654 }
 0x9b4   :  { %v1778_v3 = vsel %vm362_vm1, %v4114_v0, -inf  ;;  %v1665_v32 = vsub.f32 %v1649_v22, %v1655_v2 }
 0x9b5   :  { %1779 = vmax.xlane.f32.xlu0 %v1778_v3  ;;  %v1885_v4 = vpop.f32.mrf.mxu2 }
 0x9b6   :  { %v1894_v9 = vmul.f32 0.17677669, %v1885_v4  ;;  %v1669_v12 = vmul.f32 1.442695, %v1665_v32 }
 0x9b7   :  { %v1762_v6 = vpop.f32.mrf.mxu0 }
 0x9b8   :  { %v4119_v7 = vadd.f32 %v4083_v44, %v1894_v9  ;;  %v1769_v5 = vmul.f32 0.17677669, %v1762_v6  ;;  %3447 = vpow2.f32 %v1669_v12 }
 0x9ba   :  { %v1904_v54 = vsel %vm362_vm1, %v4119_v7, -inf  ;;  %v4124_v60 = vadd.f32 %v4091_v50, %v1769_v5 }
 0x9bb   :  { %v1658_v8 = vpop.xlane.xlu2 %1657 }
 0x9bc   :  { %v1666_v19 = vsub.f32 %v1650_v11, %v1658_v8  ;;  %v1781_v16 = vsel %vm362_vm1, %v4124_v60, -inf }
 0x9bd   :  { %1905 = vmax.xlane.f32.xlu0 %v1904_v54 }
 0x9be   :  { %v1671_v53 = vmul.f32 1.442695, %v1666_v19  ;;  %v3448_v17 = vpop.eup %3447 }
 0x9bf   :  { %v1764_v56 = vpop.f32.mrf.mxu0  ;;  %v1677_v58 = vsel %vm362_vm1, %v3448_v17, 0.0 }
 0x9c0   :  { %3449 = vpow2.f32 %v1671_v53  ;;  %v1770_v13 = vmul.f32 0.17677669, %v1764_v56 }
 0x9c2   :  { %v4131_v23 = vadd.f32 %v4098_v51, %v1770_v13 }
 0x9c3   :  { %v1661_v14 = vpop.xlane.xlu1 %1660 }
 0x9c4   :  { %v1667_v28 = vsub.f32 %v1651_v30, %v1661_v14  ;;  %v1784_v33 = vsel %vm362_vm1, %v4131_v23, -inf  ;;  %v1888_v30 = vpop.f32.mrf.mxu2 }
 0x9c5   :  { %1782 = vmax.xlane.f32.xlu0 %v1781_v16  ;;  %v1895_v2 = vmul.f32 0.17677669, %v1888_v30 }
 0x9c6   :  { %v3450_v18 = vpop.eup %3449  ;;  %1941 = vrot.lane.b32.xlu1 %v4041_v29, %s3644_s24  ;;  %v1673_v36 = vmul.f32 1.442695, %v1667_v28 }
 0x9c7   :  { %v1689_v25 = vpack.c.bf16 %v3450_v18, %v3448_v17  ;;  %v2007_v35 = vpop.f32.mrf.mxu0  ;;  %v4176_v3 = vadd.f32 %v4091_v50, %v1895_v2  ;;  %v1680_v4 = vsel %vm362_vm1, %v3450_v18, 0.0 }
 0x9c8   :  { %v2017_v22 = vmul.f32 0.17677669, %v2007_v35  ;;  %3451 = vpow2.f32 %v1673_v36 }
 0x9c9   :  { %3044 = vmatmul.msk.bf16.vlgmr.msra.gmra.mxu3 %vm362_vm1, %v1689_v25 }
 0x9ca   :  { %v4139_v11 = vadd.f32 %v4076_v24, %v2017_v22 }
 0x9cb   :  { %2065 = vrot.lane.b32.xlu2 %v4041_v29, %s3643_s23  ;;  %v1664_v37 = vpop.xlane.xlu0 %1663 }
 0x9cc   :  { %v1668_v41 = vsub.f32 %v1652_v57, %v1664_v37  ;;  %v2025_v61 = vsel %vm362_vm1, %v4139_v11, -inf  ;;  %v1890_v49 = vpop.f32.mrf.mxu2 }
 0x9cd   :  { %1785 = vmax.xlane.f32.xlu0 %v1784_v33  ;;  %v1896_v57 = vmul.f32 0.17677669, %v1890_v49 }
 0x9ce   :  { %v1675_v42 = vmul.f32 1.442695, %v1668_v41  ;;  %v4145_v29 = vpop.eup %3451 }
 0x9cf   :  { %v2009_v31 = vpop.f32.mrf.mxu0  ;;  %v4160_v62 = vadd.f32 %v4098_v51, %v1896_v57 }
 0x9d0   :  { %3453 = vpow2.f32 %v1675_v42  ;;  %v2018_v47 = vmul.f32 0.17677669, %v2009_v31 }
 0x9d1   :  { %v1910_v38 = vsel %vm362_vm1, %v4160_v62, -inf }
 0x9d2   :  { %v4155_v48 = vadd.f32 %v4083_v44, %v2018_v47 }
 0x9d3   :  { %2063 = vrot.lane.b32.xlu2 %v4047_v43, %s3643_s23 }
 0x9d4   :  { %v2028_v40 = vsel %vm362_vm1, %v4155_v48, -inf }
 0x9d5   :  { %2026 = vmax.xlane.f32.xlu0 %v2025_v61 }
 0x9d6   :  { %v4147_v34 = vpop.eup %3453 }
 0x9d7   :  { %v1690_v45 = vpack.c.bf16 %v4147_v34, %v4145_v29  ;;  %v2012_v24 = vpop.f32.mrf.mxu0 }
 0x9d8   :  { %v2019_v59 = vmul.f32 0.17677669, %v2012_v24 }
 0x9d9   :  { %3045 = vmatmul.msk.bf16.gmra.mxu3 %vm362_vm1, %v1690_v45 }
 0x9da   :  { %v4170_v63 = vadd.f32 %v4091_v50, %v2019_v59 }
 0x9dc   :  { %v2031_v46 = vsel %vm362_vm1, %v4170_v63, -inf }
 0x9df   :  { %v2014_v52 = vpop.f32.mrf.mxu0 }
 0x9e0   :  { %v2020_v27 = vmul.f32 0.17677669, %v2014_v52 }
 0x9e9   :  { %1939 = vrot.lane.b32.xlu0 %v4047_v43, %s3644_s24  ;;  %v4165_v43 = vadd.f32 %v4098_v51, %v2020_v27  ;;  %v1907_v51 = vsel %vm362_vm1, %v4176_v3, -inf }
 0x9eb   :  { %v2034_v44 = vsel %vm362_vm1, %v4165_v43, -inf }
 0x9f0   :  { %2029 = vmax.xlane.f32.xlu1 %v2028_v40 }
 0x9f8   :  { %1911 = vmax.xlane.f32.xlu1 %v1910_v38 }
 0x9fc   :  { %2035 = vmax.xlane.f32.xlu2 %v2034_v44 }
 0xa00   :  { %2032 = vmax.xlane.f32.xlu1 %v2031_v46 }
 0xa04   :  { %1678 = vadd.xlane.f32.xlu2 %v1677_v58 }
 0xa13   :  { %1908 = vmax.xlane.f32.xlu0 %v1907_v51 }
 0xa1b   :  { %1681 = vadd.xlane.f32.xlu0 %v1680_v4 }
 0xa20   :  { %v1777_v9 = vpop.xlane.xlu1 %1776 }
 0xa21   :  { %v1787_v32 = vsub.f32 %v4104_v26, %v1777_v9 }
 0xa23   :  { %v1791_v6 = vmul.f32 1.442695, %v1787_v32 }
 0xa25   :  { %3455 = vpow2.f32 %v1791_v6 }
 0xa26   :  { %v1903_v12 = vpop.xlane.xlu2 %1902 }
 0xa27   :  { %v1913_v8 = vsub.f32 %v4109_v55, %v1903_v12 }
 0xa28   :  { %v1780_v5 = vpop.xlane.xlu0 %1779 }
 0xa29   :  { %v1917_v19 = vmul.f32 1.442695, %v1913_v8  ;;  %v1788_v50 = vsub.f32 %v4114_v0, %v1780_v5 }
 0xa2b   :  { %v3456_v54 = vpop.eup %3455  ;;  %3457 = vpow2.f32 %v1917_v19  ;;  %v1793_v53 = vmul.f32 1.442695, %v1788_v50 }
 0xa2c   :  { %v1799_v56 = vsel %vm362_vm1, %v3456_v54, 0.0 }
 0xa2d   :  { %3459 = vpow2.f32 %v1793_v53  ;;  %1800 = vadd.xlane.f32.xlu1 %v1799_v56 }
 0xa2e   :  { %v2066_v13 = vpop.permute.xlu2 %2065 }
 0xa2f   :  { %2081 = vmatpush.bf16.msra.mxu1 %v2066_v13 }
 0xa30   :  { %v1906_v14 = vpop.xlane.xlu0 %1905 }
 0xa31   :  { %v3458_v26 = vpop.eup %3457  ;;  %v1914_v16 = vsub.f32 %v4119_v7, %v1906_v14 }
 0xa32   :  { %v1925_v25 = vsel %vm362_vm1, %v3458_v26, 0.0 }
 0xa33   :  { %v3460_v17 = vpop.eup %3459  ;;  %v1919_v18 = vmul.f32 1.442695, %v1914_v16 }
 0xa34   :  { %v1811_v55 = vpack.c.bf16 %v3460_v17, %v3456_v54  ;;  %v1802_v0 = vsel %vm362_vm1, %v3460_v17, 0.0 }
 0xa35   :  { %3461 = vpow2.f32 %v1919_v18  ;;  %1926 = vadd.xlane.f32.xlu1 %v1925_v25  ;;  %1803 = vadd.xlane.f32.xlu0 %v1802_v0 }
 0xa36   :  { %v2064_v28 = vpop.permute.xlu2 %2063  ;;  %3048 = vmatmul.msk.bf16.vlgmr.msrb.gmra.mxu1 %vm362_vm1, %v1811_v55 }
 0xa37   :  { %2082 = vmatpush.bf16.msra.mxu1 %v2064_v28 }
 0xa38   :  { %v1942_v35 = vpop.permute.xlu1 %1941  ;;  %v1783_v36 = vpop.xlane.xlu0 %1782 }
 0xa39   :  { %v1789_v37 = vsub.f32 %v4124_v60, %v1783_v36  ;;  %1957 = vmatpush.bf16.msrb.mxu3 %v1942_v35 }
 0xa3b   :  { %v3462_v7 = vpop.eup %3461  ;;  %v1795_v22 = vmul.f32 1.442695, %v1789_v37 }
 0xa3c   :  { %v1928_v41 = vsel %vm362_vm1, %v3462_v7, 0.0  ;;  %v1937_v57 = vpack.c.bf16 %v3462_v7, %v3458_v26 }
 0xa3d   :  { %3463 = vpow2.f32 %v1795_v22  ;;  %1929 = vadd.xlane.f32.xlu0 %v1928_v41 }
 0xa40   :  { %v1786_v33 = vpop.xlane.xlu0 %1785 }
 0xa41   :  { %v1790_v42 = vsub.f32 %v4131_v23, %v1786_v33 }
 0xa43   :  { %v3464_v61 = vpop.eup %3463  ;;  %v1797_v45 = vmul.f32 1.442695, %v1790_v42 }
 0xa44   :  { %v1805_v31 = vsel %vm362_vm1, %v3464_v61, 0.0 }
 0xa45   :  { %3465 = vpow2.f32 %v1797_v45  ;;  %1806 = vadd.xlane.f32.xlu1 %v1805_v31 }
 0xa48   :  { %v2027_v47 = vpop.xlane.xlu0 %2026 }
 0xa49   :  { %v2037_v40 = vsub.f32 %v4139_v11, %v2027_v47 }
 0xa4b   :  { %v3466_v30 = vpop.eup %3465  ;;  %v2041_v23 = vmul.f32 1.442695, %v2037_v40 }
 0xa4c   :  { %v1808_v24 = vsel %vm362_vm1, %v3466_v30, 0.0  ;;  %v1812_v60 = vpack.c.bf16 %v3466_v30, %v3464_v61 }
 0xa4d   :  { %1809 = vadd.xlane.f32.xlu0 %v1808_v24  ;;  %3467 = vpow2.f32 %v2041_v23 }
 0xa4e   :  { %3049 = vmatmul.msk.bf16.gmra.mxu1 %vm362_vm1, %v1812_v60 }
 0xa53   :  { %v3468_v46 = vpop.eup %3467 }
 0xa54   :  { %v2049_v25 = vsel %vm362_vm1, %v3468_v46, 0.0 }
 0xa5b   :  { %v1940_v49 = vpop.permute.xlu0 %1939 }
 0xa5c   :  { %1958 = vmatpush.bf16.msrb.mxu3 %v1940_v49 }
 0xa5f   :  { %3052 = vmatmul.msk.bf16.vlgmr.msrb.gmra.mxu3 %vm362_vm1, %v1937_v57  ;;  %v1683_v57 = vsel %vm362_vm1, %v4145_v29, 0.0 }
 0xa63   :  { %v2030_v52 = vpop.xlane.xlu1 %2029 }
 0xa64   :  { %v2038_v27 = vsub.f32 %v4155_v48, %v2030_v52 }
 0xa66   :  { %v2043_v59 = vmul.f32 1.442695, %v2038_v27 }
 0xa68   :  { %3469 = vpow2.f32 %v2043_v59 }
 0xa6b   :  { %v1912_v38 = vpop.xlane.xlu1 %1911 }
 0xa6c   :  { %v1916_v44 = vsub.f32 %v4160_v62, %v1912_v38 }
 0xa6e   :  { %v3470_v58 = vpop.eup %3469  ;;  %v1923_v2 = vmul.f32 1.442695, %v1916_v44 }
 0xa6f   :  { %v2061_v51 = vpack.c.bf16 %v3470_v58, %v3468_v46  ;;  %v2036_v4 = vpop.xlane.xlu2 %2035  ;;  %v2052_v9 = vsel %vm362_vm1, %v3470_v58, 0.0 }
 0xa70   :  { %3471 = vpow2.f32 %v1923_v2  ;;  %v2040_v11 = vsub.f32 %v4165_v43, %v2036_v4  ;;  %2053 = vadd.xlane.f32.xlu0 %v2052_v9 }
 0xa71   :  { %3056 = vmatmul.msk.bf16.vlgmr.msra.gmra.mxu1 %vm362_vm1, %v2061_v51 }
 0xa72   :  { %v2047_v48 = vmul.f32 1.442695, %v2040_v11 }
 0xa73   :  { %v2033_v32 = vpop.xlane.xlu1 %2032 }
 0xa74   :  { %v2039_v6 = vsub.f32 %v4170_v63, %v2033_v32  ;;  %3473 = vpow2.f32 %v2047_v48  ;;  %v4207_v63 = vpop.f32.mrf.mxu3 }
 0xa76   :  { %v3472_v12 = vpop.eup %3471  ;;  %v2045_v8 = vmul.f32 1.442695, %v2039_v6 }
 0xa77   :  { %v1934_v62 = vsel %vm362_vm1, %v3472_v12, 0.0  ;;  %v4224_v11 = vpop.xlane.xlu2 %1678 }
 0xa78   :  { %3475 = vpow2.f32 %v2045_v8  ;;  %1935 = vadd.xlane.f32.xlu2 %v1934_v62 }
 0xa7a   :  { %v3474_v5 = vpop.eup %3473 }
 0xa7c   :  { %v1708_v18 = vpop.f32.mrf.mxu3 }
 0xa7e   :  { %v3476_v19 = vpop.eup %3475 }
 0xa7f   :  { %v2055_v50 = vsel %vm362_vm1, %v3476_v19, 0.0  ;;  %v2062_v54 = vpack.c.bf16 %v3474_v5, %v3476_v19 }
 0xa80   :  { %2056 = vadd.xlane.f32.xlu0 %v2055_v50 }
 0xa81   :  { %3057 = vmatmul.msk.bf16.gmra.mxu1 %vm362_vm1, %v2062_v54 }
 0xa84   :  { %v4216_v42 = vpop.f32.mrf.mxu3 }
 0xa86   :  { %v1909_v43 = vpop.xlane.xlu0 %1908 }
 0xa87   :  { %v1915_v53 = vsub.f32 %v4176_v3, %v1909_v43  ;;  %v2058_v3 = vsel %vm362_vm1, %v3474_v5, 0.0 }
 0xa89   :  { %v1921_v56 = vmul.f32 1.442695, %v1915_v53 }
 0xa8b   :  { %3477 = vpow2.f32 %v1921_v56 }
 0xa8c   :  { %v4218_v61 = vpop.f32.mrf.mxu3 }
 0xa8e   :  { %v1682_v13 = vpop.xlane.xlu0 %1681 }
 0xa8f   :  { %3479 = vrcp.f32 %v1682_v13 }
 0xa91   :  { %v3478_v14 = vpop.eup %3477 }
 0xa92   :  { %v1931_v26 = vsel %vm362_vm1, %v3478_v14, 0.0  ;;  %v1938_v16 = vpack.c.bf16 %v3472_v12, %v3478_v14 }
 0xa93   :  { %1932 = vadd.xlane.f32.xlu1 %v1931_v26 }
 0xa94   :  { %3053 = vmatmul.msk.bf16.gmra.mxu3 %vm362_vm1, %v1938_v16 }
 0xa95   :  { %v3480_v17 = vpop.eup %3479 }
 0xa96   :  { %v4211_v55 = vmul.f32 %v3480_v17, %v1708_v18 }
 0xa9b   :  { %2050 = vadd.xlane.f32.xlu1 %v2049_v25 }
 0xaa0   :  { %v1801_v0 = vpop.xlane.xlu1 %1800 }
 0xaa1   :  { %3481 = vrcp.f32 %v1801_v0 }
 0xaa3   :  { %2059 = vadd.xlane.f32.xlu1 %v2058_v3 }
 0xaa7   :  { %v3482_v36 = vpop.eup %3481 }
 0xaa8   :  { %v1804_v28 = vpop.xlane.xlu0 %1803  ;;  %v1927_v31 = vpop.xlane.xlu1 %1926 }
 0xaa9   :  { %3483 = vrcp.f32 %v1804_v28 }
 0xaaa   :  { %3485 = vrcp.f32 %v1927_v31  ;;  %v3080_v31 = vld [vmem:[#allocation5 + $0x27c] sm:$0xf] }
 0xaaf   :  { %v3484_v37 = vpop.eup %3483 }
 0xab0   :  { %v1930_v45 = vpop.xlane.xlu0 %1929  ;;  %v3486_v47 = vpop.eup %3485 }
 0xab1   :  { %3487 = vrcp.f32 %v1930_v45 }
 0xab3   :  { %v1836_v35 = vpop.f32.mrf.mxu1 }
 0xab4   :  { %v1850_v22 = vmul.f32 %v3482_v36, %v1836_v35  ;;  %v1686_v36 = vsel %vm362_vm1, %v4147_v34, 0.0 }
 0xab7   :  { %v3488_v40 = vpop.eup %3487 }
 0xab8   :  { %v1807_v49 = vpop.xlane.xlu1 %1806 }
 0xabb   :  { %v1838_v7 = vpop.f32.mrf.mxu1 }
 0xabc   :  { %v1851_v41 = vmul.f32 %v3484_v37, %v1838_v7  ;;  %v3088_v37 = vld [vmem:[#allocation5 + $0x2dc] sm:$0xf]  ;;  %v3267_v7 = vld [vmem:[#allocation5 + $0x2f0] sm:$0xf0] }
 0xabe   :  { %v3334_v33 = vpack.i.bf16 %v1851_v41, %v1850_v22  ;;  %v3084_v22 = vld [vmem:[#allocation5 + $0x2ac] sm:$0xf]  ;;  %v3089_v41 = vor.u32 %v3267_v7, %v3088_v37 }
 0xac0   :  { %3335 = vrot.lane.b32.xlu1 %v3334_v33, %s3643_s23  ;;  %v1810_v60 = vpop.xlane.xlu0 %1809  ;;  %v3266_v33 = vld [vmem:[#allocation5 + $0x2c0] sm:$0xf0]  ;;  %2229 = vmatpush.bf16.msra.mxu2 %v3089_v41 }
 0xac1   :  { %3489 = vrcp.f32 %v1810_v60  ;;  %v3085_v45 = vor.u32 %v3266_v33, %v3084_v22  ;;  %v3076_v60 = vld [vmem:[#allocation5 + $0x24c] sm:$0xf] }
 0xac2   :  { %3491 = vrcp.f32 %v1807_v49 }
 0xac4   :  { %2230 = vmatpush.bf16.msra.mxu2 %v3085_v45 }
 0xac7   :  { %v3490_v44 = vpop.eup %3489 }
 0xac8   :  { %v3492_v58 = vpop.eup %3491 }
 0xacb   :  { %v1841_v24 = vpop.f32.mrf.mxu1 }
 0xacc   :  { %v1852_v2 = vmul.f32 %v3492_v58, %v1841_v24  ;;  %v3260_v58 = vld [vmem:[#allocation5 + $0x1a0] sm:$0xf0] }
 0xad3   :  { %v1843_v38 = vpop.f32.mrf.mxu1 }
 0xad4   :  { %v1853_v46 = vmul.f32 %v3490_v44, %v1843_v38  ;;  %v3261_v38 = vld [vmem:[#allocation5 + $0x1d0] sm:$0xf0] }
 0xad6   :  { %v3349_v51 = vpack.i.bf16 %v1853_v46, %v1852_v2  ;;  %v3060_v46 = vld [vmem:[#allocation5 + $0x18c] sm:$0xf] }
 0xad7   :  { %v3061_v2 = vor.u32 %v3260_v58, %v3060_v46 }
 0xae2   :  { %v1960_v30 = vpop.f32.mrf.mxu3 }
 0xae3   :  { %v1974_v52 = vmul.f32 %v3486_v47, %v1960_v30  ;;  %v2054_v9 = vpop.xlane.xlu0 %2053  ;;  %v3265_v30 = vld [vmem:[#allocation5 + $0x290] sm:$0xf0]  ;;  %v3264_v47 = vld [vmem:[#allocation5 + $0x260] sm:$0xf0] }
 0xae4   :  { %3493 = vrcp.f32 %v2054_v9  ;;  %v3081_v24 = vor.u32 %v3265_v30, %v3080_v31  ;;  %v3077_v49 = vor.u32 %v3264_v47, %v3076_v60  ;;  %v2180_v30 = vperm.slane %v4032_v1, 3 }
 0xae6   :  { %2231 = vmatpush.bf16.msra.mxu2 %v3081_v24 }
 0xaea   :  { %v1962_v23 = vpop.f32.mrf.mxu3  ;;  %1684 = vadd.xlane.f32.xlu1 %v1683_v57  ;;  %v3494_v6 = vpop.eup %3493  ;;  %2232 = vmatpush.bf16.msra.mxu2 %v3077_v49  ;;  %v3072_v57 = vld [vmem:[#allocation5 + $0x21c] sm:$0xf] }
 0xaeb   :  { %v1975_v27 = vmul.f32 %v3488_v40, %v1962_v23  ;;  %v1936_v8 = vpop.xlane.xlu2 %1935  ;;  %v3263_v40 = vld [vmem:[#allocation5 + $0x230] sm:$0xf0]  ;;  %v3068_v23 = vld [vmem:[#allocation5 + $0x1ec] sm:$0xf] }
 0xaec   :  { %v3073_v34 = vor.u32 %v3263_v40, %v3072_v57 }
 0xaed   :  { %v3339_v59 = vpack.i.bf16 %v1975_v27, %v1974_v52  ;;  %v3262_v52 = vld [vmem:[#allocation5 + $0x200] sm:$0xf0] }
 0xaee   :  { %v2084_v29 = vpop.f32.mrf.mxu1  ;;  %2233 = vmatpush.bf16.msra.mxu2 %v3073_v34  ;;  %v3069_v27 = vor.u32 %v3262_v52, %v3068_v23 }
 0xaef   :  { %3340 = vrot.lane.b32.xlu2 %v3339_v59, %s3644_s24  ;;  %v3064_v59 = vld [vmem:[#allocation5 + $0x1bc] sm:$0xf] }
 0xaf0   :  { %v3065_v44 = vor.u32 %v3261_v38, %v3064_v59 }
 0xaf2   :  { %2234 = vmatpush.bf16.msra.mxu2 %v3069_v27 }
 0xaf3   :  { %v2057_v56 = vpop.xlane.xlu0 %2056 }
 0xaf6   :  { %v2086_v32 = vpop.f32.mrf.mxu1  ;;  %2235 = vmatpush.bf16.msra.mxu2 %v3065_v44 }
 0xaf7   :  { %3350 = vrot.lane.b32.xlu2 %v3349_v51, %s3643_s23  ;;  %v2099_v62 = vmul.f32 %v3494_v6, %v2086_v32 }
 0xafa   :  { %2236 = vmatpush.bf16.msra.mxu2 %v3061_v2 }
 0xafe   :  { %v2089_v43 = vpop.f32.mrf.mxu1 }
 0xb06   :  { %v1933_v4 = vpop.xlane.xlu1 %1932  ;;  %v2091_v25 = vpop.f32.mrf.mxu1 }
 0xb0e   :  { %v2051_v48 = vpop.xlane.xlu1 %2050 }
 0xb0f   :  { %3495 = vrcp.f32 %v2051_v48 }
 0xb10   :  { %3497 = vrcp.f32 %v1936_v8 }
 0xb11   :  { %3499 = vrcp.f32 %v1933_v4 }
 0xb15   :  { %v3496_v12 = vpop.eup %3495 }
 0xb16   :  { %v2098_v5 = vmul.f32 %v3496_v12, %v2084_v29  ;;  %v2060_v54 = vpop.xlane.xlu1 %2059  ;;  %v3498_v53 = vpop.eup %3497 }
 0xb17   :  { %v1965_v19 = vpop.f32.mrf.mxu3  ;;  %3501 = vrcp.f32 %v2060_v54  ;;  %v3500_v13 = vpop.eup %3499 }
 0xb18   :  { %v3344_v50 = vpack.i.bf16 %v2099_v62, %v2098_v5  ;;  %v1976_v26 = vmul.f32 %v3500_v13, %v1965_v19  ;;  %3503 = vrcp.f32 %v2057_v56 }
 0xb19   :  { %3505 = vrcp.f32 %v4224_v11 }
 0xb1a   :  { %3345 = vrot.lane.b32.xlu0 %v3344_v50, %s3642_s0 }
 0xb1d   :  { %v3502_v18 = vpop.eup %3501 }
 0xb1e   :  { %v2101_v3 = vmul.f32 %v3502_v18, %v2091_v25  ;;  %v3504_v0 = vpop.eup %3503 }
 0xb1f   :  { %v1967_v14 = vpop.f32.mrf.mxu3  ;;  %v2100_v28 = vmul.f32 %v3504_v0, %v2089_v43  ;;  %v3506_v29 = vpop.eup %3505 }
 0xb20   :  { %v1977_v16 = vmul.f32 %v3498_v53, %v1967_v14  ;;  %v1720_v12 = vmul.f32 %v3506_v29, %v4207_v63 }
 0xb21   :  { %v3359_v35 = vpack.i.bf16 %v2101_v3, %v2100_v28 }
 0xb22   :  { %v3354_v17 = vpack.i.bf16 %v1977_v16, %v1976_v26 }
 0xb24   :  { %3355 = vrot.lane.b32.xlu2 %v3354_v17, %s3644_s24 }
 0xb2c   :  { %3360 = vrot.lane.b32.xlu2 %v3359_v35, %s3642_s0 }
 0xb32   :  { %v3336_v51 = vpop.permute.xlu1 %3335 }
 0xb33   :  { %v3338_v9 = vunpack.i.h.bf16 %v3336_v51  ;;  %v3337_v48 = vunpack.i.l.bf16 %v3336_v51 }
 0xb35   :  { %v2151_v62 = vsel %vm362_vm1, %v4211_v55, %v3338_v9  ;;  %v2150_v5 = vsel %vm362_vm1, %v1720_v12, %v3337_v48  ;;  %v3275_v12 = vld [vmem:[#allocation5 + $0x2f4] sm:$0xf0] }
 0xb44   :  { %1687 = vadd.xlane.f32.xlu0 %v1686_v36 }
 0xb49   :  { %v3341_v4 = vpop.permute.xlu2 %3340 }
 0xb4a   :  { %v3343_v32 = vunpack.i.h.bf16 %v3341_v4  ;;  %v3342_v6 = vunpack.i.l.bf16 %v3341_v4 }
 0xb4c   :  { %v2155_v54 = vsel %vm903_vm2, %v2151_v62, %v3343_v32  ;;  %v2154_v11 = vsel %vm903_vm2, %v2150_v5, %v3342_v6  ;;  %v3120_v6 = vld [vmem:[#allocation5 + $0x2e0] sm:$0xf]  ;;  %v3116_v62 = vld [vmem:[#allocation5 + $0x2b0] sm:$0xf]  ;;  %v3274_v5 = vld [vmem:[#allocation5 + $0x2c4] sm:$0xf0] }
 0xb51   :  { %v3351_v13 = vpop.permute.xlu2 %3350 }
 0xb52   :  { %v3353_v3 = vunpack.i.h.bf16 %v3351_v13  ;;  %v3352_v0 = vunpack.i.l.bf16 %v3351_v13  ;;  %v3104_v13 = vld [vmem:[#allocation5 + $0x220] sm:$0xf] }
 0xb5d   :  { %v1685_v63 = vpop.xlane.xlu1 %1684 }
 0xb5e   :  { %3507 = vrcp.f32 %v1685_v63  ;;  %v3271_v63 = vld [vmem:[#allocation5 + $0x234] sm:$0xf0] }
 0xb64   :  { %v3508_v55 = vpop.eup %3507 }
 0xb65   :  { %v1722_v17 = vmul.f32 %v3508_v55, %v4216_v42  ;;  %v3270_v55 = vld [vmem:[#allocation5 + $0x204] sm:$0xf0] }
 0xb67   :  { %v2152_v37 = vsel %vm362_vm1, %v1722_v17, %v3352_v0  ;;  %v3096_v17 = vld [vmem:[#allocation5 + $0x1c0] sm:$0xf] }
 0xb7e   :  { %v3356_v14 = vpop.permute.xlu2 %3355 }
 0xb7f   :  { %v3357_v25 = vunpack.i.l.bf16 %v3356_v14  ;;  %v3358_v36 = vunpack.i.h.bf16 %v3356_v14  ;;  %v3105_v14 = vor.u32 %v3271_v63, %v3104_v13  ;;  %v3280_v13 = vld [vmem:[#allocation5 + $0x268] sm:$0xf0] }
 0xb81   :  { %v2156_v41 = vsel %vm903_vm2, %v2152_v37, %v3357_v25 }
 0xb86   :  { %v3361_v16 = vpop.permute.xlu2 %3360 }
 0xb87   :  { %v3362_v28 = vunpack.i.l.bf16 %v3361_v16  ;;  %v3363_v7 = vunpack.i.h.bf16 %v3361_v16 }
 0xb89   :  { %v2160_v45 = vsel %vm908_vm3, %v2156_v41, %v3362_v28  ;;  %v3092_v28 = vld [vmem:[#allocation5 + $0x190] sm:$0xf] }
 0xb8c   :  { %v3346_v8 = vpop.permute.xlu0 %3345 }
 0xb8d   :  { %v3348_v19 = vunpack.i.h.bf16 %v3346_v8  ;;  %v3347_v50 = vunpack.i.l.bf16 %v3346_v8  ;;  %v3121_v8 = vor.u32 %v3275_v12, %v3120_v6 }
 0xb8f   :  { %v2159_v43 = vsel %vm908_vm3, %v2155_v54, %v3348_v19  ;;  %v2158_v53 = vsel %vm908_vm3, %v2154_v11, %v3347_v50  ;;  %2409 = vmatpush.bf16.msra.mxu3 %v3121_v8  ;;  %v3117_v19 = vor.u32 %v3274_v5, %v3116_v62  ;;  %v3112_v50 = vld [vmem:[#allocation5 + $0x280] sm:$0xf]  ;;  %v3273_v54 = vld [vmem:[#allocation5 + $0x294] sm:$0xf0] }
 0xb90   :  { %v2162_v56 = vpack.c.bf16 %v2159_v43, %v2158_v53  ;;  %v3113_v11 = vor.u32 %v3273_v54, %v3112_v50  ;;  %v3108_v43 = vld [vmem:[#allocation5 + $0x250] sm:$0xf]  ;;  %v3272_v53 = vld [vmem:[#allocation5 + $0x264] sm:$0xf0]  ;;  %v3144_v50 = vld [vmem:[#allocation5 + $0x284] sm:$0xf] }
 0xb91   :  { %v3281_v54 = vld [vmem:[#allocation5 + $0x298] sm:$0xf0] }
 0xb92   :  { %2237 = vmatmul.bf16.vlgmr.msra.gmra.mxu2 %v2162_v56  ;;  %v3109_v56 = vor.u32 %v3272_v53, %v3108_v43  ;;  %v3145_v53 = vor.u32 %v3281_v54, %v3144_v50 }
 0xb93   :  { %2410 = vmatpush.bf16.msra.mxu3 %v3117_v19 }
 0xb97   :  { %2411 = vmatpush.bf16.msra.mxu3 %v3113_v11 }
 0xb9b   :  { %2412 = vmatpush.bf16.msra.mxu3 %v3109_v56  ;;  %v3140_v56 = vld [vmem:[#allocation5 + $0x254] sm:$0xf] }
 0xb9f   :  { %2413 = vmatpush.bf16.msra.mxu3 %v3105_v14 }
 0xbb7   :  { %v1688_v26 = vpop.xlane.xlu0 %1687 }
 0xbb8   :  { %3509 = vrcp.f32 %v1688_v26  ;;  %v3100_v26 = vld [vmem:[#allocation5 + $0x1f0] sm:$0xf] }
 0xbb9   :  { %v3101_v16 = vor.u32 %v3270_v55, %v3100_v26  ;;  %v3141_v26 = vor.u32 %v3280_v13, %v3140_v56 }
 0xbbb   :  { %2414 = vmatpush.bf16.msra.mxu3 %v3101_v16 }
 0xbbe   :  { %v3510_v18 = vpop.eup %3509 }
 0xbbf   :  { %v1723_v35 = vmul.f32 %v3510_v18, %v4218_v61  ;;  %v3269_v18 = vld [vmem:[#allocation5 + $0x1d4] sm:$0xf0] }
 0xbc0   :  { %v3097_v25 = vor.u32 %v3269_v18, %v3096_v17 }
 0xbc1   :  { %v2153_v22 = vsel %vm362_vm1, %v1723_v35, %v3353_v3  ;;  %v3268_v35 = vld [vmem:[#allocation5 + $0x1a4] sm:$0xf0] }
 0xbc2   :  { %v2157_v33 = vsel %vm903_vm2, %v2153_v22, %v3358_v36  ;;  %2415 = vmatpush.bf16.msra.mxu3 %v3097_v25  ;;  %v3093_v37 = vor.u32 %v3268_v35, %v3092_v28 }
 0xbc3   :  { %v2161_v42 = vsel %vm908_vm3, %v2157_v33, %v3363_v7 }
 0xbc4   :  { %v2163_v31 = vpack.c.bf16 %v2161_v42, %v2160_v45 }
 0xbc6   :  { %2242 = vmatmul.bf16.gmra.mxu2 %v2163_v31  ;;  %2416 = vmatpush.bf16.msra.mxu3 %v3093_v37 }
 0xc15   :  { %v2238_v24 = vpop.f32.mrf.mxu2 }
 0xc16   :  { %v2239_v61 = vadd.f32 %v2238_v24, %v2180_v30 }
 0xc18   :  { %v2248_v60 = vadd.f32 %v2239_v61, %v4016_v15 }
 0xc1a   :  { %2252 = vadd.xlane.f32.xlu2 %v2248_v60 }
 0xc1d   :  { %v2240_v47 = vpop.f32.mrf.mxu2 }
 0xc1e   :  { %v2241_v49 = vadd.f32 %v2240_v47, %v2180_v30 }
 0xc20   :  { %v2249_v57 = vadd.f32 %v2241_v49, %v4018_v10 }
 0xc22   :  { %2254 = vadd.xlane.f32.xlu1 %v2249_v57 }
 0xc49   :  { %v2243_v40 = vpop.f32.mrf.mxu2 }
 0xc4a   :  { %v2244_v34 = vadd.f32 %v2243_v40, %v2180_v30 }
 0xc4c   :  { %v2250_v23 = vadd.f32 %v2244_v34, %v4026_v39  ;;  %v4275_v34 = vld [vmem:[#allocation7 + $0x10] sm:$0xff] }
 0xc4e   :  { %2256 = vadd.xlane.f32.xlu0 %v2250_v23 }
 0xc51   :  { %v2245_v52 = vpop.f32.mrf.mxu2 }
 0xc52   :  { %v2246_v27 = vadd.f32 %v2245_v52, %v2180_v30 }
 0xc54   :  { %v2251_v59 = vadd.f32 %v2246_v27, %v4028_v21 }
 0xc56   :  { %2258 = vadd.xlane.f32.xlu1 %v2251_v59 }
 0xc8d   :  { %v2253_v1 = vpop.xlane.xlu2 %2252 }
 0xc8e   :  { %v2260_v38 = vmul.f32 %v2253_v1, %v3948_v20  ;;  %v2337_v1 = vperm.slane %v4275_v34, 5 }
 0xc90   :  { %v4254_v15 = vsub.f32 %v2248_v60, %v2260_v38 }
 0xc92   :  { %v2268_v44 = vmul.f32 %v4254_v15, %v4254_v15 }
 0xc94   :  { %2272 = vadd.xlane.f32.xlu0 %v2268_v44 }
 0xc95   :  { %v2255_v10 = vpop.xlane.xlu1 %2254 }
 0xc96   :  { %v2261_v46 = vmul.f32 %v2255_v10, %v3948_v20 }
 0xc98   :  { %v4259_v58 = vsub.f32 %v2249_v57, %v2261_v46 }
 0xc9a   :  { %v2269_v39 = vmul.f32 %v4259_v58, %v4259_v58 }
 0xc9c   :  { %2274 = vadd.xlane.f32.xlu1 %v2269_v39 }
 0xcc1   :  { %v2257_v21 = vpop.xlane.xlu0 %2256 }
 0xcc2   :  { %v2262_v2 = vmul.f32 %v2257_v21, %v3948_v20 }
 0xcc4   :  { %v4264_v51 = vsub.f32 %v2250_v23, %v2262_v2  ;;  %v2332_v23 = vperm.slane %v4275_v34, 4 }
 0xcc6   :  { %v2270_v4 = vmul.f32 %v4264_v51, %v4264_v51 }
 0xcc8   :  { %2276 = vadd.xlane.f32.xlu0 %v2270_v4 }
 0xcc9   :  { %v2259_v29 = vpop.xlane.xlu1 %2258 }
 0xcca   :  { %v2263_v9 = vmul.f32 %v2259_v29, %v3948_v20  ;;  %v3152_v29 = vld [vmem:[#allocation5 + $0x2e4] sm:$0xf] }
 0xccc   :  { %v4269_v48 = vsub.f32 %v2251_v59, %v2263_v9  ;;  %v3283_v9 = vld [vmem:[#allocation5 + $0x2f8] sm:$0xf0] }
 0xccd   :  { %v3153_v12 = vor.u32 %v3283_v9, %v3152_v29 }
 0xcce   :  { %v2271_v32 = vmul.f32 %v4269_v48, %v4269_v48 }
 0xccf   :  { %2499 = vmatpush.bf16.msrb.mxu0 %v3153_v12 }
 0xcd0   :  { %2278 = vadd.xlane.f32.xlu1 %v2271_v32  ;;  %v3148_v32 = vld [vmem:[#allocation5 + $0x2b4] sm:$0xf] }
 0xd07   :  { %v2273_v3 = vpop.xlane.xlu0 %2272 }
 0xd08   :  { %v2280_v0 = vmul.f32 %v2273_v3, %v3948_v20 }
 0xd0a   :  { %v2284_v36 = vadd.f32 1e-05, %v2280_v0 }
 0xd0c   :  { %3511 = vrsqrt.f32 %v2284_v36  ;;  %vm2294_vm3 = vweird.f32 %v2284_v36 }
 0xd0f   :  { %v2275_v7 = vpop.xlane.xlu1 %2274 }
 0xd10   :  { %v2281_v22 = vmul.f32 %v2275_v7, %v3948_v20 }
 0xd12   :  { %v3512_v41 = vpop.eup %3511  ;;  %v2285_v33 = vadd.f32 1e-05, %v2281_v22 }
 0xd13   :  { %v2289_v45 = vmul.f32 %v3512_v41, %v2284_v36  ;;  %vm2295_vm2 = vweird.f32 %v3512_v41 }
 0xd14   :  { %3513 = vrsqrt.f32 %v2285_v33  ;;  %vm2296_vm0 = vmor %vm2294_vm3, %vm2295_vm2  ;;  %vm2304_vm5 = vweird.f32 %v2285_v33 }
 0xd15   :  { %v2290_v42 = vmul.f32 %v3512_v41, %v2289_v45 }
 0xd17   :  { %v2291_v31 = vmul.f32 0.5, %v2290_v42  ;;  %v3136_v42 = vld [vmem:[#allocation5 + $0x224] sm:$0xf] }
 0xd19   :  { %v2292_v30 = vsub.f32 1.5, %v2291_v31  ;;  %v3279_v31 = vld [vmem:[#allocation5 + $0x238] sm:$0xf0] }
 0xd1a   :  { %v3514_v24 = vpop.eup %3513 }
 0xd1b   :  { %v2293_v61 = vmul.f32 %v3512_v41, %v2292_v30  ;;  %v2299_v60 = vmul.f32 %v3514_v24, %v2285_v33  ;;  %vm2305_vm4 = vweird.f32 %v3514_v24  ;;  %v3137_v30 = vor.u32 %v3279_v31, %v3136_v42 }
 0xd1c   :  { %vm2306_vm6 = vmor %vm2304_vm5, %vm2305_vm4 }
 0xd1d   :  { %v2300_v47 = vmul.f32 %v3514_v24, %v2299_v60  ;;  %v2297_v49 = vsel %vm2296_vm0, %v3512_v41, %v2293_v61  ;;  %v3278_v61 = vld [vmem:[#allocation5 + $0x208] sm:$0xf0] }
 0xd1e   :  { %v2328_v52 = vmul.f32 %v2297_v49, %v4254_v15 }
 0xd1f   :  { %v2301_v57 = vmul.f32 0.5, %v2300_v47  ;;  %v3277_v47 = vld [vmem:[#allocation5 + $0x1d8] sm:$0xf0] }
 0xd20   :  { %v2333_v38 = vmul.f32 %v2332_v23, %v2328_v52  ;;  %v2360_v52 = vperm.slane %v4275_v34, 6 }
 0xd21   :  { %v2302_v40 = vsub.f32 1.5, %v2301_v57  ;;  %v3124_v57 = vld [vmem:[#allocation5 + $0x194] sm:$0xf] }
 0xd22   :  { %v4281_v46 = vadd.f32 %v2337_v1, %v2333_v38 }
 0xd23   :  { %v2303_v27 = vmul.f32 %v3514_v24, %v2302_v40 }
 0xd25   :  { %v2307_v59 = vsel %vm2306_vm6, %v3514_v24, %v2303_v27  ;;  %v3132_v24 = vld [vmem:[#allocation5 + $0x1f4] sm:$0xf] }
 0xd26   :  { %v2329_v44 = vmul.f32 %v2307_v59, %v4259_v58  ;;  %v3282_v58 = vld [vmem:[#allocation5 + $0x2c8] sm:$0xf0]  ;;  %v3133_v60 = vor.u32 %v3278_v61, %v3132_v24 }
 0xd27   :  { %v3149_v62 = vor.u32 %v3282_v58, %v3148_v32 }
 0xd28   :  { %v2334_v10 = vmul.f32 %v2332_v23, %v2329_v44 }
 0xd29   :  { %2500 = vmatpush.bf16.msrb.mxu0 %v3149_v62 }
 0xd2a   :  { %v4283_v39 = vadd.f32 %v2337_v1, %v2334_v10 }
 0xd2c   :  { %v2342_v21 = vpack.c.bf16 %v4283_v39, %v4281_v46 }
 0xd2d   :  { %2501 = vmatpush.bf16.msrb.mxu0 %v3145_v53 }
 0xd2e   :  { %2417 = vmatmul.bf16.vlgmr.msra.gmra.mxu3 %v2342_v21 }
 0xd31   :  { %2502 = vmatpush.bf16.msrb.mxu0 %v3141_v26 }
 0xd35   :  { %2503 = vmatpush.bf16.msrb.mxu0 %v3137_v30 }
 0xd39   :  { %2504 = vmatpush.bf16.msrb.mxu0 %v3133_v60 }
 0xd3b   :  { %v2277_v2 = vpop.xlane.xlu0 %2276 }
 0xd3c   :  { %v2282_v15 = vmul.f32 %v2277_v2, %v3948_v20 }
 0xd3e   :  { %v2286_v4 = vadd.f32 1e-05, %v2282_v15 }
 0xd40   :  { %3515 = vrsqrt.f32 %v2286_v4  ;;  %vm2314_vm8 = vweird.f32 %v2286_v4 }
 0xd43   :  { %v2279_v6 = vpop.xlane.xlu1 %2278 }
 0xd44   :  { %v2283_v8 = vmul.f32 %v2279_v6, %v3948_v20  ;;  %v2450_v6 = vperm.slane %v4275_v34, 7 }
 0xd46   :  { %v3516_v5 = vpop.eup %3515  ;;  %v2287_v19 = vadd.f32 1e-05, %v2283_v8 }
 0xd47   :  { %v2309_v11 = vmul.f32 %v3516_v5, %v2286_v4  ;;  %vm2315_vm7 = vweird.f32 %v3516_v5 }
 0xd48   :  { %3517 = vrsqrt.f32 %v2287_v19  ;;  %vm2316_vm9 = vmor %vm2314_vm8, %vm2315_vm7  ;;  %vm2324_vm11 = vweird.f32 %v2287_v19 }
 0xd49   :  { %v2310_v43 = vmul.f32 %v3516_v5, %v2309_v11 }
 0xd4b   :  { %v2311_v63 = vmul.f32 0.5, %v2310_v43 }
 0xd4d   :  { %v2312_v14 = vsub.f32 1.5, %v2311_v63 }
 0xd4e   :  { %v3518_v55 = vpop.eup %3517 }
 0xd4f   :  { %v2313_v16 = vmul.f32 %v3516_v5, %v2312_v14  ;;  %v2319_v17 = vmul.f32 %v3518_v55, %v2287_v19  ;;  %vm2325_vm10 = vweird.f32 %v3518_v55 }
 0xd50   :  { %vm2326_vm12 = vmor %vm2324_vm11, %vm2325_vm10 }
 0xd51   :  { %v2320_v18 = vmul.f32 %v3518_v55, %v2319_v17  ;;  %v2317_v25 = vsel %vm2316_vm9, %v3516_v5, %v2313_v16 }
 0xd52   :  { %v2330_v28 = vmul.f32 %v2317_v25, %v4264_v51  ;;  %v3128_v51 = vld [vmem:[#allocation5 + $0x1c4] sm:$0xf] }
 0xd53   :  { %v2321_v3 = vmul.f32 0.5, %v2320_v18  ;;  %v3129_v49 = vor.u32 %v3277_v47, %v3128_v51 }
 0xd54   :  { %v2335_v7 = vmul.f32 %v2332_v23, %v2330_v28 }
 0xd55   :  { %v2322_v0 = vsub.f32 1.5, %v2321_v3  ;;  %2505 = vmatpush.bf16.msrb.mxu0 %v3129_v49 }
 0xd56   :  { %v2340_v41 = vadd.f32 %v2337_v1, %v2335_v7 }
 0xd57   :  { %v2323_v35 = vmul.f32 %v3518_v55, %v2322_v0 }
 0xd59   :  { %v2327_v36 = vsel %vm2326_vm12, %v3518_v55, %v2323_v35 }
 0xd5a   :  { %v2331_v37 = vmul.f32 %v2327_v36, %v4269_v48  ;;  %v3276_v48 = vld [vmem:[#allocation5 + $0x1a8] sm:$0xf0] }
 0xd5b   :  { %v3125_v40 = vor.u32 %v3276_v48, %v3124_v57 }
 0xd5c   :  { %v2336_v22 = vmul.f32 %v2332_v23, %v2331_v37 }
 0xd5d   :  { %2506 = vmatpush.bf16.msrb.mxu0 %v3125_v40  ;;  %v3291_v40 = vld [vmem:[%s4363_s3 + $0x40] sm:$0xff] }
 0xd5e   :  { %v2341_v33 = vadd.f32 %v2337_v1, %v2336_v22  ;;  %2700 = vmatpush.bf16.msrb.mxu2 %v3291_v40 }
 0xd60   :  { %v2343_v45 = vpack.c.bf16 %v2341_v33, %v2340_v41 }
 0xd62   :  { %2422 = vmatmul.bf16.gmra.mxu3 %v2343_v45 }
 0xdb1   :  { %v2418_v23 = vpop.f32.mrf.mxu3 }
 0xdb2   :  { %v2419_v27 = vadd.f32 %v2418_v23, %v2360_v52 }
 0xdb4   :  { %v2428_v38 = vmax.f32 %v2419_v27, 0.0  ;;  %v3290_v27 = vld [vmem:[%s4363_s3 + $0x38] sm:$0xff] }
 0xdb5   :  { %2701 = vmatpush.bf16.msrb.mxu2 %v3290_v27 }
 0xdb9   :  { %v2420_v59 = vpop.f32.mrf.mxu3 }
 0xdba   :  { %v2421_v1 = vadd.f32 %v2420_v59, %v2360_v52 }
 0xdbc   :  { %v2429_v44 = vmax.f32 %v2421_v1, 0.0 }
 0xdbe   :  { %v2432_v10 = vpack.c.bf16 %v2429_v44, %v2428_v38 }
 0xdc0   :  { %2507 = vmatmul.bf16.vlgmr.msrb.gmra.mxu0 %v2432_v10 }
 0xde5   :  { %v2423_v21 = vpop.f32.mrf.mxu3 }
 0xde6   :  { %v2424_v2 = vadd.f32 %v2423_v21, %v2360_v52  ;;  %v3289_v21 = vld [vmem:[%s4363_s3 + $0x30] sm:$0xff] }
 0xde7   :  { %2702 = vmatpush.bf16.msrb.mxu2 %v3289_v21 }
 0xde8   :  { %v2430_v29 = vmax.f32 %v2424_v2, 0.0 }
 0xded   :  { %v2425_v15 = vpop.f32.mrf.mxu3 }
 0xdee   :  { %v2426_v4 = vadd.f32 %v2425_v15, %v2360_v52 }
 0xdf0   :  { %v2431_v9 = vmax.f32 %v2426_v4, 0.0 }
 0xdf2   :  { %v2433_v32 = vpack.c.bf16 %v2431_v9, %v2430_v29 }
 0xdf4   :  { %2512 = vmatmul.bf16.gmra.mxu0 %v2433_v32 }
 0xe3d   :  { %v2508_v12 = vpop.f32.mrf.mxu0 }
 0xe3e   :  { %v2509_v58 = vadd.f32 %v2508_v12, %v2450_v6 }
 0xe40   :  { %v2518_v8 = vadd.f32 %v2509_v58, %v4281_v46 }
 0xe42   :  { %2522 = vadd.xlane.f32.xlu1 %v2518_v8 }
 0xe45   :  { %v2510_v62 = vpop.f32.mrf.mxu0 }
 0xe46   :  { %v2511_v54 = vadd.f32 %v2510_v62, %v2450_v6 }
 0xe48   :  { %v2519_v56 = vadd.f32 %v2511_v54, %v4283_v39 }
 0xe71   :  { %v2513_v5 = vpop.f32.mrf.mxu0 }
 0xe72   :  { %v2514_v19 = vadd.f32 %v2513_v5, %v2450_v6 }
 0xe74   :  { %v2520_v50 = vadd.f32 %v2514_v19, %v2340_v41 }
 0xe76   :  { %2526 = vadd.xlane.f32.xlu0 %v2520_v50 }
 0xe79   :  { %v2515_v11 = vpop.f32.mrf.mxu0 }
 0xe7a   :  { %v2516_v43 = vadd.f32 %v2515_v11, %v2450_v6  ;;  %v3288_v6 = vld [vmem:[%s4363_s3 + $0x28] sm:$0xff]  ;;  %v3287_v11 = vld [vmem:[%s4363_s3 + $0x20] sm:$0xff] }
 0xe7b   :  { %2703 = vmatpush.bf16.msrb.mxu2 %v3288_v6 }
 0xe7c   :  { %v2521_v53 = vadd.f32 %v2516_v43, %v2341_v33 }
 0xe7e   :  { %2528 = vadd.xlane.f32.xlu2 %v2521_v53  ;;  %2524 = vadd.xlane.f32.xlu0 %v2519_v56 }
 0xe7f   :  { %2704 = vmatpush.bf16.msrb.mxu2 %v3287_v11 }
 0xeb5   :  { %v2523_v13 = vpop.xlane.xlu1 %2522 }
 0xeb6   :  { %v2530_v34 = vmul.f32 %v2523_v13, %v3948_v20 }
 0xeb8   :  { %v4296_v63 = vsub.f32 %v2518_v8, %v2530_v34  ;;  %v1372_v8 = vld [vmem:[#allocation7 + $0x18] sm:$0xff] }
 0xeba   :  { %v2538_v46 = vmul.f32 %v4296_v63, %v4296_v63 }
 0xebc   :  { %2542 = vadd.xlane.f32.xlu0 %v2538_v46 }
 0xee9   :  { %v2527_v14 = vpop.xlane.xlu0 %2526 }
 0xeea   :  { %v2532_v26 = vmul.f32 %v2527_v14, %v3948_v20 }
 0xeec   :  { %v4301_v55 = vsub.f32 %v2520_v50, %v2532_v26 }
 0xeee   :  { %v2540_v16 = vmul.f32 %v4301_v55, %v4301_v55 }
 0xef0   :  { %2546 = vadd.xlane.f32.xlu2 %v2540_v16 }
 0xef1   :  { %v2529_v39 = vpop.xlane.xlu2 %2528  ;;  %v2525_v17 = vpop.xlane.xlu0 %2524 }
 0xef2   :  { %v2533_v18 = vmul.f32 %v2529_v39, %v3948_v20  ;;  %v2531_v25 = vmul.f32 %v2525_v17, %v3948_v20  ;;  %v2607_v39 = vperm.slane %v1372_v8, 1 }
 0xef4   :  { %v4307_v3 = vsub.f32 %v2521_v53, %v2533_v18  ;;  %v4309_v0 = vsub.f32 %v2519_v56, %v2531_v25  ;;  %v2602_v53 = vperm.slane %v1372_v8, 0 }
 0xef6   :  { %v2541_v28 = vmul.f32 %v4307_v3, %v4307_v3  ;;  %v2539_v35 = vmul.f32 %v4309_v0, %v4309_v0 }
 0xef8   :  { %2548 = vadd.xlane.f32.xlu1 %v2541_v28  ;;  %2544 = vadd.xlane.f32.xlu2 %v2539_v35 }
 0xf2f   :  { %v2543_v36 = vpop.xlane.xlu0 %2542 }
 0xf30   :  { %v2550_v37 = vmul.f32 %v2543_v36, %v3948_v20  ;;  %v2612_v36 = vld [vmem:[%s4362_s2 + $0x20] sm:$0xff] }
 0xf32   :  { %v2554_v7 = vadd.f32 1e-05, %v2550_v37 }
 0xf34   :  { %3519 = vrsqrt.f32 %v2554_v7  ;;  %vm2564_vm3 = vweird.f32 %v2554_v7 }
 0xf3a   :  { %v3520_v45 = vpop.eup %3519 }
 0xf3b   :  { %v2559_v42 = vmul.f32 %v3520_v45, %v2554_v7  ;;  %vm2565_vm2 = vweird.f32 %v3520_v45  ;;  %v2613_v7 = vpack.c.bf16 %v2612_v36, %v2612_v36 }
 0xf3c   :  { %vm4331_vm4 = vmor %vm2564_vm3, %vm2565_vm2 }
 0xf3d   :  { %v2560_v49 = vmul.f32 %v3520_v45, %v2559_v42  ;;  %v3364_v42 = vld [vmem:[#allocation7 + $0x20] ss:$0 sm:$0xff] }
 0xf3f   :  { %v2561_v23 = vmul.f32 0.5, %v2560_v49 }
 0xf41   :  { %v2562_v38 = vsub.f32 1.5, %v2561_v23 }
 0xf43   :  { %v2563_v29 = vmul.f32 %v3520_v45, %v2562_v38 }
 0xf45   :  { %v2567_v50 = vsel %vm4331_vm4, %v3520_v45, %v2563_v29 }
 0xf46   :  { %v2598_v13 = vmul.f32 %v2567_v50, %v4296_v63  ;;  %v3285_v63 = vld [vmem:[%s4363_s3 + $0x10] sm:$0xff] }
 0xf48   :  { %v2603_v28 = vmul.f32 %v2602_v53, %v2598_v13 }
 0xf63   :  { %v2547_v22 = vpop.xlane.xlu2 %2546 }
 0xf64   :  { %v2552_v41 = vmul.f32 %v2547_v22, %v3948_v20  ;;  %v3284_v22 = vld [vmem:[%s4363_s3 + $0x8] sm:$0xff] }
 0xf66   :  { %v2556_v33 = vadd.f32 1e-05, %v2552_v41 }
 0xf68   :  { %3521 = vrsqrt.f32 %v2556_v33  ;;  %vm2584_vm14 = vweird.f32 %v2556_v33 }
 0xf6b   :  { %v2549_v31 = vpop.xlane.xlu1 %2548  ;;  %v2545_v30 = vpop.xlane.xlu2 %2544 }
 0xf6c   :  { %v2553_v24 = vmul.f32 %v2549_v31, %v3948_v20  ;;  %v2551_v61 = vmul.f32 %v2545_v30, %v3948_v20 }
 0xf6e   :  { %v3522_v60 = vpop.eup %3521  ;;  %v2557_v51 = vadd.f32 1e-05, %v2553_v24  ;;  %v2555_v47 = vadd.f32 1e-05, %v2551_v61 }
 0xf6f   :  { %v2579_v57 = vmul.f32 %v3522_v60, %v2556_v33  ;;  %vm2585_vm13 = vweird.f32 %v3522_v60 }
 0xf70   :  { %3523 = vrsqrt.f32 %v2557_v51  ;;  %vm2586_vm15 = vmor %vm2584_vm14, %vm2585_vm13  ;;  %vm2594_vm6 = vweird.f32 %v2557_v51  ;;  %vm2574_vm8 = vweird.f32 %v2555_v47 }
 0xf71   :  { %v2580_v48 = vmul.f32 %v3522_v60, %v2579_v57  ;;  %3525 = vrsqrt.f32 %v2555_v47 }
 0xf73   :  { %v2581_v52 = vmul.f32 0.5, %v2580_v48 }
 0xf75   :  { %v2582_v20 = vsub.f32 1.5, %v2581_v52 }
 0xf76   :  { %v3524_v59 = vpop.eup %3523 }
 0xf77   :  { %v3526_v1 = vpop.eup %3525  ;;  %v2583_v44 = vmul.f32 %v3522_v60, %v2582_v20  ;;  %v2589_v10 = vmul.f32 %v3524_v59, %v2557_v51  ;;  %vm2595_vm0 = vweird.f32 %v3524_v59 }
 0xf78   :  { %v2569_v2 = vmul.f32 %v3526_v1, %v2555_v47  ;;  %vm2575_vm5 = vweird.f32 %v3526_v1  ;;  %vm2596_vm7 = vmor %vm2594_vm6, %vm2595_vm0 }
 0xf79   :  { %v2590_v15 = vmul.f32 %v3524_v59, %v2589_v10  ;;  %v2587_v9 = vsel %vm2586_vm15, %v3522_v60, %v2583_v44  ;;  %vm2576_vm9 = vmor %vm2574_vm8, %vm2575_vm5 }
 0xf7a   :  { %v2570_v4 = vmul.f32 %v3526_v1, %v2569_v2  ;;  %v2600_v5 = vmul.f32 %v2587_v9, %v4301_v55  ;;  %v3286_v55 = vld [vmem:[%s4363_s3 + $0x18] sm:$0xff] }
 0xf7b   :  { %v2591_v32 = vmul.f32 0.5, %v2590_v15  ;;  %2705 = vmatpush.bf16.msrb.mxu2 %v3286_v55 }
 0xf7c   :  { %v2571_v12 = vmul.f32 0.5, %v2570_v4  ;;  %v2605_v14 = vmul.f32 %v2602_v53, %v2600_v5 }
 0xf7d   :  { %v2592_v58 = vsub.f32 1.5, %v2591_v32 }
 0xf7e   :  { %v2572_v19 = vsub.f32 1.5, %v2571_v12  ;;  %v2610_v18 = vadd.f32 %v2607_v39, %v2605_v14 }
 0xf7f   :  { %v2593_v54 = vmul.f32 %v3524_v59, %v2592_v58  ;;  %2706 = vmatpush.bf16.msrb.mxu2 %v3285_v63 }
 0xf80   :  { %v2573_v43 = vmul.f32 %v3526_v1, %v2572_v19 }
 0xf81   :  { %v2597_v56 = vsel %vm2596_vm7, %v3524_v59, %v2593_v54 }
 0xf82   :  { %v2601_v34 = vmul.f32 %v2597_v56, %v4307_v3  ;;  %v2577_v46 = vsel %vm2576_vm9, %v3526_v1, %v2573_v43 }
 0xf83   :  { %v2599_v26 = vmul.f32 %v2577_v46, %v4309_v0  ;;  %v2608_v0 = vadd.f32 %v2607_v39, %v2603_v28  ;;  %2707 = vmatpush.bf16.msrb.mxu2 %v3284_v22 }
 0xf84   :  { %v2606_v16 = vmul.f32 %v2602_v53, %v2601_v34 }
 0xf85   :  { %v2604_v17 = vmul.f32 %v2602_v53, %v2599_v26 }
 0xf86   :  { %v2611_v25 = vadd.f32 %v2607_v39, %v2606_v16 }
 0xf87   :  { %v2609_v35 = vadd.f32 %v2607_v39, %v2604_v17 }
 0xf88   :  { %v2615_v3 = vpack.c.bf16 %v2611_v25, %v2610_v18 }
 0xf89   :  { %v2614_v37 = vpack.c.bf16 %v2609_v35, %v2608_v0 }
 0xf8a   :  { %2625 = vmatpush.bf16.msrb.mxu1 %v2615_v3 }
 0xf8e   :  { %2626 = vmatpush.bf16.msrb.mxu1 %v2614_v37 }
 0xf91   :  { %3154 = vmatmul.msk.bf16.vlgmr.msrb.gmra.mxu1 %vm362_vm1, %v2613_v7 }
0x100e   :  { %v2628_v41 = vpop.f32.mrf.mxu1 }
0x100f   :  { %v2648_v33 = vpack.c.bf16 %v2628_v41, %v2628_v41 }
0x1011   :  { %2708 = vmatmul.bf16.vlgmr.msrb.gmra.mxu2 %v2648_v33 }
0x1016   :  { %v2630_v45 = vpop.f32.mrf.mxu1 }
0x1094   :  { %v2709_v31 = vpop.f32.mrf.mxu2 }
0x1095   :  { %v2710_v30 = vadd.f32 %v3364_v42, %v2709_v31 }
0x1097   :  { %2713 = vst [vmem:[#allocation8] sm:$0xff] %v2710_v30 }
0x1098   :  { %2724 = dma.vmem_to_hbm [thread:$0]  %s2720_s8, 128, %s2722_s10, [#allocation4]  }
0x109c   :  { %v2711_v24 = vpop.f32.mrf.mxu2 }
0x109d   :  { %3633 = dma.done.wait [#allocation4], 128  }
0x109e   :  { %3634 = vsyncadd [#allocation4], 4294967168 }
0x109f   :  { %2729 = vsyncpa [#allocation3], 1 }
0x10a0   :  { %2730 = vsyncpa [#allocation6], 1 }
0x10a1   :  { %2731 = vsyncpa [#allocation4], 1 }

</bundles_post_ra>
